<compile_context>
chip_gen: v7x
topology: tpu7x:2x2x1
jax: 0.10.0
libtpu: 0.0.40
codegen_flags: <defaults>
</compile_context>

<pallas_src>
import jax
import jax.numpy as jnp
from jax.experimental import pallas as pl
from jax.experimental.pallas import tpu as pltpu

# ------------------------- problem sizes (small, consistent with module) ----
B = 2          # batch
T = 128        # number of query points per batch element
POINT_DIM = 3
Z_DIM = 32
HIDDEN = 128
N_BLOCKS = 5
NEG_SLOPE = 0.2

_HI = jax.lax.Precision.HIGHEST   # reference-only: true-f32 dots for validation


def decoder_kernel(p_ref, z_ref,
                   wp_ref, wz_ref, bpz_ref,
                   w0_ref, b0_ref, w1_ref, b1_ref,
                   wo_ref, bo_ref,
                   out_ref):
    # p_ref: (TM, 3) f32; z_ref: (TM, Z_DIM) bf16 (rows pre-broadcast per batch).
    p = p_ref[...]

    # fc_p: K=3 is a degenerate MXU shape -> 3 broadcast FMAs on the VPU (f32).
    net = (p[:, 0:1] * wp_ref[0:1, :]
           + p[:, 1:2] * wp_ref[1:2, :]
           + p[:, 2:3] * wp_ref[2:3, :])                         # (TM, H) f32

    # fc_z: one well-shaped (TM, Z) x (Z, H) bf16 MXU matmul, f32 accumulation.
    # Bias is the pre-fused (bp + bz) row.
    net = net + jnp.dot(z_ref[...], wz_ref[...],
                        preferred_element_type=jnp.float32) + bpz_ref[...]

    # 5x ResnetBlockFC(hidden): residual stream stays f32; only MXU operands bf16.
    for i in range(N_BLOCKS):                                    # static unroll
        h = jnp.maximum(net, 0.0).astype(jnp.bfloat16)           # actvn(x)
        h = jnp.dot(h, w0_ref[i], preferred_element_type=jnp.float32) + b0_ref[i]
        h = jnp.maximum(h, 0.0).astype(jnp.bfloat16)             # actvn(net)
        dx = jnp.dot(h, w1_ref[i], preferred_element_type=jnp.float32) + b1_ref[i]
        net = net + dx                                           # identity shortcut

    # LeakyReLU(0.2), then Linear(hidden, 1) as VPU multiply + lane reduction
    # (avoids an N=1 matmul and produces a lane-dense (1, TM) store).
    net = jnp.where(net > 0, net, NEG_SLOPE * net)
    out_vec = jnp.sum(net * wo_ref[...], axis=-1)                # (TM,) f32
    out_ref[...] = out_vec[None, :] + bo_ref[...]                # (1, TM), lane-dense


def occ_simple_decoder(p, z, params, tile_m=None):
    (wp, bp, wz, bz, w0, b0, w1, b1, wo, bo) = params
    Bb, Tt, pd = p.shape
    zd = z.shape[-1]
    M = Bb * Tt
    if tile_m is None:
        tile_m = M                      # grid=(1,): single step, M=256 fills the MXU
    assert M % tile_m == 0 and tile_m % 8 == 0

    # Fuse batch into M; pre-broadcast z rows (tiny: M*Z_DIM*2 bytes).
    p_flat = p.reshape(M, pd)
    z_rows = jnp.repeat(z, Tt, axis=0).astype(jnp.bfloat16)      # (M, Z_DIM)

    # bf16 weight copies for the MXU; biases / fc_p / final projection stay f32.
    wz_b = wz.astype(jnp.bfloat16)
    w0_b = w0.astype(jnp.bfloat16)
    w1_b = w1.astype(jnp.bfloat16)
    bpz = (bp + bz).reshape(1, -1)      # fused fc_p + fc_z bias (f32)
    wo_row = wo.reshape(1, -1)          # (H, 1) -> (1, H)
    bo2 = bo.reshape(1, 1)

    grid = (M // tile_m,)
    const = lambda shape: pl.BlockSpec(shape, lambda i: tuple(0 for _ in shape))

    out = pl.pallas_call(
        decoder_kernel,
        out_shape=jax.ShapeDtypeStruct((1, M), jnp.float32),
        grid_spec=pltpu.PrefetchScalarGridSpec(
            num_scalar_prefetch=0,
            grid=grid,
            in_specs=[
                pl.BlockSpec((tile_m, pd), lambda i: (i, 0)),    # p (fused rows)
                pl.BlockSpec((tile_m, zd), lambda i: (i, 0)),    # z (broadcast rows)
                const(wp.shape),
                const(wz_b.shape), const(bpz.shape),
                const(w0_b.shape), const(b0.shape),
                const(w1_b.shape), const(b1.shape),
                const(wo_row.shape), const(bo2.shape),
            ],
            out_specs=pl.BlockSpec((1, tile_m), lambda i: (0, i)),
        ),
        compiler_params=pltpu.CompilerParams(
            dimension_semantics=("parallel",)),
    )(p_flat, z_rows, wp, wz_b, bpz, w0_b, b0, w1_b, b1, wo_row, bo2)
    return out.reshape(Bb, Tt)


def reference(p, z, params, matmul_dtype=jnp.float32):
    """Pure-JAX reference. matmul_dtype=bf16 mirrors the kernel's MXU-operand
    casts (path-exact check); matmul_dtype=f32 is the full-f32 PyTorch-equivalent."""
    (wp, bp, wz, bz, w0, b0, w1, b1, wo, bo) = params
    md = matmul_dtype
    net = jnp.dot(p, wp, precision=_HI) + bp
    net_z = jnp.dot(z.astype(md), wz.astype(md), precision=_HI,
                    preferred_element_type=jnp.float32) + bz
    net = net + net_z[:, None, :]
    for i in range(N_BLOCKS):
        h = jnp.dot(jnp.maximum(net, 0.0).astype(md), w0[i].astype(md),
                    precision=_HI, preferred_element_type=jnp.float32) + b0[i]
        dx = jnp.dot(jnp.maximum(h, 0.0).astype(md), w1[i].astype(md),
                     precision=_HI, preferred_element_type=jnp.float32) + b1[i]
        net = net + dx
    net = jnp.where(net > 0, net, NEG_SLOPE * net)
    out = jnp.dot(net, wo, precision=_HI) + bo
    return out[..., 0]


def init_params(key):
    # Deterministic synthetic init (weights as (in, out)).
    # TODO(synk): occupancy-net ResnetBlockFC zero-inits fc_1 weights; random
    # values are used here so the kernel's compute path is non-trivial.
    ks = jax.random.split(key, 16)
    s = 0.1
    wp = jax.random.normal(ks[0], (POINT_DIM, HIDDEN), jnp.float32) * s
    bp = jax.random.normal(ks[1], (HIDDEN,), jnp.float32) * s
    wz = jax.random.normal(ks[2], (Z_DIM, HIDDEN), jnp.float32) * s
    bz = jax.random.normal(ks[3], (HIDDEN,), jnp.float32) * s
    w0 = jax.random.normal(ks[4], (N_BLOCKS, HIDDEN, HIDDEN), jnp.float32) * s
    b0 = jax.random.normal(ks[5], (N_BLOCKS, HIDDEN), jnp.float32) * s
    w1 = jax.random.normal(ks[6], (N_BLOCKS, HIDDEN, HIDDEN), jnp.float32) * s
    b1 = jax.random.normal(ks[7], (N_BLOCKS, HIDDEN), jnp.float32) * s
    wo = jax.random.normal(ks[8], (HIDDEN, 1), jnp.float32) * s
    bo = jax.random.normal(ks[9], (1,), jnp.float32) * s
    return (wp, bp, wz, bz, w0, b0, w1, b1, wo, bo)


if __name__ == "__main__":
    key = jax.random.PRNGKey(0)
    kp, kz, kw = jax.random.split(key, 3)
    p = jax.random.normal(kp, (B, T, POINT_DIM), jnp.float32)
    z = jax.random.normal(kz, (B, Z_DIM), jnp.float32)
    params = init_params(kw)

    out = occ_simple_decoder(p, z, params)
    out = jax.block_until_ready(out)
    assert out.shape == (B, T), out.shape

    # 1) Path-exact check: reference with the same bf16 MXU-operand casts as the
    #    kernel (differences are only f32 accumulation order / FMA contraction).
    ref_mixed = reference(p, z, params, matmul_dtype=jnp.bfloat16)
    err_mixed = float(jnp.max(jnp.abs(out - ref_mixed)))
    assert jnp.allclose(out, ref_mixed, atol=5e-3, rtol=5e-3), err_mixed

    # 2) Fidelity check vs the full-f32 PyTorch-equivalent forward: bf16 matmul
    #    operands cost ~1e-2 absolute at these magnitudes (expected), so this
    #    bound is intentionally loose.
    ref_f32 = reference(p, z, params, matmul_dtype=jnp.float32)
    err_f32 = float(jnp.max(jnp.abs(out - ref_f32)))
    assert jnp.allclose(out, ref_f32, atol=1e-1, rtol=1e-1), err_f32

    print("KERNEL_OK")
</pallas_src>

<mosaic_0001>
module attributes {stable_mosaic.version = 11 : i64} {
  func.func @decoder_kernel(%arg0: i32, %arg1: memref<256x3xf32, #tpu.memory_space<vmem>>, %arg2: memref<256x32xbf16, #tpu.memory_space<vmem>>, %arg3: memref<3x128xf32, #tpu.memory_space<vmem>>, %arg4: memref<32x128xbf16, #tpu.memory_space<vmem>>, %arg5: memref<1x128xf32, #tpu.memory_space<vmem>>, %arg6: memref<5x128x128xbf16, #tpu.memory_space<vmem>>, %arg7: memref<5x128xf32, #tpu.memory_space<vmem>>, %arg8: memref<5x128x128xbf16, #tpu.memory_space<vmem>>, %arg9: memref<5x128xf32, #tpu.memory_space<vmem>>, %arg10: memref<1x128xf32, #tpu.memory_space<vmem>>, %arg11: memref<1x1xf32, #tpu.memory_space<vmem>>, %arg12: memref<1x256xf32, #tpu.memory_space<vmem>>) attributes {dimension_semantics = [#tpu.dimension_semantics<parallel>], iteration_bounds = array<i64: 1>, scalar_prefetch = 0 : i64, scratch_operands = 0 : i64, tpu.core_type = #tpu.core_type<tc>, window_params = [{transform_indices = @transform_0, window_bounds = array<i64: 256, 3>}, {transform_indices = @transform_1, window_bounds = array<i64: 256, 32>}, {pipeline_mode = #tpu.pipeline_mode<synchronous>, transform_indices = @transform_2, window_bounds = array<i64: 3, 128>}, {pipeline_mode = #tpu.pipeline_mode<synchronous>, transform_indices = @transform_3, window_bounds = array<i64: 32, 128>}, {pipeline_mode = #tpu.pipeline_mode<synchronous>, transform_indices = @transform_4, window_bounds = array<i64: 1, 128>}, {pipeline_mode = #tpu.pipeline_mode<synchronous>, transform_indices = @transform_5, window_bounds = array<i64: 5, 128, 128>}, {pipeline_mode = #tpu.pipeline_mode<synchronous>, transform_indices = @transform_6, window_bounds = array<i64: 5, 128>}, {pipeline_mode = #tpu.pipeline_mode<synchronous>, transform_indices = @transform_7, window_bounds = array<i64: 5, 128, 128>}, {pipeline_mode = #tpu.pipeline_mode<synchronous>, transform_indices = @transform_8, window_bounds = array<i64: 5, 128>}, {pipeline_mode = #tpu.pipeline_mode<synchronous>, transform_indices = @transform_9, window_bounds = array<i64: 1, 128>}, {pipeline_mode = #tpu.pipeline_mode<synchronous>, transform_indices = @transform_10, window_bounds = array<i64: 1, 1>}, {transform_indices = @transform_11, window_bounds = array<i64: 1, 256>}]} {
    %c0 = arith.constant 0 : index
    %c0_0 = arith.constant 0 : index
    %0 = vector.load %arg1[%c0, %c0_0] : memref<256x3xf32, #tpu.memory_space<vmem>>, vector<256x3xf32>
    %1 = vector.extract_strided_slice %0 {offsets = [0, 0], sizes = [256, 1], strides = [1, 1]} : vector<256x3xf32> to vector<256x1xf32>
    %c0_1 = arith.constant 0 : index
    %c0_2 = arith.constant 0 : index
    %2 = vector.load %arg3[%c0_1, %c0_2] : memref<3x128xf32, #tpu.memory_space<vmem>>, vector<1x128xf32>
    %3 = vector.broadcast %1 : vector<256x1xf32> to vector<256x128xf32>
    %4 = vector.broadcast %2 : vector<1x128xf32> to vector<256x128xf32>
    %5 = arith.mulf %3, %4 : vector<256x128xf32>
    %6 = vector.extract_strided_slice %0 {offsets = [0, 1], sizes = [256, 1], strides = [1, 1]} : vector<256x3xf32> to vector<256x1xf32>
    %c1 = arith.constant 1 : index
    %c0_3 = arith.constant 0 : index
    %7 = vector.load %arg3[%c1, %c0_3] : memref<3x128xf32, #tpu.memory_space<vmem>>, vector<1x128xf32>
    %8 = vector.broadcast %6 : vector<256x1xf32> to vector<256x128xf32>
    %9 = vector.broadcast %7 : vector<1x128xf32> to vector<256x128xf32>
    %10 = arith.mulf %8, %9 : vector<256x128xf32>
    %11 = arith.addf %5, %10 : vector<256x128xf32>
    %12 = vector.extract_strided_slice %0 {offsets = [0, 2], sizes = [256, 1], strides = [1, 1]} : vector<256x3xf32> to vector<256x1xf32>
    %c2 = arith.constant 2 : index
    %c0_4 = arith.constant 0 : index
    %13 = vector.load %arg3[%c2, %c0_4] : memref<3x128xf32, #tpu.memory_space<vmem>>, vector<1x128xf32>
    %14 = vector.broadcast %12 : vector<256x1xf32> to vector<256x128xf32>
    %15 = vector.broadcast %13 : vector<1x128xf32> to vector<256x128xf32>
    %16 = arith.mulf %14, %15 : vector<256x128xf32>
    %17 = arith.addf %11, %16 : vector<256x128xf32>
    %c0_5 = arith.constant 0 : index
    %c0_6 = arith.constant 0 : index
    %18 = vector.load %arg2[%c0_5, %c0_6] : memref<256x32xbf16, #tpu.memory_space<vmem>>, vector<256x32xbf16>
    %c0_7 = arith.constant 0 : index
    %c0_8 = arith.constant 0 : index
    %19 = vector.load %arg4[%c0_7, %c0_8] : memref<32x128xbf16, #tpu.memory_space<vmem>>, vector<32x128xbf16>
    %cst = arith.constant dense<0.000000e+00> : vector<256x128xf32>
    %20 = tpu.matmul %18, %19, %cst {dimension_numbers = #tpu.dot_dimension_numbers<[1], [0], [0], [1], [0, 0, 1, 1], [], []>} : vector<256x32xbf16>, vector<32x128xbf16>, vector<256x128xf32> -> vector<256x128xf32>
    %21 = arith.addf %17, %20 : vector<256x128xf32>
    %c0_9 = arith.constant 0 : index
    %c0_10 = arith.constant 0 : index
    %22 = vector.load %arg5[%c0_9, %c0_10] : memref<1x128xf32, #tpu.memory_space<vmem>>, vector<1x128xf32>
    %23 = vector.broadcast %22 : vector<1x128xf32> to vector<256x128xf32>
    %24 = arith.addf %21, %23 : vector<256x128xf32>
    %cst_11 = arith.constant 0.000000e+00 : f32
    %25 = vector.broadcast %cst_11 : f32 to vector<256x128xf32>
    %26 = arith.maximumf %24, %25 : vector<256x128xf32>
    %27 = arith.truncf %26 : vector<256x128xf32> to vector<256x128xbf16>
    %c0_12 = arith.constant 0 : index
    %c0_13 = arith.constant 0 : index
    %c0_14 = arith.constant 0 : index
    %28 = vector.load %arg6[%c0_12, %c0_13, %c0_14] : memref<5x128x128xbf16, #tpu.memory_space<vmem>>, vector<1x128x128xbf16>
    %29 = vector.shape_cast %28 : vector<1x128x128xbf16> to vector<128x128xbf16>
    %cst_15 = arith.constant dense<0.000000e+00> : vector<256x128xf32>
    %30 = tpu.matmul %27, %29, %cst_15 {dimension_numbers = #tpu.dot_dimension_numbers<[1], [0], [0], [1], [0, 0, 1, 1], [], []>} : vector<256x128xbf16>, vector<128x128xbf16>, vector<256x128xf32> -> vector<256x128xf32>
    %c0_16 = arith.constant 0 : index
    %c0_17 = arith.constant 0 : index
    %31 = vector.load %arg7[%c0_16, %c0_17] : memref<5x128xf32, #tpu.memory_space<vmem>>, vector<1x128xf32>
    %32 = vector.shape_cast %31 : vector<1x128xf32> to vector<128xf32>
    %33 = vector.shape_cast %32 : vector<128xf32> to vector<1x128xf32>
    %34 = vector.broadcast %33 : vector<1x128xf32> to vector<256x128xf32>
    %35 = arith.addf %30, %34 : vector<256x128xf32>
    %cst_18 = arith.constant 0.000000e+00 : f32
    %36 = vector.broadcast %cst_18 : f32 to vector<256x128xf32>
    %37 = arith.maximumf %35, %36 : vector<256x128xf32>
    %38 = arith.truncf %37 : vector<256x128xf32> to vector<256x128xbf16>
    %c0_19 = arith.constant 0 : index
    %c0_20 = arith.constant 0 : index
    %c0_21 = arith.constant 0 : index
    %39 = vector.load %arg8[%c0_19, %c0_20, %c0_21] : memref<5x128x128xbf16, #tpu.memory_space<vmem>>, vector<1x128x128xbf16>
    %40 = vector.shape_cast %39 : vector<1x128x128xbf16> to vector<128x128xbf16>
    %cst_22 = arith.constant dense<0.000000e+00> : vector<256x128xf32>
    %41 = tpu.matmul %38, %40, %cst_22 {dimension_numbers = #tpu.dot_dimension_numbers<[1], [0], [0], [1], [0, 0, 1, 1], [], []>} : vector<256x128xbf16>, vector<128x128xbf16>, vector<256x128xf32> -> vector<256x128xf32>
    %c0_23 = arith.constant 0 : index
    %c0_24 = arith.constant 0 : index
    %42 = vector.load %arg9[%c0_23, %c0_24] : memref<5x128xf32, #tpu.memory_space<vmem>>, vector<1x128xf32>
    %43 = vector.shape_cast %42 : vector<1x128xf32> to vector<128xf32>
    %44 = vector.shape_cast %43 : vector<128xf32> to vector<1x128xf32>
    %45 = vector.broadcast %44 : vector<1x128xf32> to vector<256x128xf32>
    %46 = arith.addf %41, %45 : vector<256x128xf32>
    %47 = arith.addf %24, %46 : vector<256x128xf32>
    %cst_25 = arith.constant 0.000000e+00 : f32
    %48 = vector.broadcast %cst_25 : f32 to vector<256x128xf32>
    %49 = arith.maximumf %47, %48 : vector<256x128xf32>
    %50 = arith.truncf %49 : vector<256x128xf32> to vector<256x128xbf16>
    %c1_26 = arith.constant 1 : index
    %c0_27 = arith.constant 0 : index
    %c0_28 = arith.constant 0 : index
    %51 = vector.load %arg6[%c1_26, %c0_27, %c0_28] : memref<5x128x128xbf16, #tpu.memory_space<vmem>>, vector<1x128x128xbf16>
    %52 = vector.shape_cast %51 : vector<1x128x128xbf16> to vector<128x128xbf16>
    %cst_29 = arith.constant dense<0.000000e+00> : vector<256x128xf32>
    %53 = tpu.matmul %50, %52, %cst_29 {dimension_numbers = #tpu.dot_dimension_numbers<[1], [0], [0], [1], [0, 0, 1, 1], [], []>} : vector<256x128xbf16>, vector<128x128xbf16>, vector<256x128xf32> -> vector<256x128xf32>
    %c1_30 = arith.constant 1 : index
    %c0_31 = arith.constant 0 : index
    %54 = vector.load %arg7[%c1_30, %c0_31] : memref<5x128xf32, #tpu.memory_space<vmem>>, vector<1x128xf32>
    %55 = vector.shape_cast %54 : vector<1x128xf32> to vector<128xf32>
    %56 = vector.shape_cast %55 : vector<128xf32> to vector<1x128xf32>
    %57 = vector.broadcast %56 : vector<1x128xf32> to vector<256x128xf32>
    %58 = arith.addf %53, %57 : vector<256x128xf32>
    %cst_32 = arith.constant 0.000000e+00 : f32
    %59 = vector.broadcast %cst_32 : f32 to vector<256x128xf32>
    %60 = arith.maximumf %58, %59 : vector<256x128xf32>
    %61 = arith.truncf %60 : vector<256x128xf32> to vector<256x128xbf16>
    %c1_33 = arith.constant 1 : index
    %c0_34 = arith.constant 0 : index
    %c0_35 = arith.constant 0 : index
    %62 = vector.load %arg8[%c1_33, %c0_34, %c0_35] : memref<5x128x128xbf16, #tpu.memory_space<vmem>>, vector<1x128x128xbf16>
    %63 = vector.shape_cast %62 : vector<1x128x128xbf16> to vector<128x128xbf16>
    %cst_36 = arith.constant dense<0.000000e+00> : vector<256x128xf32>
    %64 = tpu.matmul %61, %63, %cst_36 {dimension_numbers = #tpu.dot_dimension_numbers<[1], [0], [0], [1], [0, 0, 1, 1], [], []>} : vector<256x128xbf16>, vector<128x128xbf16>, vector<256x128xf32> -> vector<256x128xf32>
    %c1_37 = arith.constant 1 : index
    %c0_38 = arith.constant 0 : index
    %65 = vector.load %arg9[%c1_37, %c0_38] : memref<5x128xf32, #tpu.memory_space<vmem>>, vector<1x128xf32>
    %66 = vector.shape_cast %65 : vector<1x128xf32> to vector<128xf32>
    %67 = vector.shape_cast %66 : vector<128xf32> to vector<1x128xf32>
    %68 = vector.broadcast %67 : vector<1x128xf32> to vector<256x128xf32>
    %69 = arith.addf %64, %68 : vector<256x128xf32>
    %70 = arith.addf %47, %69 : vector<256x128xf32>
    %cst_39 = arith.constant 0.000000e+00 : f32
    %71 = vector.broadcast %cst_39 : f32 to vector<256x128xf32>
    %72 = arith.maximumf %70, %71 : vector<256x128xf32>
    %73 = arith.truncf %72 : vector<256x128xf32> to vector<256x128xbf16>
    %c2_40 = arith.constant 2 : index
    %c0_41 = arith.constant 0 : index
    %c0_42 = arith.constant 0 : index
    %74 = vector.load %arg6[%c2_40, %c0_41, %c0_42] : memref<5x128x128xbf16, #tpu.memory_space<vmem>>, vector<1x128x128xbf16>
    %75 = vector.shape_cast %74 : vector<1x128x128xbf16> to vector<128x128xbf16>
    %cst_43 = arith.constant dense<0.000000e+00> : vector<256x128xf32>
    %76 = tpu.matmul %73, %75, %cst_43 {dimension_numbers = #tpu.dot_dimension_numbers<[1], [0], [0], [1], [0, 0, 1, 1], [], []>} : vector<256x128xbf16>, vector<128x128xbf16>, vector<256x128xf32> -> vector<256x128xf32>
    %c2_44 = arith.constant 2 : index
    %c0_45 = arith.constant 0 : index
    %77 = vector.load %arg7[%c2_44, %c0_45] : memref<5x128xf32, #tpu.memory_space<vmem>>, vector<1x128xf32>
    %78 = vector.shape_cast %77 : vector<1x128xf32> to vector<128xf32>
    %79 = vector.shape_cast %78 : vector<128xf32> to vector<1x128xf32>
    %80 = vector.broadcast %79 : vector<1x128xf32> to vector<256x128xf32>
    %81 = arith.addf %76, %80 : vector<256x128xf32>
    %cst_46 = arith.constant 0.000000e+00 : f32
    %82 = vector.broadcast %cst_46 : f32 to vector<256x128xf32>
    %83 = arith.maximumf %81, %82 : vector<256x128xf32>
    %84 = arith.truncf %83 : vector<256x128xf32> to vector<256x128xbf16>
    %c2_47 = arith.constant 2 : index
    %c0_48 = arith.constant 0 : index
    %c0_49 = arith.constant 0 : index
    %85 = vector.load %arg8[%c2_47, %c0_48, %c0_49] : memref<5x128x128xbf16, #tpu.memory_space<vmem>>, vector<1x128x128xbf16>
    %86 = vector.shape_cast %85 : vector<1x128x128xbf16> to vector<128x128xbf16>
    %cst_50 = arith.constant dense<0.000000e+00> : vector<256x128xf32>
    %87 = tpu.matmul %84, %86, %cst_50 {dimension_numbers = #tpu.dot_dimension_numbers<[1], [0], [0], [1], [0, 0, 1, 1], [], []>} : vector<256x128xbf16>, vector<128x128xbf16>, vector<256x128xf32> -> vector<256x128xf32>
    %c2_51 = arith.constant 2 : index
    %c0_52 = arith.constant 0 : index
    %88 = vector.load %arg9[%c2_51, %c0_52] : memref<5x128xf32, #tpu.memory_space<vmem>>, vector<1x128xf32>
    %89 = vector.shape_cast %88 : vector<1x128xf32> to vector<128xf32>
    %90 = vector.shape_cast %89 : vector<128xf32> to vector<1x128xf32>
    %91 = vector.broadcast %90 : vector<1x128xf32> to vector<256x128xf32>
    %92 = arith.addf %87, %91 : vector<256x128xf32>
    %93 = arith.addf %70, %92 : vector<256x128xf32>
    %cst_53 = arith.constant 0.000000e+00 : f32
    %94 = vector.broadcast %cst_53 : f32 to vector<256x128xf32>
    %95 = arith.maximumf %93, %94 : vector<256x128xf32>
    %96 = arith.truncf %95 : vector<256x128xf32> to vector<256x128xbf16>
    %c3 = arith.constant 3 : index
    %c0_54 = arith.constant 0 : index
    %c0_55 = arith.constant 0 : index
    %97 = vector.load %arg6[%c3, %c0_54, %c0_55] : memref<5x128x128xbf16, #tpu.memory_space<vmem>>, vector<1x128x128xbf16>
    %98 = vector.shape_cast %97 : vector<1x128x128xbf16> to vector<128x128xbf16>
    %cst_56 = arith.constant dense<0.000000e+00> : vector<256x128xf32>
    %99 = tpu.matmul %96, %98, %cst_56 {dimension_numbers = #tpu.dot_dimension_numbers<[1], [0], [0], [1], [0, 0, 1, 1], [], []>} : vector<256x128xbf16>, vector<128x128xbf16>, vector<256x128xf32> -> vector<256x128xf32>
    %c3_57 = arith.constant 3 : index
    %c0_58 = arith.constant 0 : index
    %100 = vector.load %arg7[%c3_57, %c0_58] : memref<5x128xf32, #tpu.memory_space<vmem>>, vector<1x128xf32>
    %101 = vector.shape_cast %100 : vector<1x128xf32> to vector<128xf32>
    %102 = vector.shape_cast %101 : vector<128xf32> to vector<1x128xf32>
    %103 = vector.broadcast %102 : vector<1x128xf32> to vector<256x128xf32>
    %104 = arith.addf %99, %103 : vector<256x128xf32>
    %cst_59 = arith.constant 0.000000e+00 : f32
    %105 = vector.broadcast %cst_59 : f32 to vector<256x128xf32>
    %106 = arith.maximumf %104, %105 : vector<256x128xf32>
    %107 = arith.truncf %106 : vector<256x128xf32> to vector<256x128xbf16>
    %c3_60 = arith.constant 3 : index
    %c0_61 = arith.constant 0 : index
    %c0_62 = arith.constant 0 : index
    %108 = vector.load %arg8[%c3_60, %c0_61, %c0_62] : memref<5x128x128xbf16, #tpu.memory_space<vmem>>, vector<1x128x128xbf16>
    %109 = vector.shape_cast %108 : vector<1x128x128xbf16> to vector<128x128xbf16>
    %cst_63 = arith.constant dense<0.000000e+00> : vector<256x128xf32>
    %110 = tpu.matmul %107, %109, %cst_63 {dimension_numbers = #tpu.dot_dimension_numbers<[1], [0], [0], [1], [0, 0, 1, 1], [], []>} : vector<256x128xbf16>, vector<128x128xbf16>, vector<256x128xf32> -> vector<256x128xf32>
    %c3_64 = arith.constant 3 : index
    %c0_65 = arith.constant 0 : index
    %111 = vector.load %arg9[%c3_64, %c0_65] : memref<5x128xf32, #tpu.memory_space<vmem>>, vector<1x128xf32>
    %112 = vector.shape_cast %111 : vector<1x128xf32> to vector<128xf32>
    %113 = vector.shape_cast %112 : vector<128xf32> to vector<1x128xf32>
    %114 = vector.broadcast %113 : vector<1x128xf32> to vector<256x128xf32>
    %115 = arith.addf %110, %114 : vector<256x128xf32>
    %116 = arith.addf %93, %115 : vector<256x128xf32>
    %cst_66 = arith.constant 0.000000e+00 : f32
    %117 = vector.broadcast %cst_66 : f32 to vector<256x128xf32>
    %118 = arith.maximumf %116, %117 : vector<256x128xf32>
    %119 = arith.truncf %118 : vector<256x128xf32> to vector<256x128xbf16>
    %c4 = arith.constant 4 : index
    %c0_67 = arith.constant 0 : index
    %c0_68 = arith.constant 0 : index
    %120 = vector.load %arg6[%c4, %c0_67, %c0_68] : memref<5x128x128xbf16, #tpu.memory_space<vmem>>, vector<1x128x128xbf16>
    %121 = vector.shape_cast %120 : vector<1x128x128xbf16> to vector<128x128xbf16>
    %cst_69 = arith.constant dense<0.000000e+00> : vector<256x128xf32>
    %122 = tpu.matmul %119, %121, %cst_69 {dimension_numbers = #tpu.dot_dimension_numbers<[1], [0], [0], [1], [0, 0, 1, 1], [], []>} : vector<256x128xbf16>, vector<128x128xbf16>, vector<256x128xf32> -> vector<256x128xf32>
    %c4_70 = arith.constant 4 : index
    %c0_71 = arith.constant 0 : index
    %123 = vector.load %arg7[%c4_70, %c0_71] : memref<5x128xf32, #tpu.memory_space<vmem>>, vector<1x128xf32>
    %124 = vector.shape_cast %123 : vector<1x128xf32> to vector<128xf32>
    %125 = vector.shape_cast %124 : vector<128xf32> to vector<1x128xf32>
    %126 = vector.broadcast %125 : vector<1x128xf32> to vector<256x128xf32>
    %127 = arith.addf %122, %126 : vector<256x128xf32>
    %cst_72 = arith.constant 0.000000e+00 : f32
    %128 = vector.broadcast %cst_72 : f32 to vector<256x128xf32>
    %129 = arith.maximumf %127, %128 : vector<256x128xf32>
    %130 = arith.truncf %129 : vector<256x128xf32> to vector<256x128xbf16>
    %c4_73 = arith.constant 4 : index
    %c0_74 = arith.constant 0 : index
    %c0_75 = arith.constant 0 : index
    %131 = vector.load %arg8[%c4_73, %c0_74, %c0_75] : memref<5x128x128xbf16, #tpu.memory_space<vmem>>, vector<1x128x128xbf16>
    %132 = vector.shape_cast %131 : vector<1x128x128xbf16> to vector<128x128xbf16>
    %cst_76 = arith.constant dense<0.000000e+00> : vector<256x128xf32>
    %133 = tpu.matmul %130, %132, %cst_76 {dimension_numbers = #tpu.dot_dimension_numbers<[1], [0], [0], [1], [0, 0, 1, 1], [], []>} : vector<256x128xbf16>, vector<128x128xbf16>, vector<256x128xf32> -> vector<256x128xf32>
    %c4_77 = arith.constant 4 : index
    %c0_78 = arith.constant 0 : index
    %134 = vector.load %arg9[%c4_77, %c0_78] : memref<5x128xf32, #tpu.memory_space<vmem>>, vector<1x128xf32>
    %135 = vector.shape_cast %134 : vector<1x128xf32> to vector<128xf32>
    %136 = vector.shape_cast %135 : vector<128xf32> to vector<1x128xf32>
    %137 = vector.broadcast %136 : vector<1x128xf32> to vector<256x128xf32>
    %138 = arith.addf %133, %137 : vector<256x128xf32>
    %139 = arith.addf %116, %138 : vector<256x128xf32>
    %cst_79 = arith.constant 0.000000e+00 : f32
    %140 = vector.broadcast %cst_79 : f32 to vector<256x128xf32>
    %141 = arith.cmpf ogt, %139, %140 : vector<256x128xf32>
    %cst_80 = arith.constant 2.000000e-01 : f32
    %142 = vector.broadcast %cst_80 : f32 to vector<256x128xf32>
    %143 = arith.mulf %142, %139 : vector<256x128xf32>
    %144 = arith.select %141, %139, %143 : vector<256x128xi1>, vector<256x128xf32>
    %c0_81 = arith.constant 0 : index
    %c0_82 = arith.constant 0 : index
    %145 = vector.load %arg10[%c0_81, %c0_82] : memref<1x128xf32, #tpu.memory_space<vmem>>, vector<1x128xf32>
    %146 = vector.broadcast %145 : vector<1x128xf32> to vector<256x128xf32>
    %147 = arith.mulf %144, %146 : vector<256x128xf32>
    %cst_83 = arith.constant dense<0.000000e+00> : vector<256xf32>
    %148 = vector.multi_reduction <add>, %147, %cst_83 [1] : vector<256x128xf32> to vector<256xf32>
    %149 = vector.shape_cast %148 : vector<256xf32> to vector<1x256xf32>
    %c0_84 = arith.constant 0 : index
    %c0_85 = arith.constant 0 : index
    %150 = vector.load %arg11[%c0_84, %c0_85] : memref<1x1xf32, #tpu.memory_space<vmem>>, vector<1x1xf32>
    %151 = vector.broadcast %150 : vector<1x1xf32> to vector<1x256xf32>
    %152 = arith.addf %149, %151 : vector<1x256xf32>
    %c0_86 = arith.constant 0 : index
    %c0_87 = arith.constant 0 : index
    %153 = vector.load %arg12[%c0_86, %c0_87] : memref<1x256xf32, #tpu.memory_space<vmem>>, vector<1x256xf32>
    tpu.vector_store %arg12[%c0_86, %c0_87], %152 {strides = array<i32>} : memref<1x256xf32, #tpu.memory_space<vmem>>, vector<1x256xf32>,
    return
  }
  func.func @transform_0(%arg0: i32) -> (i32, i32) {
    %c0_i32 = arith.constant 0 : i32
    %c0_i32_0 = arith.constant 0 : i32
    return %arg0, %c0_i32 : i32, i32
  }
  func.func @transform_1(%arg0: i32) -> (i32, i32) {
    %c0_i32 = arith.constant 0 : i32
    %c0_i32_0 = arith.constant 0 : i32
    return %arg0, %c0_i32 : i32, i32
  }
  func.func @transform_2(%arg0: i32) -> (i32, i32) {
    %c0_i32 = arith.constant 0 : i32
    %c0_i32_0 = arith.constant 0 : i32
    %c0_i32_1 = arith.constant 0 : i32
    return %c0_i32, %c0_i32_0 : i32, i32
  }
  func.func @transform_3(%arg0: i32) -> (i32, i32) {
    %c0_i32 = arith.constant 0 : i32
    %c0_i32_0 = arith.constant 0 : i32
    %c0_i32_1 = arith.constant 0 : i32
    return %c0_i32, %c0_i32_0 : i32, i32
  }
  func.func @transform_4(%arg0: i32) -> (i32, i32) {
    %c0_i32 = arith.constant 0 : i32
    %c0_i32_0 = arith.constant 0 : i32
    %c0_i32_1 = arith.constant 0 : i32
    return %c0_i32, %c0_i32_0 : i32, i32
  }
  func.func @transform_5(%arg0: i32) -> (i32, i32, i32) {
    %c0_i32 = arith.constant 0 : i32
    %c0_i32_0 = arith.constant 0 : i32
    %c0_i32_1 = arith.constant 0 : i32
    %c0_i32_2 = arith.constant 0 : i32
    return %c0_i32, %c0_i32_0, %c0_i32_1 : i32, i32, i32
  }
  func.func @transform_6(%arg0: i32) -> (i32, i32) {
    %c0_i32 = arith.constant 0 : i32
    %c0_i32_0 = arith.constant 0 : i32
    %c0_i32_1 = arith.constant 0 : i32
    return %c0_i32, %c0_i32_0 : i32, i32
  }
  func.func @transform_7(%arg0: i32) -> (i32, i32, i32) {
    %c0_i32 = arith.constant 0 : i32
    %c0_i32_0 = arith.constant 0 : i32
    %c0_i32_1 = arith.constant 0 : i32
    %c0_i32_2 = arith.constant 0 : i32
    return %c0_i32, %c0_i32_0, %c0_i32_1 : i32, i32, i32
  }
  func.func @transform_8(%arg0: i32) -> (i32, i32) {
    %c0_i32 = arith.constant 0 : i32
    %c0_i32_0 = arith.constant 0 : i32
    %c0_i32_1 = arith.constant 0 : i32
    return %c0_i32, %c0_i32_0 : i32, i32
  }
  func.func @transform_9(%arg0: i32) -> (i32, i32) {
    %c0_i32 = arith.constant 0 : i32
    %c0_i32_0 = arith.constant 0 : i32
    %c0_i32_1 = arith.constant 0 : i32
    return %c0_i32, %c0_i32_0 : i32, i32
  }
  func.func @transform_10(%arg0: i32) -> (i32, i32) {
    %c0_i32 = arith.constant 0 : i32
    %c0_i32_0 = arith.constant 0 : i32
    %c0_i32_1 = arith.constant 0 : i32
    return %c0_i32, %c0_i32_0 : i32, i32
  }
  func.func @transform_11(%arg0: i32) -> (i32, i32) {
    %c0_i32 = arith.constant 0 : i32
    %c0_i32_0 = arith.constant 0 : i32
    return %c0_i32, %arg0 : i32, i32
  }
}

</mosaic_0001>

<bundles_post_ra>
// kernel: tpu_custom_call.1
= control target key start
LH: loop header
LB: loop body
LE: loop exit
PB: predicated region body
PF: predicated region fallthrough
CT: control target
= control target key end

     0   :  { %s11119_s0 = inlined_call_operand.vmem [shape: f32[256,3], index: 0, kind: input, shape index: {}]   ;;  %s11120_s1 = inlined_call_operand.vmem [shape: bf16[256,32], index: 1, kind: input, shape index: {}]   ;;  %s11121_s2 = inlined_call_operand.vmem [shape: f32[3,128], index: 2, kind: input, shape index: {}]   ;;  %s11122_s3 = inlined_call_operand.vmem [shape: bf16[32,128], index: 3, kind: input, shape index: {}]   ;;  %s11123_s4 = inlined_call_operand.vmem [shape: f32[1,128], index: 4, kind: input, shape index: {}]   ;;  %s11124_s5 = inlined_call_operand.vmem [shape: bf16[5,128,128], index: 5, kind: input, shape index: {}]   ;;  %s11125_s6 = inlined_call_operand.vmem [shape: f32[5,128], index: 6, kind: input, shape index: {}]   ;;  %s11126_s7 = inlined_call_operand.hbm [shape: bf16[5,128,128], index: 7, kind: input, shape index: {}]   ;;  %s11127_s8 = inlined_call_operand.vmem [shape: f32[5,128], index: 8, kind: input, shape index: {}]   ;;  %s11128_s9 = inlined_call_operand.vmem [shape: f32[1,128], index: 9, kind: input, shape index: {}]   ;;  %s11129_s10 = inlined_call_operand.<no memory space> [shape: f32[1,1], index: 10, kind: input, shape index: {}]   ;;  %s11130_s11 = inlined_call_operand.hbm [shape: f32[1,256], index: 11, kind: output, shape index: {}]  }
   0x1   :  { %v16_v0 = vstv %s11129_s10 }
   0x2   :  { %17 = vst [vmem:[#allocation2] sm:$0x1] %v16_v0 }
   0x3   :  { %18 = vsyncpa [#allocation4], 0 }
   0x4   :  { %19 = vsyncpa [#allocation5], 0  ;;  %s8394_s19 = smov [#allocation3]   ;;  %s8346_s23 = scalar_lea.hbm %s11126_s7, 5120 }
   0x5   :  { %s39_s20 = sshll.u32 %s8394_s19, 4  ;;  %p8347_p0 = scmp.ne.s32.totalorder %s11126_s7, %s8346_s23  ;;  %s40_s20 = int_to_ptr.vmem [resolvable:$true] %s39_s20 }
   0x6   :  { %p8350_p1 = scmp.lt.u32.totalorder %s8346_s23, %s11126_s7 }
   0x8   :  { %p8352_p2 = pnand %p8350_p1, %p8347_p0 }
   0xa   :  { %8355 = shalt.err (!%p8352_p2)
}
   0xb   :  { %s8356_s10 = scalar_lea.vmem %s40_s20, 5120  ;;  %p8361_p4 = scmp.lt.s32.totalorder %s40_s20, %s40_s20 }
   0xc   :  { %p8357_p3 = scmp.ne.s32.totalorder %s40_s20, %s8356_s10  ;;  %p8362_p5 = scmp.lt.s32.totalorder %s8356_s10, %s8356_s10 }
   0xe   :  { %p8363_p6 = por %p8362_p5, %p8361_p4 }
  0x10   :  { %p8364_p7 = pnand %p8363_p6, %p8357_p3 }
  0x12   :  { %8367 = shalt.err (!%p8364_p7)
}
  0x13   :  { %s8395_s28 = smov 64   ;;  %s8396_s29 = smov 4  }
  0x14   :  { %45 = dma.hbm_to_vmem [thread:$0]  %s11126_s7, 5120, %s40_s20, [#allocation4], %s8395_s28, %s8395_s28, %s8396_s29  }
  0x15   :  { %8390 = dma.done.wait [#allocation4], 5120  }
  0x16   :  { %8391 = vsyncadd [#allocation4], 4294962176  ;;  %v11134_v1 = vmov 1   ;;  %v8482_v2 = vld [vmem:[%s11119_s0 + $0x10] sm:$0xff]  ;;  %v8487_v3 = vld [vmem:[%s11119_s0] sm:$0xff]  ;;  %vm807_vm0 = vcmask 261120  }
  0x17   :  { %8204 = vset.pattern.permute.xlu0 %v11134_v1  ;;  %8202 = vset.pattern.permute.xlu1 %v11134_v1  ;;  %v8248_v4 = vld [vmem:[%s11122_s3] sm:$0xff]   ;;  %v8497_v5 = vld [vmem:[%s11119_s0 + $0x28] sm:$0xff]  ;;  %v8515_v9 = vld [vmem:[%s11119_s0 + $0x30] sm:$0xff]  ;;  %v11131_v13 = vmov 0   ;;  %v11133_v14 = vmov 2  }
  0x18   :  { %295 = vperm.xlu0 %8204, %v8482_v2   ;;  %287 = vperm.xlu1 %8202, %v8487_v3   ;;  %v8502_v6 = vld [vmem:[%s11119_s0 + $0x8] sm:$0xff]  ;;  %v8250_v8 = vld [vmem:[%s11120_s1] sm:$0xff]   ;;  %v59_v10 = vld [vmem:[%s11119_s0 + $0x18] sm:$0xff] }
  0x19   :  { %7674 = vmatprep.subr.bf16.mxu0 %v8248_v4  ;;  %v8249_v7 = vld [vmem:[%s11122_s3 + $0x8] sm:$0xff]   ;;  %8190 = vmatprep.subr.bf16.mxu1 %v8248_v4  ;;  %v8252_v12 = vld [vmem:[%s11120_s1 + $0x10] sm:$0xff]   ;;  %v8537_v15 = vld [vmem:[%s11119_s0 + $0x20] sm:$0xff] }
  0x1a   :  { %7675 = vmatpush3.bf16.msra.mxu0 %v8248_v4  ;;  %8192 = vmatpush3.bf16.msra.mxu1 %v8248_v4  ;;  %v8251_v11 = vld [vmem:[%s11120_s1 + $0x8] sm:$0xff]   ;;  %v8253_v16 = vld [vmem:[%s11120_s1 + $0x18] sm:$0xff]   ;;  %v8254_v17 = vld [vmem:[%s11120_s1 + $0x20] sm:$0xff]  }
  0x1b   :  { %7676 = vmatprep.subr.bf16.mxu0 %v8249_v7  ;;  %7678 = vmatprep.mubr.msk.bf16.mxu0 %vm807_vm0, %v8250_v8  ;;  %v8258_v18 = vld [vmem:[%s11120_s1 + $0x40] sm:$0xff]   ;;  %v8259_v19 = vld [vmem:[%s11120_s1 + $0x48] sm:$0xff]   ;;  %v63_v20 = vld [vmem:[%s11119_s0 + $0x38] sm:$0xff] }
  0x1c   :  { %307 = vperm.xlu0 %8204, %v8497_v5   ;;  %291 = vperm.xlu1 %8202, %v8502_v6   ;;  %v8260_v21 = vld [vmem:[%s11120_s1 + $0x50] sm:$0xff]   ;;  %v65_v22 = vld [vmem:[%s11119_s0 + $0x48] sm:$0xff]  ;;  %v8261_v24 = vld [vmem:[%s11120_s1 + $0x58] sm:$0xff]  }
  0x1d   :  { %8191 = vmatprep.subr.bf16.mxu1 %v8249_v7  ;;  %7694 = vmatprep.mubr.msk.bf16.mxu1 %vm807_vm0, %v8258_v18  ;;  %v8255_v23 = vld [vmem:[%s11120_s1 + $0x28] sm:$0xff]   ;;  %v8262_v25 = vld [vmem:[%s11120_s1 + $0x60] sm:$0xff]   ;;  %v8256_v26 = vld [vmem:[%s11120_s1 + $0x30] sm:$0xff]  }
  0x1e   :  { %7677 = vmatpush3.bf16.msra.mxu0 %v8249_v7  ;;  %8193 = vmatpush3.bf16.msra.mxu1 %v8249_v7  ;;  %v8584_v27 = vld [vmem:[%s11119_s0 + $0x60] sm:$0xff]  ;;  %v8263_v28 = vld [vmem:[%s11120_s1 + $0x68] sm:$0xff]   ;;  %v8596_v29 = vld [vmem:[%s11119_s0 + $0x78] sm:$0xff] }
  0x1f   :  { %v8257_v30 = vld [vmem:[%s11120_s1 + $0x38] sm:$0xff]   ;;  %v8607_v31 = vld [vmem:[%s11119_s0 + $0x88] sm:$0xff]  ;;  %v8616_v32 = vld [vmem:[%s11119_s0 + $0xa0] sm:$0xff] }
  0x20   :  { %311 = vperm.xlu0 %8204, %v8515_v9   ;;  %8203 = vset.pattern.permute.xlu1 %v11131_v13  ;;  %v8264_v33 = vld [vmem:[%s11120_s1 + $0x70] sm:$0xff]   ;;  %v8265_v34 = vld [vmem:[%s11120_s1 + $0x78] sm:$0xff]   ;;  %v8639_v36 = vld [vmem:[%s11119_s0 + $0xc8] sm:$0xff] }
  0x21   :  { %106 = vperm.xlu1 %8203, %v59_v10   ;;  %7679 = vmatmul.mubr.msk.bf16.vlgmr.msra.gmra.mrb[0].mxu0 %vm807_vm0, %v8251_v11  ;;  %v8630_v35 = vld [vmem:[%s11119_s0 + $0xb8] sm:$0xff]  ;;  %v64_v37 = vld [vmem:[%s11119_s0 + $0x40] sm:$0xff]  ;;  %v66_v38 = vld [vmem:[%s11119_s0 + $0x50] sm:$0xff] }
  0x22   :  { %7682 = vmatprep.mubr.msk.bf16.mxu0 %vm807_vm0, %v8252_v12  ;;  %7695 = vmatmul.mubr.msk.bf16.vlgmr.msra.gmra.mrb[0].mxu1 %vm807_vm0, %v8259_v19  ;;  %v8266_v39 = vld [vmem:[%s11124_s5] sm:$0xff]   ;;  %v67_v40 = vld [vmem:[%s11119_s0 + $0x58] sm:$0xff]  ;;  %v8267_v41 = vld [vmem:[%s11124_s5 + $0x8] sm:$0xff]  }
  0x23   :  { %7698 = vmatprep.mubr.msk.bf16.mxu1 %vm807_vm0, %v8260_v21  ;;  %7710 = vmatprep.subr.bf16.mxu1 %v8266_v39  ;;  %v8268_v42 = vld [vmem:[%s11124_s5 + $0x10] sm:$0xff]   ;;  %v8269_v44 = vld [vmem:[%s11124_s5 + $0x18] sm:$0xff]   ;;  %v8270_v45 = vld [vmem:[%s11124_s5 + $0x20] sm:$0xff]  }
  0x24   :  { %8210 = vset.pattern.permute.xlu0 %v11133_v14  ;;  %7711 = vmatpush3.bf16.msra.mxu1 %v8266_v39  ;;  %v8679_v43 = vld [vmem:[%s11119_s0 + $0x90] sm:$0xff]  ;;  %v8271_v46 = vld [vmem:[%s11124_s5 + $0x28] sm:$0xff]   ;;  %v8706_v49 = vld [vmem:[%s11119_s0 + $0xe0] sm:$0xff] }
  0x25   :  { %488 = vperm.xlu0 %8210, %v8502_v6   ;;  %8205 = vset.pattern.permute.xlu1 %v11134_v1  ;;  %v8697_v47 = vld [vmem:[%s11119_s0 + $0xd0] sm:$0xff]  ;;  %v69_v50 = vld [vmem:[%s11119_s0 + $0x68] sm:$0xff]  ;;  %v8273_v51 = vld [vmem:[%s11124_s5 + $0x38] sm:$0xff]  }
  0x26   :  { %299 = vperm.xlu1 %8205, %v59_v10   ;;  %7712 = vmatprep.subr.bf16.mxu1 %v8267_v41  ;;  %v8272_v48 = vld [vmem:[%s11124_s5 + $0x30] sm:$0xff]   ;;  %v8729_v53 = vld [vmem:[%s11119_s0 + $0xa8] sm:$0xff]  ;;  %v72_v59 = vld [vmem:[%s11119_s0 + $0x80] sm:$0xff] }
  0x27   :  { %v70_v52 = vld [vmem:[%s11119_s0 + $0x70] sm:$0xff]  ;;  %v8755_v60 = vld [vmem:[%s11119_s0 + $0xe8] sm:$0xff] }
  0x28   :  { %7713 = vmatpush3.bf16.msra.mxu1 %v8267_v41  ;;  %v8736_v54 = vld [vmem:[%s11119_s0 + $0xb0] sm:$0xff]  ;;  %v8872_v41 = vld [vmem:[%s11121_s2] ss:$0 sm:$0xff] }
  0x29   :  { %500 = vperm.xlu0 %8210, %v8537_v15   ;;  %7683 = vmatmul.mubr.msk.bf16.gmra.mrb[4].mxu0 %vm807_vm0, %v8253_v16  ;;  %v8766_v63 = vld [vmem:[%s11119_s0 + $0xf0] sm:$0xff] }
  0x2a   :  { %8206 = vset.pattern.permute.xlu1 %v11133_v14  ;;  %7686 = vmatprep.mubr.msk.bf16.mxu0 %vm807_vm0, %v8254_v17 }
  0x2b   :  { %484 = vperm.xlu1 %8206, %v8487_v3   ;;  %7699 = vmatmul.mubr.msk.bf16.gmra.mrb[4].mxu1 %vm807_vm0, %v8261_v24 }
  0x2c   :  { %7702 = vmatprep.mubr.msk.bf16.mxu1 %vm807_vm0, %v8262_v25  ;;  %7714 = vmatprep.subr.bf16.mxu1 %v8268_v42 }
  0x2d   :  { %512 = vperm.xlu0 %8210, %v63_v20   ;;  %7715 = vmatpush3.bf16.msra.mxu1 %v8268_v42 }
  0x2e   :  { %7716 = vmatprep.subr.bf16.mxu1 %v8269_v44 }
  0x2f   :  { %492 = vperm.xlu1 %8206, %v8482_v2  }
  0x31   :  { %520 = vperm.xlu0 %8210, %v65_v22   ;;  %7687 = vmatmul.mubr.msk.bf16.gmra.mrb[8].mxu0 %vm807_vm0, %v8255_v23 }
  0x32   :  { %7690 = vmatprep.mubr.msk.bf16.mxu0 %vm807_vm0, %v8256_v26  ;;  %7717 = vmatpush3.bf16.msra.mxu1 %v8269_v44 }
  0x33   :  { %496 = vperm.xlu1 %8206, %v59_v10   ;;  %7703 = vmatmul.mubr.msk.bf16.gmra.mrb[8].mxu1 %vm807_vm0, %v8263_v28 }
  0x34   :  { %7706 = vmatprep.mubr.msk.bf16.mxu1 %vm807_vm0, %v8264_v33  ;;  %7718 = vmatprep.subr.bf16.mxu1 %v8270_v45 }
  0x35   :  { %532 = vperm.xlu0 %8210, %v8584_v27  }
  0x36   :  { %7719 = vmatpush3.bf16.msra.mxu1 %v8270_v45 }
  0x37   :  { %8207 = vset.pattern.permute.xlu1 %v11131_v13  ;;  %7720 = vmatprep.subr.bf16.mxu1 %v8271_v46 }
  0x38   :  { %116 = vperm.xlu1 %8207, %v8497_v5  }
  0x39   :  { %544 = vperm.xlu0 %8210, %v8596_v29   ;;  %7691 = vmatmul.mubr.msk.bf16.gmra.mrb[12].mxu0 %vm807_vm0, %v8257_v30 }
  0x3a   :  { %7721 = vmatpush3.bf16.msra.mxu1 %v8271_v46 }
  0x3b   :  { %7707 = vmatmul.mubr.msk.bf16.gmra.mrb[12].mxu1 %vm807_vm0, %v8265_v34  ;;  %7722 = vmatprep.subr.bf16.mxu1 %v8272_v48 }
  0x3c   :  { %8208 = vset.pattern.permute.xlu1 %v11134_v1 }
  0x3d   :  { %552 = vperm.xlu0 %8210, %v8607_v31   ;;  %303 = vperm.xlu1 %8208, %v8537_v15  }
  0x3e   :  { %7723 = vmatpush3.bf16.msra.mxu1 %v8272_v48 }
  0x3f   :  { %7724 = vmatprep.subr.bf16.mxu1 %v8273_v51 }
  0x41   :  { %564 = vperm.xlu0 %8210, %v8616_v32   ;;  %8209 = vset.pattern.permute.xlu1 %v11131_v13 }
  0x42   :  { %121 = vperm.xlu1 %8209, %v8515_v9   ;;  %7725 = vmatpush3.bf16.msra.mxu1 %v8273_v51  ;;  %v8889_v51 = vld [vmem:[%s11121_s2 + $0x2] ss:$0 sm:$0xff] }
  0x45   :  { %576 = vperm.xlu0 %8210, %v8630_v35  }
  0x46   :  { %126 = vperm.xlu1 %8209, %v63_v20  }
  0x49   :  { %584 = vperm.xlu0 %8210, %v8639_v36  }
  0x4a   :  { %8211 = vset.pattern.permute.xlu1 %v11134_v1 }
  0x4b   :  { %315 = vperm.xlu1 %8211, %v63_v20  }
  0x4d   :  { %8238 = vset.pattern.permute.xlu0 %v11131_v13 }
  0x4e   :  { %91 = vperm.xlu0 %8238, %v8487_v3  }
  0x4f   :  { %8212 = vset.pattern.permute.xlu1 %v11133_v14 }
  0x50   :  { %504 = vperm.xlu1 %8212, %v8497_v5   ;;  %v75_v5 = vld [vmem:[%s11119_s0 + $0x98] sm:$0xff] }
  0x52   :  { %96 = vperm.xlu0 %8238, %v8502_v6   ;;  %v8787_v6 = vld [vmem:[%s11119_s0 + $0xf8] sm:$0xff] }
  0x54   :  { %508 = vperm.xlu1 %8212, %v8515_v9  }
  0x56   :  { %101 = vperm.xlu0 %8238, %v8482_v2  }
  0x58   :  { %8213 = vset.pattern.permute.xlu1 %v11131_v13 }
  0x59   :  { %131 = vperm.xlu1 %8213, %v64_v37  }
  0x5a   :  { %111 = vperm.xlu0 %8238, %v8537_v15  }
  0x5d   :  { %8214 = vset.pattern.permute.xlu1 %v11134_v1 }
  0x5e   :  { %136 = vperm.xlu0 %8238, %v65_v22   ;;  %319 = vperm.xlu1 %8214, %v64_v37  }
  0x62   :  { %141 = vperm.xlu0 %8238, %v66_v38   ;;  %323 = vperm.xlu1 %8214, %v65_v22  }
  0x66   :  { %151 = vperm.xlu0 %8238, %v8584_v27   ;;  %8215 = vset.pattern.permute.xlu1 %v11131_v13 }
  0x67   :  { %146 = vperm.xlu1 %8215, %v67_v40  }
  0x6a   :  { %176 = vperm.xlu0 %8238, %v8607_v31  }
  0x6b   :  { %8216 = vset.pattern.permute.xlu1 %v11134_v1 }
  0x6c   :  { %331 = vperm.xlu1 %8216, %v67_v40  }
  0x6e   :  { %181 = vperm.xlu0 %8238, %v8679_v43  }
  0x70   :  { %8217 = vset.pattern.permute.xlu1 %v11133_v14 }
  0x71   :  { %516 = vperm.xlu1 %8217, %v64_v37  }
  0x72   :  { %191 = vperm.xlu0 %8238, %v8616_v32  }
  0x75   :  { %524 = vperm.xlu1 %8217, %v66_v38  }
  0x76   :  { %216 = vperm.xlu0 %8238, %v8639_v36  }
  0x79   :  { %528 = vperm.xlu1 %8217, %v67_v40   ;;  %v8867_v40 = vld [vmem:[%s11121_s2 + $0x1] ss:$0 sm:$0xff] }
  0x7a   :  { %221 = vperm.xlu0 %8238, %v8697_v47  }
  0x7d   :  { %8218 = vset.pattern.permute.xlu1 %v11131_v13 }
  0x7e   :  { %231 = vperm.xlu0 %8238, %v8706_v49   ;;  %156 = vperm.xlu1 %8218, %v69_v50  }
  0x82   :  { %8239 = vset.pattern.permute.xlu0 %v11134_v1  ;;  %8219 = vset.pattern.permute.xlu1 %v11134_v1 }
  0x83   :  { %327 = vperm.xlu0 %8239, %v66_v38   ;;  %335 = vperm.xlu1 %8219, %v8584_v27  }
  0x87   :  { %339 = vperm.xlu0 %8239, %v69_v50   ;;  %8220 = vset.pattern.permute.xlu1 %v11131_v13 }
  0x88   :  { %161 = vperm.xlu1 %8220, %v70_v52  }
  0x8b   :  { %343 = vperm.xlu0 %8239, %v70_v52  }
  0x8c   :  { %166 = vperm.xlu1 %8220, %v8596_v29  }
  0x8f   :  { %359 = vperm.xlu0 %8239, %v8679_v43  }
  0x90   :  { %8221 = vset.pattern.permute.xlu1 %v11134_v1 }
  0x91   :  { %347 = vperm.xlu1 %8221, %v8596_v29  }
  0x93   :  { %371 = vperm.xlu0 %8239, %v8729_v53  }
  0x95   :  { %8222 = vset.pattern.permute.xlu1 %v11133_v14 }
  0x96   :  { %536 = vperm.xlu1 %8222, %v69_v50  }
  0x97   :  { %v8739_v55 = vpop.permute.xlu1 %287  ;;  %v8741_v56 = vpop.permute.xlu0 %295  ;;  %375 = vperm.xlu0 %8239, %v8736_v54  }
  0x98   :  { %v418_v48 = vmul.f32 %v8867_v40, %v8739_v55 }
  0x9a   :  { %540 = vperm.xlu1 %8222, %v70_v52  }
  0x9b   :  { %v8744_v57 = vpop.permute.xlu1 %291  ;;  %v8746_v58 = vpop.permute.xlu0 %307  ;;  %391 = vperm.xlu0 %8239, %v8697_v47  }
  0x9c   :  { %v419_v55 = vmul.f32 %v8867_v40, %v8744_v57 }
  0x9e   :  { %8223 = vset.pattern.permute.xlu1 %v11131_v13 }
  0x9f   :  { %171 = vperm.xlu1 %8223, %v72_v59   ;;  %v8758_v61 = vpop.permute.xlu0 %311  ;;  %403 = vperm.xlu0 %8239, %v8755_v60  }
  0xa0   :  { %v8761_v62 = vpop.permute.xlu1 %106 }
  0xa3   :  { %8224 = vset.pattern.permute.xlu1 %v11134_v1  ;;  %407 = vperm.xlu0 %8239, %v8766_v63  }
  0xa4   :  { %351 = vperm.xlu1 %8224, %v72_v59   ;;  %v8770_v0 = vpop.permute.xlu0 %488 }
  0xa5   :  { %v8772_v2 = vpop.permute.xlu1 %299 }
  0xa6   :  { %v421_v52 = vmul.f32 %v8867_v40, %v8772_v2 }
  0xa7   :  { %8244 = vset.pattern.permute.xlu0 %v11133_v14 }
  0xa8   :  { %355 = vperm.xlu1 %8224, %v8607_v31   ;;  %v8776_v3 = vpop.permute.xlu0 %500  ;;  %596 = vperm.xlu0 %8244, %v8706_v49  }
  0xaa   :  { %v8779_v4 = vpop.permute.xlu1 %484 }
  0xab   :  { %v615_v57 = vmul.f32 %v8889_v51, %v8779_v4 }
  0xac   :  { %8225 = vset.pattern.permute.xlu1 %v11131_v13  ;;  %v8790_v7 = vpop.permute.xlu0 %512  ;;  %608 = vperm.xlu0 %8244, %v8787_v6  }
  0xad   :  { %186 = vperm.xlu1 %8225, %v75_v5  }
  0xae   :  { %v8793_v8 = vpop.permute.xlu1 %492 }
  0xaf   :  { %v617_v2 = vmul.f32 %v8889_v51, %v8793_v8 }
  0xb0   :  { %v8795_v9 = vpop.permute.xlu0 %520  ;;  %8247 = vset.pattern.permute.xlu0 %v11131_v13 }
  0xb1   :  { %8226 = vset.pattern.permute.xlu1 %v11134_v1 }
  0xb2   :  { %363 = vperm.xlu1 %8226, %v75_v5   ;;  %v8799_v10 = vpop.permute.xlu1 %496 }
  0xb4   :  { %v8801_v11 = vpop.permute.xlu0 %532 }
  0xb6   :  { %8227 = vset.pattern.permute.xlu1 %v11133_v14 }
  0xb7   :  { %548 = vperm.xlu1 %8227, %v72_v59   ;;  %v8804_v12 = vpop.permute.xlu1 %116 }
  0xb8   :  { %v8806_v15 = vpop.permute.xlu0 %544 }
  0xbb   :  { %556 = vperm.xlu1 %8227, %v8679_v43   ;;  %v420_v43 = vmul.f32 %v8867_v40, %v8741_v56 }
  0xbc   :  { %v8809_v16 = vpop.permute.xlu1 %303  ;;  %v8811_v17 = vpop.permute.xlu0 %552 }
  0xbf   :  { %560 = vperm.xlu1 %8227, %v75_v5   ;;  %v256_v5 = vmul.f32 %v8872_v41, %v8761_v62 }
  0xc0   :  { %v8813_v18 = vpop.permute.xlu0 %564 }
  0xc1   :  { %v8815_v19 = vpop.permute.xlu1 %121 }
  0xc3   :  { %8228 = vset.pattern.permute.xlu1 %v11131_v13 }
  0xc4   :  { %196 = vperm.xlu1 %8228, %v8729_v53   ;;  %v8819_v20 = vpop.permute.xlu0 %576 }
  0xc5   :  { %v8821_v21 = vpop.permute.xlu1 %126 }
  0xc8   :  { %8229 = vset.pattern.permute.xlu1 %v11134_v1  ;;  %v8824_v22 = vpop.permute.xlu0 %584 }
  0xc9   :  { %367 = vperm.xlu1 %8229, %v8616_v32  }
  0xca   :  { %v316_v23 = vpop.permute.xlu1 %315 }
  0xcb   :  { %v425_v62 = vmul.f32 %v8867_v40, %v316_v23  ;;  %v260_v23 = vmul.f32 %v8872_v41, %v8821_v21  ;;  %v258_v21 = vmul.f32 %v8872_v41, %v8804_v12 }
  0xcd   :  { %v92_v24 = vpop.permute.xlu0 %91  ;;  %8230 = vset.pattern.permute.xlu1 %v11131_v13 }
  0xce   :  { %201 = vperm.xlu1 %8230, %v8736_v54   ;;  %v253_v45 = vmul.f32 %v8872_v41, %v92_v24  ;;  %v618_v24 = vmul.f32 %v8889_v51, %v8799_v10  ;;  %v423_v10 = vmul.f32 %v8867_v40, %v8746_v58  ;;  %v8933_v58 = vld [vmem:[%s11123_s4] ss:$0 sm:$0xff] }
  0xcf   :  { %v8829_v25 = vpop.permute.xlu1 %504 }
  0xd0   :  { %v450_v56 = vadd.f32 %v418_v48, %v253_v45  ;;  %v424_v45 = vmul.f32 %v8867_v40, %v8758_v61 }
  0xd1   :  { %v97_v26 = vpop.permute.xlu0 %96 }
  0xd2   :  { %206 = vperm.xlu1 %8230, %v8630_v35   ;;  %v254_v50 = vmul.f32 %v8872_v41, %v97_v26  ;;  %v616_v26 = vmul.f32 %v8889_v51, %v8770_v0 }
  0xd3   :  { %v8832_v27 = vpop.permute.xlu1 %508 }
  0xd5   :  { %v102_v28 = vpop.permute.xlu0 %101 }
  0xd6   :  { %8231 = vset.pattern.permute.xlu1 %v11134_v1  ;;  %v255_v44 = vmul.f32 %v8872_v41, %v102_v28  ;;  %v451_v28 = vadd.f32 %v419_v55, %v254_v50  ;;  %v259_v50 = vmul.f32 %v8872_v41, %v8815_v19  ;;  %v422_v55 = vmul.f32 %v8867_v40, %v8809_v16 }
  0xd7   :  { %379 = vperm.xlu1 %8231, %v8630_v35   ;;  %v8852_v35 = vld [vmem:[%s11119_s0 + $0xc0] sm:$0xff]  ;;  %v619_v16 = vmul.f32 %v8889_v51, %v8776_v3  ;;  %v8962_v3 = vmul.f32 %v8889_v51, %v8795_v9 }
  0xd8   :  { %v8836_v29 = vpop.permute.xlu1 %131  ;;  %v648_v19 = vadd.f32 %v616_v26, %v451_v28  ;;  %v456_v12 = vadd.f32 %v424_v45, %v259_v50  ;;  %v455_v45 = vadd.f32 %v423_v10, %v258_v21 }
  0xd9   :  { %v112_v30 = vpop.permute.xlu0 %111 }
  0xda   :  { %v257_v0 = vmul.f32 %v8872_v41, %v112_v30  ;;  %v622_v30 = vmul.f32 %v8889_v51, %v8790_v7 }
  0xdb   :  { %8232 = vset.pattern.permute.xlu1 %v11133_v14 }
  0xdc   :  { %568 = vperm.xlu1 %8232, %v8729_v53   ;;  %v452_v53 = vadd.f32 %v420_v43, %v255_v44  ;;  %v453_v43 = vadd.f32 %v421_v52, %v256_v5 }
  0xdd   :  { %v8840_v31 = vpop.permute.xlu1 %319  ;;  %v8842_v32 = vpop.permute.xlu0 %136 }
  0xde   :  { %v649_v8 = vadd.f32 %v617_v2, %v452_v53  ;;  %v650_v61 = vadd.f32 %v618_v24, %v453_v43  ;;  %v457_v2 = vadd.f32 %v425_v62, %v260_v23  ;;  %v620_v62 = vmul.f32 %v8889_v51, %v8829_v25 }
  0xe0   :  { %572 = vperm.xlu1 %8232, %v8736_v54  }
  0xe1   :  { %v8845_v33 = vpop.permute.xlu1 %323  ;;  %v8847_v34 = vpop.permute.xlu0 %141 }
  0xe4   :  { %8233 = vset.pattern.permute.xlu1 %v11131_v13 }
  0xe5   :  { %211 = vperm.xlu1 %8233, %v8852_v35   ;;  %v8856_v37 = vpop.permute.xlu0 %151 }
  0xe6   :  { %v8858_v38 = vpop.permute.xlu1 %146 }
  0xe9   :  { %8234 = vset.pattern.permute.xlu1 %v11134_v1  ;;  %v8861_v39 = vpop.permute.xlu0 %176 }
  0xea   :  { %383 = vperm.xlu1 %8234, %v8852_v35  }
  0xeb   :  { %v8874_v42 = vpop.permute.xlu1 %331 }
  0xed   :  { %v8880_v46 = vpop.permute.xlu0 %181 }
  0xee   :  { %387 = vperm.xlu1 %8234, %v8639_v36   ;;  %v8898_v36 = vld [vmem:[%s11119_s0 + $0xd8] sm:$0xff] }
  0xf0   :  { %v8893_v54 = vpop.permute.xlu1 %516 }
  0xf1   :  { %v8902_v59 = vpop.permute.xlu0 %191 }
  0xf2   :  { %8235 = vset.pattern.permute.xlu1 %v11131_v13  ;;  %v647_v13 = vadd.f32 %v615_v57, %v450_v56  ;;  %v621_v57 = vmul.f32 %v8889_v51, %v8832_v27 }
  0xf3   :  { %226 = vperm.xlu1 %8235, %v8898_v36  }
  0xf4   :  { %v8917_v44 = vpop.permute.xlu1 %524  ;;  %v7680_v48 = vpop.f32.mrb[0].mxu0  ;;  %v653_v25 = vadd.f32 %v621_v57, %v456_v12 }
  0xf5   :  { %v8924_v4 = vpop.permute.xlu0 %216  ;;  %v1019_v52 = vadd.f32 %v7680_v48, %v649_v8  ;;  %v890_v53 = vpop.f32.mrb[1].mxu0 }
  0xf6   :  { %v1017_v56 = vadd.f32 %v890_v53, %v647_v13  ;;  %v7681_v5 = vpop.f32.mrb[2].mxu0  ;;  %v454_v13 = vadd.f32 %v422_v55, %v257_v0  ;;  %v426_v0 = vmul.f32 %v8867_v40, %v8840_v31  ;;  %v8971_v53 = vpop.f32.mrb[0].mxu1 }
  0xf7   :  { %8236 = vset.pattern.permute.xlu1 %v11134_v1  ;;  %v1020_v8 = vadd.f32 %v7681_v5, %v650_v61  ;;  %v893_v24 = vpop.f32.mrb[3].mxu0  ;;  %v8955_v27 = vadd.f32 %v8933_v58, %v1019_v52  ;;  %v654_v52 = vadd.f32 %v622_v30, %v457_v2  ;;  %v261_v61 = vmul.f32 %v8872_v41, %v8836_v29  ;;  %v8987_v12 = vpop.f32.mrb[1].mxu1 }
  0xf8   :  { %395 = vperm.xlu1 %8236, %v8898_v36   ;;  %v529_v7 = vpop.permute.xlu1 %528  ;;  %v8948_v43 = vadd.f32 %v8933_v58, %v1017_v56  ;;  %v1018_v26 = vadd.f32 %v893_v24, %v648_v19  ;;  %v651_v10 = vadd.f32 %v619_v16, %v454_v13  ;;  %v262_v5 = vmul.f32 %v8872_v41, %v8842_v32  ;;  %v8993_v1 = vpop.f32.mrb[2].mxu1 }
  0xf9   :  { %v8950_v28 = vpop.permute.xlu0 %221  ;;  %v8958_v48 = vadd.f32 %v8933_v58, %v1020_v8  ;;  %v427_v30 = vmul.f32 %v8867_v40, %v8845_v33  ;;  %v1090_v19 = vmax.f32 %v8955_v27, 0.0  ;;  %v652_v2 = vadd.f32 %v620_v62, %v455_v45 }
  0xfa   :  { %v8967_v23 = vadd.f32 %v8933_v58, %v1018_v26  ;;  %v1088_v9 = vmax.f32 %v8948_v43, 0.0  ;;  %v458_v57 = vadd.f32 %v426_v0, %v261_v61  ;;  %v429_v16 = vmul.f32 %v8867_v40, %v8874_v42 }
  0xfb   :  { %v1091_v50 = vmax.f32 %v8958_v48, 0.0  ;;  %v623_v32 = vmul.f32 %v8889_v51, %v8893_v54  ;;  %v263_v62 = vmul.f32 %v8872_v41, %v8847_v34  ;;  %v459_v42 = vadd.f32 %v427_v30, %v262_v5 }
  0xfc   :  { %8237 = vset.pattern.permute.xlu1 %v11133_v14  ;;  %v1089_v55 = vmax.f32 %v8967_v23, 0.0  ;;  %v7684_v31 = vpop.f32.mrb[4].mxu0  ;;  %v264_v54 = vmul.f32 %v8872_v41, %v8858_v38  ;;  %v625_v38 = vmul.f32 %v8889_v51, %v8917_v44 }
  0xfd   :  { %580 = vperm.xlu1 %8237, %v8852_v35   ;;  %v8978_v56 = vpop.permute.xlu1 %156  ;;  %v906_v21 = vpop.f32.mrb[5].mxu0  ;;  %v1023_v8 = vadd.f32 %v7684_v31, %v653_v25  ;;  %v1121_v33 = vpack.c.bf16 %v1091_v50, %v1090_v19  ;;  %v626_v50 = vmul.f32 %v8889_v51, %v529_v7  ;;  %v655_v31 = vadd.f32 %v623_v32, %v458_v57 }
  0xfe   :  { %v8985_v29 = vpop.permute.xlu0 %231  ;;  %v1021_v24 = vadd.f32 %v906_v21, %v651_v10  ;;  %v7685_v26 = vpop.f32.mrb[6].mxu0  ;;  %v1120_v35 = vpack.c.bf16 %v1089_v55, %v1088_v9  ;;  %v461_v55 = vadd.f32 %v429_v16, %v264_v54 }
  0xff   :  { %v1024_v13 = vadd.f32 %v7685_v26, %v654_v52  ;;  %v909_v14 = vpop.f32.mrb[7].mxu0  ;;  %v9001_v25 = vpop.f32.mrb[3].mxu1  ;;  %v9010_v9 = vadd.f32 %v8933_v58, %v1023_v8  ;;  %v656_v26 = vadd.f32 %v8962_v3, %v459_v42 }
 0x100   :  { %v8998_v0 = vadd.f32 %v8933_v58, %v1021_v24  ;;  %v1022_v45 = vadd.f32 %v909_v14, %v652_v2  ;;  %7726 = vmatprep.mubr.bf16.mxu1 %v1120_v35  ;;  %v9018_v7 = vpop.f32.mrb[4].mxu1  ;;  %v658_v24 = vadd.f32 %v626_v50, %v461_v55 }
 0x101   :  { %588 = vperm.xlu1 %8237, %v8697_v47   ;;  %v9007_v52 = vadd.f32 %v8933_v58, %v1024_v13  ;;  %7727 = vmatmul.mubr.bf16.vlgmr.msra.gmra.mrb[16].mxu1 %v1121_v33  ;;  %v9024_v2 = vpop.f32.mrb[5].mxu1  ;;  %v1094_v44 = vmax.f32 %v9010_v9, 0.0 }
 0x102   :  { %v328_v61 = vpop.permute.xlu0 %327  ;;  %v336_v34 = vpop.permute.xlu1 %335  ;;  %v9013_v14 = vadd.f32 %v8933_v58, %v1022_v45  ;;  %v1092_v10 = vmax.f32 %v8998_v0, 0.0 }
 0x103   :  { %v428_v47 = vmul.f32 %v8867_v40, %v328_v61  ;;  %v1095_v5 = vmax.f32 %v9007_v52, 0.0  ;;  %v9028_v54 = vpop.f32.mrb[6].mxu1 }
 0x104   :  { %v1093_v30 = vmax.f32 %v9013_v14, 0.0  ;;  %v7688_v21 = vpop.f32.mrb[8].mxu0  ;;  %v9034_v3 = vpop.f32.mrb[7].mxu1 }
 0x105   :  { %v460_v19 = vadd.f32 %v428_v47, %v263_v62  ;;  %592 = vperm.xlu1 %8237, %v8898_v36   ;;  %v922_v8 = vpop.f32.mrb[9].mxu0  ;;  %v11141_v47 = vmov 0   ;;  %v1123_v50 = vpack.c.bf16 %v1095_v5, %v1094_v44  ;;  %v430_v5 = vmul.f32 %v8867_v40, %v336_v34 }
 0x106   :  { %v1025_v35 = vadd.f32 %v922_v8, %v655_v31  ;;  %v7689_v16 = vpop.f32.mrb[10].mxu0  ;;  %v1122_v33 = vpack.c.bf16 %v1093_v30, %v1092_v10  ;;  %v265_v10 = vmul.f32 %v8872_v41, %v8856_v37  ;;  %v340_v30 = vpop.permute.xlu0 %339 }
 0x107   :  { %v657_v57 = vadd.f32 %v625_v38, %v460_v19  ;;  %v162_v32 = vpop.permute.xlu1 %161  ;;  %v1028_v13 = vadd.f32 %v7689_v16, %v658_v24  ;;  %v925_v45 = vpop.f32.mrb[11].mxu0  ;;  %v11145_v16 = vmov 1  }
 0x108   :  { %v9031_v36 = vadd.f32 %v8933_v58, %v1025_v35  ;;  %v1026_v61 = vadd.f32 %v925_v45, %v656_v26  ;;  %7730 = vmatprep.mubr.bf16.mxu1 %v1122_v33  ;;  %v9049_v19 = vpop.f32.mrb[8].mxu1  ;;  %v627_v45 = vmul.f32 %v8889_v51, %v8801_v11  ;;  %v630_v11 = vmul.f32 %v8889_v51, %v8806_v15 }
 0x109   :  { %v1027_v62 = vadd.f32 %v7688_v21, %v657_v57  ;;  %8240 = vset.pattern.permute.xlu1 %v11141_v47  ;;  %v9037_v42 = vadd.f32 %v8933_v58, %v1028_v13  ;;  %7731 = vmatmul.mubr.bf16.gmra.mrb[20].mxu1 %v1123_v50  ;;  %v9055_v57 = vpop.f32.mrb[9].mxu1  ;;  %v267_v15 = vmul.f32 %v8872_v41, %v162_v32 }
 0x10a   :  { %11140 = vst [vmem:[#allocation9_spill] sm:$0xff] %v9031_v36  ;;  %236 = vperm.xlu1 %8240, %v8755_v60   ;;  %v9044_v38 = vadd.f32 %v8933_v58, %v1026_v61  ;;  %v1096_v8 = vmax.f32 %v9031_v36, 0.0  ;;  %v9059_v13 = vpop.f32.mrb[10].mxu1 }
 0x10b   :  { %11142 = vst [vmem:[#allocation10_spill] sm:$0xff] %v9037_v42  ;;  %v9041_v55 = vadd.f32 %v8933_v58, %v1027_v62  ;;  %v167_v31 = vpop.permute.xlu1 %166  ;;  %v1099_v24 = vmax.f32 %v9037_v42, 0.0  ;;  %v462_v62 = vadd.f32 %v430_v5, %v265_v10  ;;  %v266_v10 = vmul.f32 %v8872_v41, %v8978_v56 }
 0x10c   :  { %11144 = vst [vmem:[#allocation12_spill] sm:$0xff] %v9044_v38  ;;  %v1097_v26 = vmax.f32 %v9044_v38, 0.0  ;;  %v7692_v44 = vpop.f32.mrb[12].mxu0  ;;  %v268_v38 = vmul.f32 %v8872_v41, %v167_v31 }
 0x10d   :  { %11143 = vst [vmem:[#allocation11_spill] sm:$0xff] %v9041_v55  ;;  %v1098_v21 = vmax.f32 %v9041_v55, 0.0  ;;  %v938_v35 = vpop.f32.mrb[13].mxu0  ;;  %v9065_v55 = vpop.f32.mrb[11].mxu1  ;;  %v659_v5 = vadd.f32 %v627_v45, %v462_v62 }
 0x10e   :  { %8241 = vset.pattern.permute.xlu1 %v11145_v16  ;;  %v1124_v37 = vpack.c.bf16 %v1097_v26, %v1096_v8  ;;  %v7693_v33 = vpop.f32.mrb[14].mxu0  ;;  %v344_v8 = vpop.permute.xlu0 %343 }
 0x10f   :  { %399 = vperm.xlu1 %8241, %v8706_v49   ;;  %v1125_v34 = vpack.c.bf16 %v1099_v24, %v1098_v21  ;;  %v941_v50 = vpop.f32.mrb[15].mxu0  ;;  %v431_v49 = vmul.f32 %v8867_v40, %v340_v30  ;;  %v432_v31 = vmul.f32 %v8867_v40, %v344_v8  ;;  %v9075_v26 = vpop.f32.mrb[12].mxu1 }
 0x110   :  { %v348_v61 = vpop.permute.xlu1 %347  ;;  %7734 = vmatprep.mubr.bf16.mxu1 %v1124_v37  ;;  %v1029_v37 = vadd.f32 %v938_v35, %v659_v5 }
 0x111   :  { %v433_v42 = vmul.f32 %v8867_v40, %v348_v61  ;;  %7735 = vmatmul.mubr.bf16.gmra.mrb[24].mxu1 %v1125_v34  ;;  %v463_v30 = vadd.f32 %v431_v49, %v266_v10  ;;  %v9078_v34 = vpop.f32.mrb[13].mxu1  ;;  %v464_v45 = vadd.f32 %v432_v31, %v267_v15 }
 0x112   :  { %v9083_v61 = vadd.f32 %v8933_v58, %v1029_v37 }
 0x113   :  { %v465_v21 = vadd.f32 %v433_v42, %v268_v38  ;;  %8242 = vset.pattern.permute.xlu1 %v11141_v47 }
 0x114   :  { %241 = vperm.xlu1 %8242, %v8766_v63   ;;  %v1100_v32 = vmax.f32 %v9083_v61, 0.0 }
 0x115   :  { %v537_v24 = vpop.permute.xlu1 %536  ;;  %v662_v38 = vadd.f32 %v630_v11, %v465_v21 }
 0x116   :  { %v628_v42 = vmul.f32 %v8889_v51, %v537_v24 }
 0x117   :  { %v1032_v8 = vadd.f32 %v7693_v33, %v662_v38  ;;  %v270_v38 = vmul.f32 %v8872_v41, %v8861_v39  ;;  %v360_v39 = vpop.permute.xlu0 %359 }
 0x118   :  { %246 = vperm.xlu1 %8242, %v8787_v6   ;;  %v660_v56 = vadd.f32 %v628_v42, %v463_v30 }
 0x119   :  { %v541_v62 = vpop.permute.xlu1 %540  ;;  %v9093_v11 = vadd.f32 %v8933_v58, %v1032_v8 }
 0x11a   :  { %v1030_v36 = vadd.f32 %v941_v50, %v660_v56  ;;  %v629_v49 = vmul.f32 %v8889_v51, %v541_v62 }
 0x11b   :  { %v1103_v24 = vmax.f32 %v9093_v11, 0.0 }
 0x11c   :  { %v9087_v35 = vadd.f32 %v8933_v58, %v1030_v36  ;;  %v661_v21 = vadd.f32 %v629_v49, %v464_v45  ;;  %8243 = vset.pattern.permute.xlu1 %v11145_v16  ;;  %v11146_v36 = vmov 2   ;;  %v9103_v16 = vpop.f32.mrb[14].mxu1  ;;  %v632_v45 = vmul.f32 %v8889_v51, %v8811_v17  ;;  %v8274_v49 = vld [vmem:[#allocation3] sm:$0xff]  }
 0x11d   :  { %411 = vperm.xlu1 %8243, %v8787_v6   ;;  %v9106_v42 = vpop.f32.mrb[15].mxu1  ;;  %7758 = vmatprep.subr.bf16.mxu0 %v8274_v49 }
 0x11e   :  { %v1101_v10 = vmax.f32 %v9087_v35, 0.0  ;;  %v1031_v5 = vadd.f32 %v7692_v44, %v661_v21  ;;  %v172_v33 = vpop.permute.xlu1 %171  ;;  %7759 = vmatpush3.bf16.msra.mxu0 %v8274_v49 }
 0x120   :  { %v9097_v50 = vadd.f32 %v8933_v58, %v1031_v5  ;;  %v1126_v31 = vpack.c.bf16 %v1101_v10, %v1100_v32  ;;  %v269_v32 = vmul.f32 %v8872_v41, %v172_v33 }
 0x121   :  { %8245 = vset.pattern.permute.xlu1 %v11146_v36  ;;  %v436_v36 = vmul.f32 %v8867_v40, %v360_v39 }
 0x122   :  { %600 = vperm.xlu1 %8245, %v8755_v60   ;;  %7738 = vmatprep.mubr.bf16.mxu1 %v1126_v31  ;;  %v1102_v6 = vmax.f32 %v9097_v50, 0.0  ;;  %v271_v31 = vmul.f32 %v8872_v41, %v8880_v46 }
 0x123   :  { %v352_v30 = vpop.permute.xlu1 %351 }
 0x124   :  { %v1127_v37 = vpack.c.bf16 %v1103_v24, %v1102_v6  ;;  %v434_v21 = vmul.f32 %v8867_v40, %v352_v30 }
 0x126   :  { %604 = vperm.xlu1 %8245, %v8766_v63   ;;  %7739 = vmatmul.mubr.bf16.gmra.mrb[28].mxu1 %v1127_v37  ;;  %v8275_v63 = vld [vmem:[#allocation3 + $0x8] sm:$0xff]   ;;  %v466_v17 = vadd.f32 %v434_v21, %v269_v32  ;;  %v8277_v37 = vld [vmem:[#allocation3 + $0x18] sm:$0xff]  }
 0x127   :  { %v356_v44 = vpop.permute.xlu1 %355  ;;  %7760 = vmatprep.subr.bf16.mxu0 %v8275_v63 }
 0x128   :  { %v435_v15 = vmul.f32 %v8867_v40, %v356_v44  ;;  %7761 = vmatpush3.bf16.msra.mxu0 %v8275_v63  ;;  %v8278_v63 = vld [vmem:[#allocation3 + $0x20] sm:$0xff]  }
 0x12a   :  { %8246 = vset.pattern.permute.xlu1 %v11141_v47  ;;  %v467_v56 = vadd.f32 %v435_v15, %v270_v38  ;;  %v8276_v47 = vld [vmem:[#allocation3 + $0x10] sm:$0xff]  }
 0x12b   :  { %7762 = vmatprep.subr.bf16.mxu0 %v8276_v47 }
 0x12c   :  { %v187_v60 = vpop.permute.xlu1 %186  ;;  %v664_v8 = vadd.f32 %v632_v45, %v467_v56  ;;  %7763 = vmatpush3.bf16.msra.mxu0 %v8276_v47 }
 0x12d   :  { %v272_v15 = vmul.f32 %v8872_v41, %v187_v60  ;;  %7764 = vmatprep.subr.bf16.mxu0 %v8277_v37  ;;  %v8279_v60 = vld [vmem:[#allocation3 + $0x28] sm:$0xff]  }
 0x12e   :  { %v1034_v10 = vadd.f32 %v9001_v25, %v664_v8  ;;  %v468_v25 = vadd.f32 %v436_v36, %v271_v31 }
 0x130   :  { %v9122_v30 = vadd.f32 %v8933_v58, %v1034_v10  ;;  %7765 = vmatpush3.bf16.msra.mxu0 %v8277_v37 }
 0x131   :  { %v364_v62 = vpop.permute.xlu1 %363  ;;  %7766 = vmatprep.subr.bf16.mxu0 %v8278_v63 }
 0x132   :  { %v437_v44 = vmul.f32 %v8867_v40, %v364_v62  ;;  %v1105_v8 = vmax.f32 %v9122_v30, 0.0 }
 0x134   :  { %v469_v21 = vadd.f32 %v437_v44, %v272_v15  ;;  %7767 = vmatpush3.bf16.msra.mxu0 %v8278_v63  ;;  %v372_v44 = vpop.permute.xlu0 %371 }
 0x135   :  { %7768 = vmatprep.subr.bf16.mxu0 %v8279_v60  ;;  %v439_v63 = vmul.f32 %v8867_v40, %v372_v44 }
 0x136   :  { %v549_v5 = vpop.permute.xlu1 %548 }
 0x137   :  { %v631_v24 = vmul.f32 %v8889_v51, %v549_v5 }
 0x138   :  { %7769 = vmatpush3.bf16.msra.mxu0 %v8279_v60  ;;  %v8281_v60 = vld [vmem:[#allocation3 + $0x38] sm:$0xff]  }
 0x139   :  { %v663_v6 = vadd.f32 %v631_v24, %v466_v17 }
 0x13a   :  { %v557_v33 = vpop.permute.xlu1 %556 }
 0x13b   :  { %v1033_v38 = vadd.f32 %v8987_v12, %v663_v6  ;;  %v633_v46 = vmul.f32 %v8889_v51, %v557_v33 }
 0x13d   :  { %v9129_v56 = vadd.f32 %v8933_v58, %v1033_v38  ;;  %v665_v45 = vadd.f32 %v633_v46, %v468_v25  ;;  %v635_v46 = vmul.f32 %v8889_v51, %v8813_v18 }
 0x13e   :  { %v561_v49 = vpop.permute.xlu1 %560 }
 0x13f   :  { %v1035_v32 = vadd.f32 %v8971_v53, %v665_v45  ;;  %v634_v62 = vmul.f32 %v8889_v51, %v561_v49  ;;  %v1104_v12 = vmax.f32 %v9129_v56, 0.0  ;;  %v8280_v49 = vld [vmem:[#allocation3 + $0x30] sm:$0xff]  }
 0x140   :  { %7770 = vmatprep.subr.bf16.mxu0 %v8280_v49 }
 0x141   :  { %v666_v39 = vadd.f32 %v634_v62, %v469_v21  ;;  %v1128_v10 = vpack.c.bf16 %v1105_v8, %v1104_v12  ;;  %v9136_v5 = vadd.f32 %v8933_v58, %v1035_v32  ;;  %v376_v12 = vpop.permute.xlu0 %375  ;;  %7771 = vmatpush3.bf16.msra.mxu0 %v8280_v49 }
 0x142   :  { %v440_v18 = vmul.f32 %v8867_v40, %v376_v12  ;;  %7772 = vmatprep.subr.bf16.mxu0 %v8281_v60 }
 0x143   :  { %v1036_v47 = vadd.f32 %v8993_v1, %v666_v39  ;;  %7742 = vmatprep.mubr.bf16.mxu1 %v1128_v10  ;;  %v197_v31 = vpop.permute.xlu1 %196  ;;  %v1106_v53 = vmax.f32 %v9136_v5, 0.0  ;;  %v273_v1 = vmul.f32 %v8872_v41, %v8902_v59  ;;  %v638_v59 = vmul.f32 %v8889_v51, %v8819_v20 }
 0x144   :  { %v274_v21 = vmul.f32 %v8872_v41, %v197_v31 }
 0x145   :  { %v9140_v17 = vadd.f32 %v8933_v58, %v1036_v47  ;;  %7773 = vmatpush3.bf16.msra.mxu0 %v8281_v60 }
 0x146   :  { %v471_v47 = vadd.f32 %v439_v63, %v274_v21 }
 0x147   :  { %v1107_v36 = vmax.f32 %v9140_v17, 0.0 }
 0x148   :  { %v368_v24 = vpop.permute.xlu1 %367 }
 0x149   :  { %v1129_v6 = vpack.c.bf16 %v1107_v36, %v1106_v53  ;;  %v438_v37 = vmul.f32 %v8867_v40, %v368_v24 }
 0x14b   :  { %7743 = vmatmul.mubr.bf16.gmra.mrb[32].mxu1 %v1129_v6  ;;  %v470_v38 = vadd.f32 %v438_v37, %v273_v1 }
 0x14d   :  { %v202_v33 = vpop.permute.xlu1 %201  ;;  %v667_v32 = vadd.f32 %v635_v46, %v470_v38 }
 0x14e   :  { %v275_v39 = vmul.f32 %v8872_v41, %v202_v33 }
 0x14f   :  { %v1037_v53 = vadd.f32 %v9024_v2, %v667_v32 }
 0x150   :  { %v472_v6 = vadd.f32 %v440_v18, %v275_v39 }
 0x151   :  { %v207_v25 = vpop.permute.xlu1 %206  ;;  %v9160_v20 = vadd.f32 %v8933_v58, %v1037_v53 }
 0x152   :  { %v276_v45 = vmul.f32 %v8872_v41, %v207_v25 }
 0x153   :  { %v1108_v38 = vmax.f32 %v9160_v20, 0.0 }
 0x156   :  { %v380_v15 = vpop.permute.xlu1 %379 }
 0x157   :  { %v441_v8 = vmul.f32 %v8867_v40, %v380_v15 }
 0x159   :  { %v473_v62 = vadd.f32 %v441_v8, %v276_v45 }
 0x15b   :  { %v569_v10 = vpop.permute.xlu1 %568  ;;  %v670_v31 = vadd.f32 %v638_v59, %v473_v62  ;;  %v278_v59 = vmul.f32 %v8872_v41, %v8924_v4  ;;  %v279_v4 = vmul.f32 %v8872_v41, %v8950_v28 }
 0x15c   :  { %v636_v36 = vmul.f32 %v8889_v51, %v569_v10 }
 0x15d   :  { %v1040_v25 = vadd.f32 %v9028_v54, %v670_v31 }
 0x15e   :  { %v668_v24 = vadd.f32 %v636_v36, %v471_v47  ;;  %v392_v36 = vpop.permute.xlu0 %391 }
 0x15f   :  { %v573_v37 = vpop.permute.xlu1 %572  ;;  %v9170_v46 = vadd.f32 %v8933_v58, %v1040_v25 }
 0x160   :  { %v1038_v33 = vadd.f32 %v9034_v3, %v668_v24  ;;  %v637_v1 = vmul.f32 %v8889_v51, %v573_v37 }
 0x161   :  { %v1111_v49 = vmax.f32 %v9170_v46, 0.0 }
 0x162   :  { %v9166_v44 = vadd.f32 %v8933_v58, %v1038_v33  ;;  %v669_v2 = vadd.f32 %v637_v1, %v472_v6  ;;  %v444_v6 = vmul.f32 %v8867_v40, %v392_v36 }
 0x164   :  { %v1109_v15 = vmax.f32 %v9166_v44, 0.0  ;;  %v1039_v45 = vadd.f32 %v9018_v7, %v669_v2  ;;  %v212_v8 = vpop.permute.xlu1 %211  ;;  %v640_v7 = vmul.f32 %v8889_v51, %v8824_v22  ;;  %v476_v1 = vadd.f32 %v444_v6, %v279_v4 }
 0x165   :  { %v277_v31 = vmul.f32 %v8872_v41, %v212_v8 }
 0x166   :  { %v9175_v54 = vadd.f32 %v8933_v58, %v1039_v45  ;;  %v1130_v3 = vpack.c.bf16 %v1109_v15, %v1108_v38  ;;  %v404_v45 = vpop.permute.xlu0 %403 }
 0x168   :  { %7746 = vmatprep.mubr.bf16.mxu1 %v1130_v3  ;;  %v1110_v63 = vmax.f32 %v9175_v54, 0.0 }
 0x169   :  { %v384_v21 = vpop.permute.xlu1 %383 }
 0x16a   :  { %v1131_v32 = vpack.c.bf16 %v1111_v49, %v1110_v63  ;;  %v442_v53 = vmul.f32 %v8867_v40, %v384_v21 }
 0x16c   :  { %7747 = vmatmul.mubr.bf16.gmra.mrb[36].mxu1 %v1131_v32  ;;  %v474_v37 = vadd.f32 %v442_v53, %v277_v31  ;;  %v281_v31 = vmul.f32 %v8872_v41, %v8985_v29 }
 0x16d   :  { %v388_v62 = vpop.permute.xlu1 %387 }
 0x16e   :  { %v443_v12 = vmul.f32 %v8867_v40, %v388_v62 }
 0x170   :  { %v475_v18 = vadd.f32 %v443_v12, %v278_v59 }
 0x172   :  { %v227_v39 = vpop.permute.xlu1 %226  ;;  %v672_v10 = vadd.f32 %v640_v7, %v475_v18  ;;  %v408_v7 = vpop.permute.xlu0 %407 }
 0x173   :  { %v280_v28 = vmul.f32 %v8872_v41, %v227_v39 }
 0x174   :  { %v1042_v60 = vadd.f32 %v9065_v55, %v672_v10 }
 0x176   :  { %v9192_v33 = vadd.f32 %v8933_v58, %v1042_v60 }
 0x177   :  { %v396_v47 = vpop.permute.xlu1 %395 }
 0x178   :  { %v445_v2 = vmul.f32 %v8867_v40, %v396_v47  ;;  %v1113_v49 = vmax.f32 %v9192_v33, 0.0  ;;  %v597_v47 = vpop.permute.xlu0 %596 }
 0x179   :  { %v643_v4 = vmul.f32 %v8889_v51, %v597_v47 }
 0x17a   :  { %v477_v21 = vadd.f32 %v445_v2, %v280_v28 }
 0x17c   :  { %v581_v24 = vpop.permute.xlu1 %580 }
 0x17d   :  { %v639_v22 = vmul.f32 %v8889_v51, %v581_v24 }
 0x17f   :  { %v671_v25 = vadd.f32 %v639_v22, %v474_v37 }
 0x180   :  { %v589_v55 = vpop.permute.xlu1 %588 }
 0x181   :  { %v1041_v38 = vadd.f32 %v9055_v57, %v671_v25  ;;  %v641_v15 = vmul.f32 %v8889_v51, %v589_v55 }
 0x183   :  { %v9199_v8 = vadd.f32 %v8933_v58, %v1041_v38  ;;  %v673_v3 = vadd.f32 %v641_v15, %v476_v1  ;;  %v609_v1 = vpop.permute.xlu0 %608 }
 0x184   :  { %v593_v63 = vpop.permute.xlu1 %592  ;;  %v646_v28 = vmul.f32 %v8889_v51, %v609_v1 }
 0x185   :  { %v1043_v32 = vadd.f32 %v9049_v19, %v673_v3  ;;  %v642_v62 = vmul.f32 %v8889_v51, %v593_v63  ;;  %v1112_v59 = vmax.f32 %v9199_v8, 0.0 }
 0x187   :  { %v674_v57 = vadd.f32 %v642_v62, %v477_v21  ;;  %v1132_v12 = vpack.c.bf16 %v1113_v49, %v1112_v59  ;;  %v9206_v18 = vadd.f32 %v8933_v58, %v1043_v32  ;;  %v447_v49 = vmul.f32 %v8867_v40, %v404_v45 }
 0x188   :  { %v448_v59 = vmul.f32 %v8867_v40, %v408_v7 }
 0x189   :  { %v1044_v39 = vadd.f32 %v9059_v13, %v674_v57  ;;  %7750 = vmatprep.mubr.bf16.mxu1 %v1132_v12  ;;  %v237_v10 = vpop.permute.xlu1 %236  ;;  %v1114_v19 = vmax.f32 %v9206_v18, 0.0 }
 0x18a   :  { %v282_v29 = vmul.f32 %v8872_v41, %v237_v10 }
 0x18b   :  { %v9210_v60 = vadd.f32 %v8933_v58, %v1044_v39 }
 0x18c   :  { %v479_v32 = vadd.f32 %v447_v49, %v282_v29 }
 0x18d   :  { %v1115_v53 = vmax.f32 %v9210_v60, 0.0 }
 0x18e   :  { %v400_v36 = vpop.permute.xlu1 %399 }
 0x18f   :  { %v446_v24 = vmul.f32 %v8867_v40, %v400_v36  ;;  %v1133_v6 = vpack.c.bf16 %v1115_v53, %v1114_v19 }
 0x191   :  { %v478_v13 = vadd.f32 %v446_v24, %v281_v31  ;;  %7751 = vmatmul.mubr.bf16.gmra.mrb[40].mxu1 %v1133_v6  ;;  %v9250_v6 = vld [vmem:[%s11125_s6] ss:$0 sm:$0xff] }
 0x193   :  { %v242_v37 = vpop.permute.xlu1 %241  ;;  %v675_v22 = vadd.f32 %v643_v4, %v478_v13 }
 0x194   :  { %v283_v63 = vmul.f32 %v8872_v41, %v242_v37 }
 0x195   :  { %v1045_v25 = vadd.f32 %v9078_v34, %v675_v22 }
 0x196   :  { %v480_v12 = vadd.f32 %v448_v59, %v283_v63 }
 0x197   :  { %v247_v55 = vpop.permute.xlu1 %246  ;;  %v9228_v47 = vadd.f32 %v8933_v58, %v1045_v25 }
 0x198   :  { %v284_v38 = vmul.f32 %v8872_v41, %v247_v55 }
 0x199   :  { %v1116_v36 = vmax.f32 %v9228_v47, 0.0 }
 0x19c   :  { %v412_v2 = vpop.permute.xlu1 %411 }
 0x19d   :  { %v449_v15 = vmul.f32 %v8867_v40, %v412_v2 }
 0x19f   :  { %v481_v3 = vadd.f32 %v449_v15, %v284_v38 }
 0x1a1   :  { %v601_v21 = vpop.permute.xlu1 %600  ;;  %v678_v62 = vadd.f32 %v646_v28, %v481_v3 }
 0x1a2   :  { %v644_v34 = vmul.f32 %v8889_v51, %v601_v21 }
 0x1a3   :  { %v1048_v10 = vadd.f32 %v9103_v16, %v678_v62 }
 0x1a4   :  { %v676_v57 = vadd.f32 %v644_v34, %v479_v32 }
 0x1a5   :  { %v605_v39 = vpop.permute.xlu1 %604  ;;  %v9238_v40 = vadd.f32 %v8933_v58, %v1048_v10 }
 0x1a6   :  { %v1046_v19 = vadd.f32 %v9106_v42, %v676_v57  ;;  %v645_v45 = vmul.f32 %v8889_v51, %v605_v39 }
 0x1a7   :  { %v1119_v42 = vmax.f32 %v9238_v40, 0.0 }
 0x1a8   :  { %v9234_v41 = vadd.f32 %v8933_v58, %v1046_v19  ;;  %v677_v53 = vadd.f32 %v645_v45, %v480_v12 }
 0x1aa   :  { %v1117_v7 = vmax.f32 %v9234_v41, 0.0  ;;  %v1047_v31 = vadd.f32 %v9075_v26, %v677_v53 }
 0x1ac   :  { %v9243_v24 = vadd.f32 %v8933_v58, %v1047_v31  ;;  %v1134_v16 = vpack.c.bf16 %v1117_v7, %v1116_v36 }
 0x1ae   :  { %7754 = vmatprep.mubr.bf16.mxu1 %v1134_v16  ;;  %v1118_v51 = vmax.f32 %v9243_v24, 0.0 }
 0x1b0   :  { %v1135_v4 = vpack.c.bf16 %v1119_v42, %v1118_v51 }
 0x1b2   :  { %7755 = vmatmul.mubr.bf16.gmra.mrb[44].mxu1 %v1135_v4 }
 0x1d4   :  { %v7728_v13 = vpop.f32.mrb[16].mxu1 }
 0x1d5   :  { %v1248_v37 = vadd.f32 %v7728_v13, %v9250_v6  ;;  %v1239_v26 = vpop.f32.mrb[17].mxu1 }
 0x1d6   :  { %v1240_v58 = vadd.f32 %v9250_v6, %v1239_v26  ;;  %v7729_v22 = vpop.f32.mrb[18].mxu1 }
 0x1d7   :  { %v1251_v25 = vadd.f32 %v7729_v22, %v9250_v6  ;;  %v1242_v55 = vpop.f32.mrb[19].mxu1  ;;  %v1368_v2 = vmax.f32 %v1248_v37, 0.0 }
 0x1d8   :  { %v1243_v1 = vadd.f32 %v9250_v6, %v1242_v55  ;;  %v1366_v15 = vmax.f32 %v1240_v58, 0.0 }
 0x1d9   :  { %v1369_v38 = vmax.f32 %v1251_v25, 0.0 }
 0x1da   :  { %v1367_v29 = vmax.f32 %v1243_v1, 0.0 }
 0x1db   :  { %v1399_v28 = vpack.c.bf16 %v1369_v38, %v1368_v2 }
 0x1dc   :  { %v1398_v3 = vpack.c.bf16 %v1367_v29, %v1366_v15  ;;  %v7732_v49 = vpop.f32.mrb[20].mxu1 }
 0x1dd   :  { %v1264_v63 = vadd.f32 %v7732_v49, %v9250_v6  ;;  %v1255_v21 = vpop.f32.mrb[21].mxu1 }
 0x1de   :  { %7774 = vmatprep.mubr.bf16.mxu0 %v1398_v3  ;;  %v1256_v32 = vadd.f32 %v9250_v6, %v1255_v21  ;;  %v7733_v34 = vpop.f32.mrb[22].mxu1 }
 0x1df   :  { %7775 = vmatmul.mubr.bf16.vlgmr.msra.gmra.mrb[16].mxu0 %v1399_v28  ;;  %v1267_v62 = vadd.f32 %v7733_v34, %v9250_v6  ;;  %v1258_v59 = vpop.f32.mrb[23].mxu1  ;;  %v1372_v12 = vmax.f32 %v1264_v63, 0.0 }
 0x1e0   :  { %v1259_v57 = vadd.f32 %v9250_v6, %v1258_v59  ;;  %v1370_v10 = vmax.f32 %v1256_v32, 0.0 }
 0x1e1   :  { %v1373_v39 = vmax.f32 %v1267_v62, 0.0 }
 0x1e2   :  { %v1371_v19 = vmax.f32 %v1259_v57, 0.0  ;;  %v8282_v57 = vld [vmem:[%s11124_s5 + $0x40] sm:$0xff]  }
 0x1e3   :  { %v1401_v45 = vpack.c.bf16 %v1373_v39, %v1372_v12  ;;  %v8283_v12 = vld [vmem:[%s11124_s5 + $0x48] sm:$0xff]   ;;  %7806 = vmatprep.subr.bf16.mxu1 %v8282_v57  ;;  %v8284_v39 = vld [vmem:[%s11124_s5 + $0x50] sm:$0xff]  }
 0x1e4   :  { %v1400_v53 = vpack.c.bf16 %v1371_v19, %v1370_v10  ;;  %v7736_v36 = vpop.f32.mrb[24].mxu1  ;;  %7807 = vmatpush3.bf16.msra.mxu1 %v8282_v57  ;;  %v8285_v10 = vld [vmem:[%s11124_s5 + $0x58] sm:$0xff]   ;;  %v8286_v19 = vld [vmem:[%s11124_s5 + $0x60] sm:$0xff]  }
 0x1e5   :  { %v1280_v7 = vadd.f32 %v7736_v36, %v9250_v6  ;;  %v1271_v31 = vpop.f32.mrb[25].mxu1  ;;  %7808 = vmatprep.subr.bf16.mxu1 %v8283_v12 }
 0x1e6   :  { %v1272_v16 = vadd.f32 %v9250_v6, %v1271_v31  ;;  %v7737_v42 = vpop.f32.mrb[26].mxu1  ;;  %7778 = vmatprep.mubr.bf16.mxu0 %v1400_v53 }
 0x1e7   :  { %v1283_v51 = vadd.f32 %v7737_v42, %v9250_v6  ;;  %v1274_v4 = vpop.f32.mrb[27].mxu1  ;;  %7779 = vmatmul.mubr.bf16.gmra.mrb[20].mxu0 %v1401_v45  ;;  %v1376_v37 = vmax.f32 %v1280_v7, 0.0 }
 0x1e8   :  { %v1275_v13 = vadd.f32 %v9250_v6, %v1274_v4  ;;  %v1374_v58 = vmax.f32 %v1272_v16, 0.0  ;;  %7809 = vmatpush3.bf16.msra.mxu1 %v8283_v12 }
 0x1e9   :  { %v1377_v26 = vmax.f32 %v1283_v51, 0.0  ;;  %7810 = vmatprep.subr.bf16.mxu1 %v8284_v39 }
 0x1ea   :  { %v1375_v22 = vmax.f32 %v1275_v13, 0.0 }
 0x1eb   :  { %v1403_v25 = vpack.c.bf16 %v1377_v26, %v1376_v37 }
 0x1ec   :  { %v1402_v55 = vpack.c.bf16 %v1375_v22, %v1374_v58  ;;  %7811 = vmatpush3.bf16.msra.mxu1 %v8284_v39 }
 0x1ed   :  { %7812 = vmatprep.subr.bf16.mxu1 %v8285_v10 }
 0x1ee   :  { %7782 = vmatprep.mubr.bf16.mxu0 %v1402_v55  ;;  %v8288_v55 = vld [vmem:[%s11124_s5 + $0x70] sm:$0xff]  }
 0x1ef   :  { %7783 = vmatmul.mubr.bf16.gmra.mrb[24].mxu0 %v1403_v25  ;;  %v8287_v25 = vld [vmem:[%s11124_s5 + $0x68] sm:$0xff]  }
 0x1f0   :  { %7813 = vmatpush3.bf16.msra.mxu1 %v8285_v10 }
 0x1f1   :  { %7814 = vmatprep.subr.bf16.mxu1 %v8286_v19 }
 0x1f4   :  { %7815 = vmatpush3.bf16.msra.mxu1 %v8286_v19 }
 0x1f5   :  { %7816 = vmatprep.subr.bf16.mxu1 %v8287_v25 }
 0x1f8   :  { %7817 = vmatpush3.bf16.msra.mxu1 %v8287_v25 }
 0x1f9   :  { %v7740_v1 = vpop.f32.mrb[28].mxu1  ;;  %7818 = vmatprep.subr.bf16.mxu1 %v8288_v55 }
 0x1fa   :  { %v1296_v2 = vadd.f32 %v7740_v1, %v9250_v6  ;;  %v1287_v38 = vpop.f32.mrb[29].mxu1  ;;  %v8289_v1 = vld [vmem:[%s11124_s5 + $0x78] sm:$0xff]  }
 0x1fb   :  { %v1288_v15 = vadd.f32 %v9250_v6, %v1287_v38  ;;  %v7741_v29 = vpop.f32.mrb[30].mxu1 }
 0x1fc   :  { %v1299_v28 = vadd.f32 %v7741_v29, %v9250_v6  ;;  %v1290_v3 = vpop.f32.mrb[31].mxu1  ;;  %v1380_v63 = vmax.f32 %v1296_v2, 0.0  ;;  %7819 = vmatpush3.bf16.msra.mxu1 %v8288_v55 }
 0x1fd   :  { %v1291_v49 = vadd.f32 %v9250_v6, %v1290_v3  ;;  %v1378_v32 = vmax.f32 %v1288_v15, 0.0  ;;  %7820 = vmatprep.subr.bf16.mxu1 %v8289_v1 }
 0x1fe   :  { %v1381_v21 = vmax.f32 %v1299_v28, 0.0 }
 0x1ff   :  { %v1379_v34 = vmax.f32 %v1291_v49, 0.0 }
 0x200   :  { %v1405_v62 = vpack.c.bf16 %v1381_v21, %v1380_v63  ;;  %7821 = vmatpush3.bf16.msra.mxu1 %v8289_v1 }
 0x201   :  { %v1404_v59 = vpack.c.bf16 %v1379_v34, %v1378_v32 }
 0x203   :  { %7786 = vmatprep.mubr.bf16.mxu0 %v1404_v59 }
 0x204   :  { %7787 = vmatmul.mubr.bf16.gmra.mrb[28].mxu0 %v1405_v62 }
 0x21e   :  { %v7744_v45 = vpop.f32.mrb[32].mxu1 }
 0x21f   :  { %v1312_v53 = vadd.f32 %v7744_v45, %v9250_v6  ;;  %v1303_v36 = vpop.f32.mrb[33].mxu1 }
 0x220   :  { %v1304_v7 = vadd.f32 %v9250_v6, %v1303_v36  ;;  %v7745_v31 = vpop.f32.mrb[34].mxu1 }
 0x221   :  { %v1315_v16 = vadd.f32 %v7745_v31, %v9250_v6  ;;  %v1306_v42 = vpop.f32.mrb[35].mxu1  ;;  %v1384_v4 = vmax.f32 %v1312_v53, 0.0 }
 0x222   :  { %v1307_v51 = vadd.f32 %v9250_v6, %v1306_v42  ;;  %v1382_v37 = vmax.f32 %v1304_v7, 0.0 }
 0x223   :  { %v1385_v13 = vmax.f32 %v1315_v16, 0.0 }
 0x224   :  { %v1383_v26 = vmax.f32 %v1307_v51, 0.0 }
 0x225   :  { %v1407_v58 = vpack.c.bf16 %v1385_v13, %v1384_v4 }
 0x226   :  { %v1406_v22 = vpack.c.bf16 %v1383_v26, %v1382_v37 }
 0x228   :  { %7790 = vmatprep.mubr.bf16.mxu0 %v1406_v22 }
 0x229   :  { %7791 = vmatmul.mubr.bf16.gmra.mrb[32].mxu0 %v1407_v58 }
 0x23f   :  { %v7748_v2 = vpop.f32.mrb[36].mxu1 }
 0x240   :  { %v1328_v38 = vadd.f32 %v7748_v2, %v9250_v6  ;;  %v1319_v15 = vpop.f32.mrb[37].mxu1 }
 0x241   :  { %v1320_v29 = vadd.f32 %v9250_v6, %v1319_v15  ;;  %v7749_v28 = vpop.f32.mrb[38].mxu1 }
 0x242   :  { %v1331_v3 = vadd.f32 %v7749_v28, %v9250_v6  ;;  %v1322_v49 = vpop.f32.mrb[39].mxu1  ;;  %v1388_v21 = vmax.f32 %v1328_v38, 0.0 }
 0x243   :  { %v1323_v63 = vadd.f32 %v9250_v6, %v1322_v49  ;;  %v1386_v34 = vmax.f32 %v1320_v29, 0.0 }
 0x244   :  { %v1389_v32 = vmax.f32 %v1331_v3, 0.0 }
 0x245   :  { %v1387_v62 = vmax.f32 %v1323_v63, 0.0  ;;  %v9311_v63 = vld [vmem:[%s11127_s8] ss:$0 sm:$0xff] }
 0x246   :  { %v1409_v59 = vpack.c.bf16 %v1389_v32, %v1388_v21 }
 0x247   :  { %v1408_v57 = vpack.c.bf16 %v1387_v62, %v1386_v34 }
 0x249   :  { %7794 = vmatprep.mubr.bf16.mxu0 %v1408_v57 }
 0x24a   :  { %7795 = vmatmul.mubr.bf16.gmra.mrb[36].mxu0 %v1409_v59 }
 0x264   :  { %v7752_v12 = vpop.f32.mrb[40].mxu1 }
 0x265   :  { %v1344_v39 = vadd.f32 %v7752_v12, %v9250_v6  ;;  %v1335_v10 = vpop.f32.mrb[41].mxu1 }
 0x266   :  { %v1336_v19 = vadd.f32 %v9250_v6, %v1335_v10  ;;  %v7753_v45 = vpop.f32.mrb[42].mxu1 }
 0x267   :  { %v1347_v53 = vadd.f32 %v7753_v45, %v9250_v6  ;;  %v1338_v36 = vpop.f32.mrb[43].mxu1  ;;  %v1392_v31 = vmax.f32 %v1344_v39, 0.0 }
 0x268   :  { %v1339_v7 = vadd.f32 %v9250_v6, %v1338_v36  ;;  %v1390_v42 = vmax.f32 %v1336_v19, 0.0 }
 0x269   :  { %v1393_v16 = vmax.f32 %v1347_v53, 0.0 }
 0x26a   :  { %v1391_v51 = vmax.f32 %v1339_v7, 0.0 }
 0x26b   :  { %v1411_v4 = vpack.c.bf16 %v1393_v16, %v1392_v31 }
 0x26c   :  { %v1410_v13 = vpack.c.bf16 %v1391_v51, %v1390_v42 }
 0x26e   :  { %7798 = vmatprep.mubr.bf16.mxu0 %v1410_v13 }
 0x26f   :  { %7799 = vmatmul.mubr.bf16.gmra.mrb[40].mxu0 %v1411_v4 }
 0x285   :  { %v7756_v37 = vpop.f32.mrb[44].mxu1 }
 0x286   :  { %v1360_v26 = vadd.f32 %v7756_v37, %v9250_v6  ;;  %v1351_v58 = vpop.f32.mrb[45].mxu1 }
 0x287   :  { %v1352_v22 = vadd.f32 %v9250_v6, %v1351_v58  ;;  %v7757_v25 = vpop.f32.mrb[46].mxu1 }
 0x288   :  { %v1363_v55 = vadd.f32 %v7757_v25, %v9250_v6  ;;  %v1354_v1 = vpop.f32.mrb[47].mxu1  ;;  %v1396_v38 = vmax.f32 %v1360_v26, 0.0 }
 0x289   :  { %v1355_v2 = vadd.f32 %v9250_v6, %v1354_v1  ;;  %v1394_v29 = vmax.f32 %v1352_v22, 0.0 }
 0x28a   :  { %v1397_v15 = vmax.f32 %v1363_v55, 0.0 }
 0x28b   :  { %v1395_v28 = vmax.f32 %v1355_v2, 0.0 }
 0x28c   :  { %v1413_v3 = vpack.c.bf16 %v1397_v15, %v1396_v38 }
 0x28d   :  { %v1412_v49 = vpack.c.bf16 %v1395_v28, %v1394_v29 }
 0x28f   :  { %7802 = vmatprep.mubr.bf16.mxu0 %v1412_v49 }
 0x290   :  { %7803 = vmatmul.mubr.bf16.gmra.mrb[44].mxu0 %v1413_v3 }
 0x2b2   :  { %v7776_v21 = vpop.f32.mrb[16].mxu0 }
 0x2b3   :  { %v1526_v32 = vadd.f32 %v7776_v21, %v9311_v63  ;;  %v1517_v34 = vpop.f32.mrb[17].mxu0  ;;  %v11147_v21 = vld [vmem:[#allocation9_spill] sm:$0xff] }
 0x2b4   :  { %v1518_v62 = vadd.f32 %v9311_v63, %v1517_v34  ;;  %v7777_v6 = vpop.f32.mrb[18].mxu0 }
 0x2b5   :  { %v1529_v59 = vadd.f32 %v7777_v6, %v9311_v63  ;;  %v1520_v57 = vpop.f32.mrb[19].mxu0  ;;  %v9321_v10 = vadd.f32 %v1526_v32, %v8955_v27 }
 0x2b6   :  { %v9317_v12 = vadd.f32 %v1518_v62, %v8948_v43  ;;  %v1521_v39 = vadd.f32 %v9311_v63, %v1520_v57  ;;  %v11148_v62 = vld [vmem:[#allocation11_spill] sm:$0xff] }
 0x2b7   :  { %v9324_v19 = vadd.f32 %v1529_v59, %v8958_v48  ;;  %v1678_v43 = vmax.f32 %v9321_v10, 0.0  ;;  %v11149_v59 = vld [vmem:[#allocation10_spill] sm:$0xff] }
 0x2b8   :  { %v9327_v45 = vadd.f32 %v1521_v39, %v8967_v23  ;;  %v1676_v36 = vmax.f32 %v9317_v12, 0.0  ;;  %v11150_v39 = vld [vmem:[#allocation12_spill] sm:$0xff] }
 0x2b9   :  { %v1679_v53 = vmax.f32 %v9324_v19, 0.0 }
 0x2ba   :  { %v1677_v7 = vmax.f32 %v9327_v45, 0.0  ;;  %v7780_v31 = vpop.f32.mrb[20].mxu0 }
 0x2bb   :  { %v1542_v16 = vadd.f32 %v7780_v31, %v9311_v63  ;;  %v1533_v42 = vpop.f32.mrb[21].mxu0  ;;  %v1709_v51 = vpack.c.bf16 %v1679_v53, %v1678_v43 }
 0x2bc   :  { %v1708_v27 = vpack.c.bf16 %v1677_v7, %v1676_v36  ;;  %v1534_v48 = vadd.f32 %v9311_v63, %v1533_v42  ;;  %v7781_v4 = vpop.f32.mrb[22].mxu0 }
 0x2bd   :  { %v1545_v23 = vadd.f32 %v7781_v4, %v9311_v63  ;;  %v1536_v13 = vpop.f32.mrb[23].mxu0  ;;  %v9341_v58 = vadd.f32 %v1542_v16, %v9010_v9 }
 0x2be   :  { %7822 = vmatprep.mubr.bf16.mxu1 %v1708_v27  ;;  %v9337_v37 = vadd.f32 %v1534_v48, %v8998_v0  ;;  %v1537_v26 = vadd.f32 %v9311_v63, %v1536_v13 }
 0x2bf   :  { %7823 = vmatmul.mubr.bf16.vlgmr.msra.gmra.mrb[48].mxu1 %v1709_v51  ;;  %v9344_v22 = vadd.f32 %v1545_v23, %v9007_v52  ;;  %v1682_v38 = vmax.f32 %v9341_v58, 0.0 }
 0x2c0   :  { %v9347_v25 = vadd.f32 %v1537_v26, %v9013_v14  ;;  %v1680_v1 = vmax.f32 %v9337_v37, 0.0 }
 0x2c1   :  { %v1683_v55 = vmax.f32 %v9344_v22, 0.0 }
 0x2c2   :  { %v1681_v2 = vmax.f32 %v9347_v25, 0.0  ;;  %v7784_v0 = vpop.f32.mrb[24].mxu0 }
 0x2c3   :  { %v1558_v15 = vadd.f32 %v7784_v0, %v9311_v63  ;;  %v1549_v29 = vpop.f32.mrb[25].mxu0  ;;  %v1711_v49 = vpack.c.bf16 %v1683_v55, %v1682_v38 }
 0x2c4   :  { %v1550_v9 = vadd.f32 %v9311_v63, %v1549_v29  ;;  %v7785_v28 = vpop.f32.mrb[26].mxu0  ;;  %v1710_v52 = vpack.c.bf16 %v1681_v2, %v1680_v1 }
 0x2c5   :  { %v1561_v3 = vadd.f32 %v7785_v28, %v9311_v63  ;;  %v1552_v14 = vpop.f32.mrb[27].mxu0  ;;  %v9361_v6 = vadd.f32 %v1558_v15, %v11148_v62 }
 0x2c6   :  { %v9357_v32 = vadd.f32 %v1550_v9, %v11147_v21  ;;  %v1553_v34 = vadd.f32 %v9311_v63, %v1552_v14  ;;  %7826 = vmatprep.mubr.bf16.mxu1 %v1710_v52 }
 0x2c7   :  { %v9364_v57 = vadd.f32 %v1561_v3, %v11149_v59  ;;  %7827 = vmatmul.mubr.bf16.gmra.mrb[52].mxu1 %v1711_v49  ;;  %v1686_v31 = vmax.f32 %v9361_v6, 0.0  ;;  %v8291_v3 = vld [vmem:[#allocation3 + $0x48] sm:$0xff]   ;;  %v8294_v49 = vld [vmem:[#allocation3 + $0x60] sm:$0xff]  }
 0x2c8   :  { %v9367_v53 = vadd.f32 %v1553_v34, %v11150_v39  ;;  %v1684_v7 = vmax.f32 %v9357_v32, 0.0 }
 0x2c9   :  { %v1687_v36 = vmax.f32 %v9364_v57, 0.0 }
 0x2ca   :  { %v1685_v43 = vmax.f32 %v9367_v53, 0.0 }
 0x2cb   :  { %v1713_v42 = vpack.c.bf16 %v1687_v36, %v1686_v31  ;;  %v8295_v31 = vld [vmem:[#allocation3 + $0x68] sm:$0xff]  }
 0x2cc   :  { %v1712_v16 = vpack.c.bf16 %v1685_v43, %v1684_v7 }
 0x2ce   :  { %7830 = vmatprep.mubr.bf16.mxu1 %v1712_v16 }
 0x2cf   :  { %7831 = vmatmul.mubr.bf16.gmra.mrb[56].mxu1 %v1713_v42 }
 0x2d7   :  { %v7788_v27 = vpop.f32.mrb[28].mxu0 }
 0x2d8   :  { %v1574_v51 = vadd.f32 %v7788_v27, %v9311_v63  ;;  %v1565_v48 = vpop.f32.mrb[29].mxu0 }
 0x2d9   :  { %v1566_v4 = vadd.f32 %v9311_v63, %v1565_v48  ;;  %v7789_v23 = vpop.f32.mrb[30].mxu0 }
 0x2da   :  { %v1577_v13 = vadd.f32 %v7789_v23, %v9311_v63  ;;  %v1568_v26 = vpop.f32.mrb[31].mxu0  ;;  %v9381_v2 = vadd.f32 %v1574_v51, %v9097_v50  ;;  %v8290_v50 = vld [vmem:[#allocation3 + $0x40] sm:$0xff]  }
 0x2db   :  { %v9377_v55 = vadd.f32 %v1566_v4, %v9083_v61  ;;  %v1569_v1 = vadd.f32 %v9311_v63, %v1568_v26  ;;  %7854 = vmatprep.subr.bf16.mxu0 %v8290_v50 }
 0x2dc   :  { %v9384_v0 = vadd.f32 %v1577_v13, %v9093_v11  ;;  %v1690_v61 = vmax.f32 %v9381_v2, 0.0  ;;  %7855 = vmatpush3.bf16.msra.mxu0 %v8290_v50  ;;  %v8292_v11 = vld [vmem:[#allocation3 + $0x50] sm:$0xff]  }
 0x2dd   :  { %v9387_v38 = vadd.f32 %v1569_v1, %v9087_v35  ;;  %v1688_v29 = vmax.f32 %v9377_v55, 0.0  ;;  %7856 = vmatprep.subr.bf16.mxu0 %v8291_v3  ;;  %v8293_v35 = vld [vmem:[#allocation3 + $0x58] sm:$0xff]  }
 0x2de   :  { %v1691_v15 = vmax.f32 %v9384_v0, 0.0 }
 0x2df   :  { %v1689_v9 = vmax.f32 %v9387_v38, 0.0 }
 0x2e0   :  { %v1715_v52 = vpack.c.bf16 %v1691_v15, %v1690_v61  ;;  %7857 = vmatpush3.bf16.msra.mxu0 %v8291_v3 }
 0x2e1   :  { %v1714_v28 = vpack.c.bf16 %v1689_v9, %v1688_v29  ;;  %7858 = vmatprep.subr.bf16.mxu0 %v8292_v11 }
 0x2e3   :  { %7834 = vmatprep.mubr.bf16.mxu1 %v1714_v28 }
 0x2e4   :  { %7835 = vmatmul.mubr.bf16.gmra.mrb[60].mxu1 %v1715_v52  ;;  %7859 = vmatpush3.bf16.msra.mxu0 %v8292_v11 }
 0x2e5   :  { %7860 = vmatprep.subr.bf16.mxu0 %v8293_v35 }
 0x2e8   :  { %7861 = vmatpush3.bf16.msra.mxu0 %v8293_v35 }
 0x2e9   :  { %7862 = vmatprep.subr.bf16.mxu0 %v8294_v49 }
 0x2ec   :  { %7863 = vmatpush3.bf16.msra.mxu0 %v8294_v49 }
 0x2ed   :  { %7864 = vmatprep.subr.bf16.mxu0 %v8295_v31 }
 0x2f0   :  { %7865 = vmatpush3.bf16.msra.mxu0 %v8295_v31 }
 0x2fc   :  { %v7792_v14 = vpop.f32.mrb[32].mxu0 }
 0x2fd   :  { %v1590_v21 = vadd.f32 %v7792_v14, %v9311_v63  ;;  %v1581_v34 = vpop.f32.mrb[33].mxu0 }
 0x2fe   :  { %v1582_v62 = vadd.f32 %v9311_v63, %v1581_v34  ;;  %v7793_v59 = vpop.f32.mrb[34].mxu0 }
 0x2ff   :  { %v1593_v39 = vadd.f32 %v7793_v59, %v9311_v63  ;;  %v1584_v36 = vpop.f32.mrb[35].mxu0  ;;  %v9401_v16 = vadd.f32 %v1590_v21, %v9136_v5  ;;  %v8296_v5 = vld [vmem:[#allocation3 + $0x70] sm:$0xff]  }
 0x300   :  { %v9397_v7 = vadd.f32 %v1582_v62, %v9129_v56  ;;  %v1585_v43 = vadd.f32 %v9311_v63, %v1584_v36  ;;  %7866 = vmatprep.subr.bf16.mxu0 %v8296_v5 }
 0x301   :  { %v9404_v42 = vadd.f32 %v1593_v39, %v9140_v17  ;;  %v1694_v4 = vmax.f32 %v9401_v16, 0.0  ;;  %7867 = vmatpush3.bf16.msra.mxu0 %v8296_v5 }
 0x302   :  { %v9407_v27 = vadd.f32 %v1585_v43, %v9122_v30  ;;  %v1692_v48 = vmax.f32 %v9397_v7, 0.0  ;;  %v8297_v30 = vld [vmem:[#allocation3 + $0x78] sm:$0xff]  }
 0x303   :  { %v1695_v51 = vmax.f32 %v9404_v42, 0.0  ;;  %7868 = vmatprep.subr.bf16.mxu0 %v8297_v30 }
 0x304   :  { %v1693_v56 = vmax.f32 %v9407_v27, 0.0 }
 0x305   :  { %v1717_v13 = vpack.c.bf16 %v1695_v51, %v1694_v4  ;;  %7869 = vmatpush3.bf16.msra.mxu0 %v8297_v30 }
 0x306   :  { %v1716_v23 = vpack.c.bf16 %v1693_v56, %v1692_v48 }
 0x308   :  { %7838 = vmatprep.mubr.bf16.mxu1 %v1716_v23 }
 0x309   :  { %7839 = vmatmul.mubr.bf16.gmra.mrb[64].mxu1 %v1717_v13 }
 0x31d   :  { %v7796_v17 = vpop.f32.mrb[36].mxu0 }
 0x31e   :  { %v1606_v26 = vadd.f32 %v7796_v17, %v9311_v63  ;;  %v1597_v1 = vpop.f32.mrb[37].mxu0 }
 0x31f   :  { %v1598_v15 = vadd.f32 %v9311_v63, %v1597_v1  ;;  %v7797_v29 = vpop.f32.mrb[38].mxu0 }
 0x320   :  { %v1609_v9 = vadd.f32 %v7797_v29, %v9311_v63  ;;  %v1600_v61 = vpop.f32.mrb[39].mxu0  ;;  %v9421_v50 = vadd.f32 %v1606_v26, %v9175_v54 }
 0x321   :  { %v9417_v28 = vadd.f32 %v1598_v15, %v9160_v20  ;;  %v1601_v52 = vadd.f32 %v9311_v63, %v1600_v61 }
 0x322   :  { %v9424_v3 = vadd.f32 %v1609_v9, %v9170_v46  ;;  %v1698_v20 = vmax.f32 %v9421_v50, 0.0 }
 0x323   :  { %v9427_v11 = vadd.f32 %v1601_v52, %v9166_v44  ;;  %v1696_v14 = vmax.f32 %v9417_v28, 0.0 }
 0x324   :  { %v1699_v35 = vmax.f32 %v9424_v3, 0.0 }
 0x325   :  { %v1697_v49 = vmax.f32 %v9427_v11, 0.0 }
 0x326   :  { %v1719_v34 = vpack.c.bf16 %v1699_v35, %v1698_v20 }
 0x327   :  { %v1718_v21 = vpack.c.bf16 %v1697_v49, %v1696_v14 }
 0x329   :  { %7842 = vmatprep.mubr.bf16.mxu1 %v1718_v21 }
 0x32a   :  { %7843 = vmatmul.mubr.bf16.gmra.mrb[68].mxu1 %v1719_v34 }
 0x342   :  { %v7800_v54 = vpop.f32.mrb[40].mxu0 }
 0x343   :  { %v1622_v62 = vadd.f32 %v7800_v54, %v9311_v63  ;;  %v1613_v46 = vpop.f32.mrb[41].mxu0 }
 0x344   :  { %v1614_v59 = vadd.f32 %v9311_v63, %v1613_v46  ;;  %v7801_v44 = vpop.f32.mrb[42].mxu0 }
 0x345   :  { %v1625_v39 = vadd.f32 %v7801_v44, %v9311_v63  ;;  %v1616_v36 = vpop.f32.mrb[43].mxu0  ;;  %v9441_v51 = vadd.f32 %v1622_v62, %v9206_v18 }
 0x346   :  { %v9437_v43 = vadd.f32 %v1614_v59, %v9199_v8  ;;  %v1617_v31 = vadd.f32 %v9311_v63, %v1616_v36 }
 0x347   :  { %v9444_v48 = vadd.f32 %v1625_v39, %v9210_v60  ;;  %v1702_v8 = vmax.f32 %v9441_v51, 0.0 }
 0x348   :  { %v9447_v56 = vadd.f32 %v1617_v31, %v9192_v33  ;;  %v1700_v23 = vmax.f32 %v9437_v43, 0.0 }
 0x349   :  { %v1703_v4 = vmax.f32 %v9444_v48, 0.0 }
 0x34a   :  { %v1701_v13 = vmax.f32 %v9447_v56, 0.0 }
 0x34b   :  { %v1721_v30 = vpack.c.bf16 %v1703_v4, %v1702_v8 }
 0x34c   :  { %v1720_v5 = vpack.c.bf16 %v1701_v13, %v1700_v23 }
 0x34e   :  { %7846 = vmatprep.mubr.bf16.mxu1 %v1720_v5 }
 0x34f   :  { %7847 = vmatmul.mubr.bf16.gmra.mrb[72].mxu1 %v1721_v30 }
 0x363   :  { %v7804_v18 = vpop.f32.mrb[44].mxu0 }
 0x364   :  { %v1638_v17 = vadd.f32 %v7804_v18, %v9311_v63  ;;  %v1629_v60 = vpop.f32.mrb[45].mxu0 }
 0x365   :  { %v1630_v26 = vadd.f32 %v9311_v63, %v1629_v60  ;;  %v7805_v33 = vpop.f32.mrb[46].mxu0 }
 0x366   :  { %v1641_v1 = vadd.f32 %v7805_v33, %v9311_v63  ;;  %v1632_v15 = vpop.f32.mrb[47].mxu0  ;;  %v9461_v61 = vadd.f32 %v1638_v17, %v9243_v24 }
 0x367   :  { %v9457_v29 = vadd.f32 %v1630_v26, %v9228_v47  ;;  %v1633_v9 = vadd.f32 %v9311_v63, %v1632_v15 }
 0x368   :  { %v9464_v52 = vadd.f32 %v1641_v1, %v9238_v40  ;;  %v1706_v47 = vmax.f32 %v9461_v61, 0.0  ;;  %v9476_v40 = vld [vmem:[%s11125_s6 + $0x1] ss:$0 sm:$0xff] }
 0x369   :  { %v9467_v35 = vadd.f32 %v1633_v9, %v9234_v41  ;;  %v1704_v49 = vmax.f32 %v9457_v29, 0.0 }
 0x36a   :  { %v1707_v14 = vmax.f32 %v9464_v52, 0.0 }
 0x36b   :  { %v1705_v20 = vmax.f32 %v9467_v35, 0.0 }
 0x36c   :  { %v1723_v34 = vpack.c.bf16 %v1707_v14, %v1706_v47 }
 0x36d   :  { %v1722_v21 = vpack.c.bf16 %v1705_v20, %v1704_v49 }
 0x36f   :  { %7850 = vmatprep.mubr.bf16.mxu1 %v1722_v21 }
 0x370   :  { %7851 = vmatmul.mubr.bf16.gmra.mrb[76].mxu1 %v1723_v34 }
 0x392   :  { %v7824_v24 = vpop.f32.mrb[48].mxu1 }
 0x393   :  { %v1837_v41 = vadd.f32 %v7824_v24, %v9476_v40  ;;  %v1828_v63 = vpop.f32.mrb[49].mxu1 }
 0x394   :  { %v1829_v54 = vadd.f32 %v9476_v40, %v1828_v63  ;;  %v7825_v62 = vpop.f32.mrb[50].mxu1 }
 0x395   :  { %v1840_v46 = vadd.f32 %v7825_v62, %v9476_v40  ;;  %v1831_v59 = vpop.f32.mrb[51].mxu1  ;;  %v1957_v39 = vmax.f32 %v1837_v41, 0.0 }
 0x396   :  { %v1832_v44 = vadd.f32 %v9476_v40, %v1831_v59  ;;  %v1955_v31 = vmax.f32 %v1829_v54, 0.0 }
 0x397   :  { %v1958_v36 = vmax.f32 %v1840_v46, 0.0 }
 0x398   :  { %v1956_v4 = vmax.f32 %v1832_v44, 0.0 }
 0x399   :  { %v1988_v23 = vpack.c.bf16 %v1958_v36, %v1957_v39 }
 0x39a   :  { %v1987_v13 = vpack.c.bf16 %v1956_v4, %v1955_v31  ;;  %v7828_v8 = vpop.f32.mrb[52].mxu1 }
 0x39b   :  { %v1853_v5 = vadd.f32 %v7828_v8, %v9476_v40  ;;  %v1844_v30 = vpop.f32.mrb[53].mxu1 }
 0x39c   :  { %7870 = vmatprep.mubr.bf16.mxu0 %v1987_v13  ;;  %v1845_v18 = vadd.f32 %v9476_v40, %v1844_v30  ;;  %v7829_v17 = vpop.f32.mrb[54].mxu1 }
 0x39d   :  { %7871 = vmatmul.mubr.bf16.vlgmr.msra.gmra.mrb[48].mxu0 %v1988_v23  ;;  %v1856_v60 = vadd.f32 %v7829_v17, %v9476_v40  ;;  %v1847_v26 = vpop.f32.mrb[55].mxu1  ;;  %v1961_v1 = vmax.f32 %v1853_v5, 0.0 }
 0x39e   :  { %v1848_v33 = vadd.f32 %v9476_v40, %v1847_v26  ;;  %v1959_v9 = vmax.f32 %v1845_v18, 0.0 }
 0x39f   :  { %v1962_v15 = vmax.f32 %v1856_v60, 0.0 }
 0x3a0   :  { %v1960_v14 = vmax.f32 %v1848_v33, 0.0 }
 0x3a1   :  { %v1990_v49 = vpack.c.bf16 %v1962_v15, %v1961_v1 }
 0x3a2   :  { %v1989_v20 = vpack.c.bf16 %v1960_v14, %v1959_v9  ;;  %v7832_v47 = vpop.f32.mrb[56].mxu1  ;;  %v8298_v14 = vld [vmem:[%s11124_s5 + $0x80] sm:$0xff]  }
 0x3a3   :  { %v1869_v21 = vadd.f32 %v7832_v47, %v9476_v40  ;;  %v1860_v34 = vpop.f32.mrb[57].mxu1  ;;  %7902 = vmatprep.subr.bf16.mxu1 %v8298_v14  ;;  %v8301_v47 = vld [vmem:[%s11124_s5 + $0x98] sm:$0xff]  }
 0x3a4   :  { %v1861_v24 = vadd.f32 %v9476_v40, %v1860_v34  ;;  %v7833_v41 = vpop.f32.mrb[58].mxu1  ;;  %7874 = vmatprep.mubr.bf16.mxu0 %v1989_v20  ;;  %7903 = vmatpush3.bf16.msra.mxu1 %v8298_v14  ;;  %v8300_v20 = vld [vmem:[%s11124_s5 + $0x90] sm:$0xff]  }
 0x3a5   :  { %v1872_v63 = vadd.f32 %v7833_v41, %v9476_v40  ;;  %v1863_v54 = vpop.f32.mrb[59].mxu1  ;;  %7875 = vmatmul.mubr.bf16.gmra.mrb[52].mxu0 %v1990_v49  ;;  %v1965_v46 = vmax.f32 %v1869_v21, 0.0  ;;  %v8299_v49 = vld [vmem:[%s11124_s5 + $0x88] sm:$0xff]   ;;  %v8302_v21 = vld [vmem:[%s11124_s5 + $0xa0] sm:$0xff]  }
 0x3a6   :  { %v1864_v62 = vadd.f32 %v9476_v40, %v1863_v54  ;;  %v1963_v44 = vmax.f32 %v1861_v24, 0.0  ;;  %7904 = vmatprep.subr.bf16.mxu1 %v8299_v49 }
 0x3a7   :  { %v1966_v59 = vmax.f32 %v1872_v63, 0.0 }
 0x3a8   :  { %v1964_v39 = vmax.f32 %v1864_v62, 0.0  ;;  %7905 = vmatpush3.bf16.msra.mxu1 %v8299_v49 }
 0x3a9   :  { %v1992_v36 = vpack.c.bf16 %v1966_v59, %v1965_v46  ;;  %7906 = vmatprep.subr.bf16.mxu1 %v8300_v20 }
 0x3aa   :  { %v1991_v31 = vpack.c.bf16 %v1964_v39, %v1963_v44 }
 0x3ac   :  { %7878 = vmatprep.mubr.bf16.mxu0 %v1991_v31  ;;  %7907 = vmatpush3.bf16.msra.mxu1 %v8300_v20 }
 0x3ad   :  { %7879 = vmatmul.mubr.bf16.gmra.mrb[56].mxu0 %v1992_v36  ;;  %7908 = vmatprep.subr.bf16.mxu1 %v8301_v47 }
 0x3b0   :  { %7909 = vmatpush3.bf16.msra.mxu1 %v8301_v47 }
 0x3b1   :  { %7910 = vmatprep.subr.bf16.mxu1 %v8302_v21 }
 0x3b4   :  { %7911 = vmatpush3.bf16.msra.mxu1 %v8302_v21 }
 0x3b7   :  { %v7836_v4 = vpop.f32.mrb[60].mxu1 }
 0x3b8   :  { %v1885_v23 = vadd.f32 %v7836_v4, %v9476_v40  ;;  %v1876_v13 = vpop.f32.mrb[61].mxu1 }
 0x3b9   :  { %v1877_v8 = vadd.f32 %v9476_v40, %v1876_v13  ;;  %v7837_v5 = vpop.f32.mrb[62].mxu1  ;;  %v8303_v13 = vld [vmem:[%s11124_s5 + $0xa8] sm:$0xff]  }
 0x3ba   :  { %v1888_v30 = vadd.f32 %v7837_v5, %v9476_v40  ;;  %v1879_v18 = vpop.f32.mrb[63].mxu1  ;;  %v1969_v60 = vmax.f32 %v1885_v23, 0.0  ;;  %7912 = vmatprep.subr.bf16.mxu1 %v8303_v13  ;;  %v8305_v5 = vld [vmem:[%s11124_s5 + $0xb8] sm:$0xff]  }
 0x3bb   :  { %v1880_v17 = vadd.f32 %v9476_v40, %v1879_v18  ;;  %v1967_v33 = vmax.f32 %v1877_v8, 0.0  ;;  %7913 = vmatpush3.bf16.msra.mxu1 %v8303_v13  ;;  %v8304_v8 = vld [vmem:[%s11124_s5 + $0xb0] sm:$0xff]  }
 0x3bc   :  { %v1970_v26 = vmax.f32 %v1888_v30, 0.0  ;;  %7914 = vmatprep.subr.bf16.mxu1 %v8304_v8 }
 0x3bd   :  { %v1968_v1 = vmax.f32 %v1880_v17, 0.0 }
 0x3be   :  { %v1994_v15 = vpack.c.bf16 %v1970_v26, %v1969_v60 }
 0x3bf   :  { %v1993_v9 = vpack.c.bf16 %v1968_v1, %v1967_v33  ;;  %7915 = vmatpush3.bf16.msra.mxu1 %v8304_v8 }
 0x3c0   :  { %7916 = vmatprep.subr.bf16.mxu1 %v8305_v5 }
 0x3c1   :  { %7882 = vmatprep.mubr.bf16.mxu0 %v1993_v9 }
 0x3c2   :  { %7883 = vmatmul.mubr.bf16.gmra.mrb[60].mxu0 %v1994_v15 }
 0x3c3   :  { %7917 = vmatpush3.bf16.msra.mxu1 %v8305_v5 }
 0x3dc   :  { %v7840_v34 = vpop.f32.mrb[64].mxu1 }
 0x3dd   :  { %v1901_v24 = vadd.f32 %v7840_v34, %v9476_v40  ;;  %v1892_v41 = vpop.f32.mrb[65].mxu1 }
 0x3de   :  { %v1893_v63 = vadd.f32 %v9476_v40, %v1892_v41  ;;  %v7841_v54 = vpop.f32.mrb[66].mxu1 }
 0x3df   :  { %v1904_v62 = vadd.f32 %v7841_v54, %v9476_v40  ;;  %v1895_v46 = vpop.f32.mrb[67].mxu1  ;;  %v1973_v44 = vmax.f32 %v1901_v24, 0.0 }
 0x3e0   :  { %v1896_v59 = vadd.f32 %v9476_v40, %v1895_v46  ;;  %v1971_v36 = vmax.f32 %v1893_v63, 0.0 }
 0x3e1   :  { %v1974_v39 = vmax.f32 %v1904_v62, 0.0 }
 0x3e2   :  { %v1972_v31 = vmax.f32 %v1896_v59, 0.0 }
 0x3e3   :  { %v1996_v4 = vpack.c.bf16 %v1974_v39, %v1973_v44 }
 0x3e4   :  { %v1995_v23 = vpack.c.bf16 %v1972_v31, %v1971_v36 }
 0x3e6   :  { %7886 = vmatprep.mubr.bf16.mxu0 %v1995_v23 }
 0x3e7   :  { %7887 = vmatmul.mubr.bf16.gmra.mrb[64].mxu0 %v1996_v4 }
 0x3fd   :  { %v7844_v30 = vpop.f32.mrb[68].mxu1 }
 0x3fe   :  { %v1917_v18 = vadd.f32 %v7844_v30, %v9476_v40  ;;  %v1908_v17 = vpop.f32.mrb[69].mxu1 }
 0x3ff   :  { %v1909_v60 = vadd.f32 %v9476_v40, %v1908_v17  ;;  %v7845_v26 = vpop.f32.mrb[70].mxu1 }
 0x400   :  { %v1920_v33 = vadd.f32 %v7845_v26, %v9476_v40  ;;  %v1911_v1 = vpop.f32.mrb[71].mxu1  ;;  %v1977_v9 = vmax.f32 %v1917_v18, 0.0 }
 0x401   :  { %v1912_v15 = vadd.f32 %v9476_v40, %v1911_v1  ;;  %v1975_v49 = vmax.f32 %v1909_v60, 0.0 }
 0x402   :  { %v1978_v14 = vmax.f32 %v1920_v33, 0.0 }
 0x403   :  { %v1976_v20 = vmax.f32 %v1912_v15, 0.0 }
 0x404   :  { %v1998_v47 = vpack.c.bf16 %v1978_v14, %v1977_v9 }
 0x405   :  { %v1997_v21 = vpack.c.bf16 %v1976_v20, %v1975_v49  ;;  %v9537_v20 = vld [vmem:[%s11127_s8 + $0x1] ss:$0 sm:$0xff] }
 0x407   :  { %7890 = vmatprep.mubr.bf16.mxu0 %v1997_v21 }
 0x408   :  { %7891 = vmatmul.mubr.bf16.gmra.mrb[68].mxu0 %v1998_v47 }
 0x422   :  { %v7848_v34 = vpop.f32.mrb[72].mxu1 }
 0x423   :  { %v1933_v24 = vadd.f32 %v7848_v34, %v9476_v40  ;;  %v1924_v41 = vpop.f32.mrb[73].mxu1 }
 0x424   :  { %v1925_v63 = vadd.f32 %v9476_v40, %v1924_v41  ;;  %v7849_v54 = vpop.f32.mrb[74].mxu1 }
 0x425   :  { %v1936_v62 = vadd.f32 %v7849_v54, %v9476_v40  ;;  %v1927_v46 = vpop.f32.mrb[75].mxu1  ;;  %v1981_v44 = vmax.f32 %v1933_v24, 0.0 }
 0x426   :  { %v1928_v59 = vadd.f32 %v9476_v40, %v1927_v46  ;;  %v1979_v36 = vmax.f32 %v1925_v63, 0.0 }
 0x427   :  { %v1982_v39 = vmax.f32 %v1936_v62, 0.0 }
 0x428   :  { %v1980_v31 = vmax.f32 %v1928_v59, 0.0 }
 0x429   :  { %v2000_v4 = vpack.c.bf16 %v1982_v39, %v1981_v44 }
 0x42a   :  { %v1999_v23 = vpack.c.bf16 %v1980_v31, %v1979_v36 }
 0x42c   :  { %7894 = vmatprep.mubr.bf16.mxu0 %v1999_v23 }
 0x42d   :  { %7895 = vmatmul.mubr.bf16.gmra.mrb[72].mxu0 %v2000_v4 }
 0x443   :  { %v7852_v13 = vpop.f32.mrb[76].mxu1 }
 0x444   :  { %v1949_v8 = vadd.f32 %v7852_v13, %v9476_v40  ;;  %v1940_v5 = vpop.f32.mrb[77].mxu1 }
 0x445   :  { %v1941_v30 = vadd.f32 %v9476_v40, %v1940_v5  ;;  %v7853_v18 = vpop.f32.mrb[78].mxu1 }
 0x446   :  { %v1952_v17 = vadd.f32 %v7853_v18, %v9476_v40  ;;  %v1943_v60 = vpop.f32.mrb[79].mxu1  ;;  %v1985_v33 = vmax.f32 %v1949_v8, 0.0 }
 0x447   :  { %v1944_v26 = vadd.f32 %v9476_v40, %v1943_v60  ;;  %v1983_v15 = vmax.f32 %v1941_v30, 0.0 }
 0x448   :  { %v1986_v1 = vmax.f32 %v1952_v17, 0.0 }
 0x449   :  { %v1984_v9 = vmax.f32 %v1944_v26, 0.0 }
 0x44a   :  { %v2002_v14 = vpack.c.bf16 %v1986_v1, %v1985_v33 }
 0x44b   :  { %v2001_v49 = vpack.c.bf16 %v1984_v9, %v1983_v15 }
 0x44d   :  { %7898 = vmatprep.mubr.bf16.mxu0 %v2001_v49 }
 0x44e   :  { %7899 = vmatmul.mubr.bf16.gmra.mrb[76].mxu0 %v2002_v14 }
 0x470   :  { %v7872_v47 = vpop.f32.mrb[48].mxu0 }
 0x471   :  { %v2116_v21 = vadd.f32 %v7872_v47, %v9537_v20  ;;  %v2107_v34 = vpop.f32.mrb[49].mxu0 }
 0x472   :  { %v2108_v24 = vadd.f32 %v9537_v20, %v2107_v34  ;;  %v7873_v40 = vpop.f32.mrb[50].mxu0 }
 0x473   :  { %v2119_v41 = vadd.f32 %v7873_v40, %v9537_v20  ;;  %v2110_v63 = vpop.f32.mrb[51].mxu0  ;;  %v9547_v46 = vadd.f32 %v2116_v21, %v9321_v10 }
 0x474   :  { %v9543_v54 = vadd.f32 %v2108_v24, %v9317_v12  ;;  %v2111_v62 = vadd.f32 %v9537_v20, %v2110_v63 }
 0x475   :  { %v9550_v59 = vadd.f32 %v2119_v41, %v9324_v19  ;;  %v2268_v12 = vmax.f32 %v9547_v46, 0.0 }
 0x476   :  { %v9553_v44 = vadd.f32 %v2111_v62, %v9327_v45  ;;  %v2266_v36 = vmax.f32 %v9543_v54, 0.0 }
 0x477   :  { %v2269_v39 = vmax.f32 %v9550_v59, 0.0 }
 0x478   :  { %v2267_v31 = vmax.f32 %v9553_v44, 0.0  ;;  %v7876_v4 = vpop.f32.mrb[52].mxu0 }
 0x479   :  { %v2132_v23 = vadd.f32 %v7876_v4, %v9537_v20  ;;  %v2123_v13 = vpop.f32.mrb[53].mxu0  ;;  %v2299_v8 = vpack.c.bf16 %v2269_v39, %v2268_v12 }
 0x47a   :  { %v2298_v10 = vpack.c.bf16 %v2267_v31, %v2266_v36  ;;  %v2124_v19 = vadd.f32 %v9537_v20, %v2123_v13  ;;  %v7877_v5 = vpop.f32.mrb[54].mxu0 }
 0x47b   :  { %v2135_v45 = vadd.f32 %v7877_v5, %v9537_v20  ;;  %v2126_v30 = vpop.f32.mrb[55].mxu0  ;;  %v9567_v60 = vadd.f32 %v2132_v23, %v9341_v58 }
 0x47c   :  { %7918 = vmatprep.mubr.bf16.mxu1 %v2298_v10  ;;  %v9563_v18 = vadd.f32 %v2124_v19, %v9337_v37  ;;  %v2127_v17 = vadd.f32 %v9537_v20, %v2126_v30 }
 0x47d   :  { %7919 = vmatmul.mubr.bf16.vlgmr.msra.gmra.mrb[80].mxu1 %v2299_v8  ;;  %v9570_v26 = vadd.f32 %v2135_v45, %v9344_v22  ;;  %v2272_v14 = vmax.f32 %v9567_v60, 0.0 }
 0x47e   :  { %v9573_v33 = vadd.f32 %v2127_v17, %v9347_v25  ;;  %v2270_v15 = vmax.f32 %v9563_v18, 0.0 }
 0x47f   :  { %v2273_v1 = vmax.f32 %v9570_v26, 0.0 }
 0x480   :  { %v2271_v9 = vmax.f32 %v9573_v33, 0.0  ;;  %v7880_v37 = vpop.f32.mrb[56].mxu0 }
 0x481   :  { %v2148_v49 = vadd.f32 %v7880_v37, %v9537_v20  ;;  %v2139_v47 = vpop.f32.mrb[57].mxu0  ;;  %v2301_v24 = vpack.c.bf16 %v2273_v1, %v2272_v14 }
 0x482   :  { %v2140_v58 = vadd.f32 %v9537_v20, %v2139_v47  ;;  %v7881_v21 = vpop.f32.mrb[58].mxu0  ;;  %v2300_v22 = vpack.c.bf16 %v2271_v9, %v2270_v15  ;;  %v8307_v47 = vld [vmem:[#allocation3 + $0x88] sm:$0xff]  }
 0x483   :  { %v2151_v34 = vadd.f32 %v7881_v21, %v9537_v20  ;;  %v2142_v25 = vpop.f32.mrb[59].mxu0  ;;  %v9587_v63 = vadd.f32 %v2148_v49, %v9361_v6  ;;  %v8310_v21 = vld [vmem:[#allocation3 + $0xa0] sm:$0xff]  }
 0x484   :  { %v9583_v40 = vadd.f32 %v2140_v58, %v9357_v32  ;;  %v2143_v41 = vadd.f32 %v9537_v20, %v2142_v25  ;;  %7922 = vmatprep.mubr.bf16.mxu1 %v2300_v22 }
 0x485   :  { %v9590_v62 = vadd.f32 %v2151_v34, %v9364_v57  ;;  %7923 = vmatmul.mubr.bf16.gmra.mrb[84].mxu1 %v2301_v24  ;;  %v2276_v12 = vmax.f32 %v9587_v63, 0.0 }
 0x486   :  { %v9593_v39 = vadd.f32 %v2143_v41, %v9367_v53  ;;  %v2274_v31 = vmax.f32 %v9583_v40, 0.0 }
 0x487   :  { %v2277_v36 = vmax.f32 %v9590_v62, 0.0 }
 0x488   :  { %v2275_v32 = vmax.f32 %v9593_v39, 0.0 }
 0x489   :  { %v2303_v23 = vpack.c.bf16 %v2277_v36, %v2276_v12  ;;  %v8311_v12 = vld [vmem:[#allocation3 + $0xa8] sm:$0xff]  }
 0x48a   :  { %v2302_v4 = vpack.c.bf16 %v2275_v32, %v2274_v31 }
 0x48c   :  { %7926 = vmatprep.mubr.bf16.mxu1 %v2302_v4 }
 0x48d   :  { %7927 = vmatmul.mubr.bf16.gmra.mrb[88].mxu1 %v2303_v23 }
 0x495   :  { %v7884_v6 = vpop.f32.mrb[60].mxu0 }
 0x496   :  { %v2164_v57 = vadd.f32 %v7884_v6, %v9537_v20  ;;  %v2155_v13 = vpop.f32.mrb[61].mxu0 }
 0x497   :  { %v2156_v10 = vadd.f32 %v9537_v20, %v2155_v13  ;;  %v7885_v53 = vpop.f32.mrb[62].mxu0 }
 0x498   :  { %v2167_v8 = vadd.f32 %v7885_v53, %v9537_v20  ;;  %v2158_v19 = vpop.f32.mrb[63].mxu0  ;;  %v9607_v30 = vadd.f32 %v2164_v57, %v9381_v2  ;;  %v8306_v2 = vld [vmem:[#allocation3 + $0x80] sm:$0xff]  }
 0x499   :  { %v9603_v5 = vadd.f32 %v2156_v10, %v9377_v55  ;;  %v2159_v45 = vadd.f32 %v9537_v20, %v2158_v19  ;;  %7950 = vmatprep.subr.bf16.mxu0 %v8306_v2 }
 0x49a   :  { %v9610_v17 = vadd.f32 %v2167_v8, %v9384_v0  ;;  %v2280_v55 = vmax.f32 %v9607_v30, 0.0  ;;  %7951 = vmatpush3.bf16.msra.mxu0 %v8306_v2  ;;  %v8308_v0 = vld [vmem:[#allocation3 + $0x90] sm:$0xff]  }
 0x49b   :  { %v9613_v1 = vadd.f32 %v2159_v45, %v9387_v38  ;;  %v2278_v9 = vmax.f32 %v9603_v5, 0.0  ;;  %7952 = vmatprep.subr.bf16.mxu0 %v8307_v47  ;;  %v8309_v38 = vld [vmem:[#allocation3 + $0x98] sm:$0xff]  }
 0x49c   :  { %v2281_v15 = vmax.f32 %v9610_v17, 0.0 }
 0x49d   :  { %v2279_v37 = vmax.f32 %v9613_v1, 0.0 }
 0x49e   :  { %v2305_v49 = vpack.c.bf16 %v2281_v15, %v2280_v55  ;;  %7953 = vmatpush3.bf16.msra.mxu0 %v8307_v47 }
 0x49f   :  { %v2304_v14 = vpack.c.bf16 %v2279_v37, %v2278_v9  ;;  %7954 = vmatprep.subr.bf16.mxu0 %v8308_v0 }
 0x4a1   :  { %7930 = vmatprep.mubr.bf16.mxu1 %v2304_v14 }
 0x4a2   :  { %7931 = vmatmul.mubr.bf16.gmra.mrb[92].mxu1 %v2305_v49  ;;  %7955 = vmatpush3.bf16.msra.mxu0 %v8308_v0 }
 0x4a3   :  { %7956 = vmatprep.subr.bf16.mxu0 %v8309_v38 }
 0x4a6   :  { %7957 = vmatpush3.bf16.msra.mxu0 %v8309_v38 }
 0x4a7   :  { %7958 = vmatprep.subr.bf16.mxu0 %v8310_v21 }
 0x4aa   :  { %7959 = vmatpush3.bf16.msra.mxu0 %v8310_v21 }
 0x4ab   :  { %7960 = vmatprep.subr.bf16.mxu0 %v8311_v12 }
 0x4ae   :  { %7961 = vmatpush3.bf16.msra.mxu0 %v8311_v12 }
 0x4ba   :  { %v7888_v58 = vpop.f32.mrb[64].mxu0 }
 0x4bb   :  { %v2180_v22 = vadd.f32 %v7888_v58, %v9537_v20  ;;  %v2171_v34 = vpop.f32.mrb[65].mxu0 }
 0x4bc   :  { %v2172_v25 = vadd.f32 %v9537_v20, %v2171_v34  ;;  %v7889_v24 = vpop.f32.mrb[66].mxu0 }
 0x4bd   :  { %v2183_v41 = vadd.f32 %v7889_v24, %v9537_v20  ;;  %v2174_v36 = vpop.f32.mrb[67].mxu0  ;;  %v9627_v4 = vadd.f32 %v2180_v22, %v9401_v16  ;;  %v8312_v16 = vld [vmem:[#allocation3 + $0xb0] sm:$0xff]  }
 0x4be   :  { %v9623_v31 = vadd.f32 %v2172_v25, %v9397_v7  ;;  %v2175_v32 = vadd.f32 %v9537_v20, %v2174_v36  ;;  %7962 = vmatprep.subr.bf16.mxu0 %v8312_v16 }
 0x4bf   :  { %v9630_v23 = vadd.f32 %v2183_v41, %v9404_v42  ;;  %v2284_v10 = vmax.f32 %v9627_v4, 0.0  ;;  %7963 = vmatpush3.bf16.msra.mxu0 %v8312_v16  ;;  %v8313_v42 = vld [vmem:[#allocation3 + $0xb8] sm:$0xff]  }
 0x4c0   :  { %v9633_v6 = vadd.f32 %v2175_v32, %v9407_v27  ;;  %v2282_v13 = vmax.f32 %v9623_v31, 0.0  ;;  %7964 = vmatprep.subr.bf16.mxu0 %v8313_v42 }
 0x4c1   :  { %v2285_v57 = vmax.f32 %v9630_v23, 0.0 }
 0x4c2   :  { %v2283_v7 = vmax.f32 %v9633_v6, 0.0 }
 0x4c3   :  { %v2307_v8 = vpack.c.bf16 %v2285_v57, %v2284_v10  ;;  %7965 = vmatpush3.bf16.msra.mxu0 %v8313_v42 }
 0x4c4   :  { %v2306_v53 = vpack.c.bf16 %v2283_v7, %v2282_v13 }
 0x4c6   :  { %7934 = vmatprep.mubr.bf16.mxu1 %v2306_v53 }
 0x4c7   :  { %7935 = vmatmul.mubr.bf16.gmra.mrb[96].mxu1 %v2307_v8 }
 0x4db   :  { %v7892_v27 = vpop.f32.mrb[68].mxu0 }
 0x4dc   :  { %v2196_v19 = vadd.f32 %v7892_v27, %v9537_v20  ;;  %v2187_v45 = vpop.f32.mrb[69].mxu0 }
 0x4dd   :  { %v2188_v15 = vadd.f32 %v9537_v20, %v2187_v45  ;;  %v7893_v9 = vpop.f32.mrb[70].mxu0 }
 0x4de   :  { %v2199_v37 = vadd.f32 %v7893_v9, %v9537_v20  ;;  %v2190_v55 = vpop.f32.mrb[71].mxu0  ;;  %v9647_v2 = vadd.f32 %v2196_v19, %v9421_v50 }
 0x4df   :  { %v9643_v14 = vadd.f32 %v2188_v15, %v9417_v28  ;;  %v2191_v49 = vadd.f32 %v9537_v20, %v2190_v55 }
 0x4e0   :  { %v9650_v47 = vadd.f32 %v2199_v37, %v9424_v3  ;;  %v2288_v28 = vmax.f32 %v9647_v2, 0.0 }
 0x4e1   :  { %v9653_v0 = vadd.f32 %v2191_v49, %v9427_v11  ;;  %v2286_v58 = vmax.f32 %v9643_v14, 0.0 }
 0x4e2   :  { %v2289_v38 = vmax.f32 %v9650_v47, 0.0 }
 0x4e3   :  { %v2287_v21 = vmax.f32 %v9653_v0, 0.0 }
 0x4e4   :  { %v2309_v34 = vpack.c.bf16 %v2289_v38, %v2288_v28 }
 0x4e5   :  { %v2308_v22 = vpack.c.bf16 %v2287_v21, %v2286_v58 }
 0x4e7   :  { %7938 = vmatprep.mubr.bf16.mxu1 %v2308_v22 }
 0x4e8   :  { %7939 = vmatmul.mubr.bf16.gmra.mrb[100].mxu1 %v2309_v34 }
 0x500   :  { %v7896_v50 = vpop.f32.mrb[72].mxu0 }
 0x501   :  { %v2212_v25 = vadd.f32 %v7896_v50, %v9537_v20  ;;  %v2203_v3 = vpop.f32.mrb[73].mxu0 }
 0x502   :  { %v2204_v24 = vadd.f32 %v9537_v20, %v2203_v3  ;;  %v7897_v11 = vpop.f32.mrb[74].mxu0 }
 0x503   :  { %v2215_v41 = vadd.f32 %v7897_v11, %v9537_v20  ;;  %v2206_v36 = vpop.f32.mrb[75].mxu0  ;;  %v9667_v57 = vadd.f32 %v2212_v25, %v9441_v51 }
 0x504   :  { %v9663_v32 = vadd.f32 %v2204_v24, %v9437_v43  ;;  %v2207_v12 = vadd.f32 %v9537_v20, %v2206_v36 }
 0x505   :  { %v9670_v13 = vadd.f32 %v2215_v41, %v9444_v48  ;;  %v2292_v43 = vmax.f32 %v9667_v57, 0.0 }
 0x506   :  { %v9673_v7 = vadd.f32 %v2207_v12, %v9447_v56  ;;  %v2290_v53 = vmax.f32 %v9663_v32, 0.0 }
 0x507   :  { %v2293_v10 = vmax.f32 %v9670_v13, 0.0 }
 0x508   :  { %v2291_v8 = vmax.f32 %v9673_v7, 0.0 }
 0x509   :  { %v2311_v42 = vpack.c.bf16 %v2293_v10, %v2292_v43 }
 0x50a   :  { %v2310_v16 = vpack.c.bf16 %v2291_v8, %v2290_v53 }
 0x50c   :  { %7942 = vmatprep.mubr.bf16.mxu1 %v2310_v16 }
 0x50d   :  { %7943 = vmatmul.mubr.bf16.gmra.mrb[104].mxu1 %v2311_v42 }
 0x521   :  { %v7900_v51 = vpop.f32.mrb[76].mxu0 }
 0x522   :  { %v2228_v27 = vadd.f32 %v7900_v51, %v9537_v20  ;;  %v2219_v48 = vpop.f32.mrb[77].mxu0 }
 0x523   :  { %v2220_v19 = vadd.f32 %v9537_v20, %v2219_v48  ;;  %v7901_v56 = vpop.f32.mrb[78].mxu0 }
 0x524   :  { %v2231_v45 = vadd.f32 %v7901_v56, %v9537_v20  ;;  %v2222_v15 = vpop.f32.mrb[79].mxu0  ;;  %v9687_v55 = vadd.f32 %v2228_v27, %v9461_v61  ;;  %v9702_v61 = vld [vmem:[%s11125_s6 + $0x2] ss:$0 sm:$0xff] }
 0x525   :  { %v9683_v9 = vadd.f32 %v2220_v19, %v9457_v29  ;;  %v2223_v37 = vadd.f32 %v9537_v20, %v2222_v15 }
 0x526   :  { %v9690_v49 = vadd.f32 %v2231_v45, %v9464_v52  ;;  %v2296_v29 = vmax.f32 %v9687_v55, 0.0 }
 0x527   :  { %v9693_v38 = vadd.f32 %v2223_v37, %v9467_v35  ;;  %v2294_v21 = vmax.f32 %v9683_v9, 0.0 }
 0x528   :  { %v2297_v58 = vmax.f32 %v9690_v49, 0.0 }
 0x529   :  { %v2295_v28 = vmax.f32 %v9693_v38, 0.0 }
 0x52a   :  { %v2313_v34 = vpack.c.bf16 %v2297_v58, %v2296_v29 }
 0x52b   :  { %v2312_v22 = vpack.c.bf16 %v2295_v28, %v2294_v21 }
 0x52d   :  { %7946 = vmatprep.mubr.bf16.mxu1 %v2312_v22 }
 0x52e   :  { %7947 = vmatmul.mubr.bf16.gmra.mrb[108].mxu1 %v2313_v34 }
 0x550   :  { %v7920_v52 = vpop.f32.mrb[80].mxu1 }
 0x551   :  { %v2427_v35 = vadd.f32 %v7920_v52, %v9702_v61  ;;  %v2418_v20 = vpop.f32.mrb[81].mxu1 }
 0x552   :  { %v2419_v50 = vadd.f32 %v9702_v61, %v2418_v20  ;;  %v7921_v25 = vpop.f32.mrb[82].mxu1 }
 0x553   :  { %v2430_v3 = vadd.f32 %v7921_v25, %v9702_v61  ;;  %v2421_v24 = vpop.f32.mrb[83].mxu1  ;;  %v2547_v41 = vmax.f32 %v2427_v35, 0.0 }
 0x554   :  { %v2422_v11 = vadd.f32 %v9702_v61, %v2421_v24  ;;  %v2545_v12 = vmax.f32 %v2419_v50, 0.0 }
 0x555   :  { %v2548_v36 = vmax.f32 %v2430_v3, 0.0 }
 0x556   :  { %v2546_v10 = vmax.f32 %v2422_v11, 0.0 }
 0x557   :  { %v2578_v53 = vpack.c.bf16 %v2548_v36, %v2547_v41 }
 0x558   :  { %v2577_v8 = vpack.c.bf16 %v2546_v10, %v2545_v12  ;;  %v7924_v43 = vpop.f32.mrb[84].mxu1 }
 0x559   :  { %v2443_v16 = vadd.f32 %v7924_v43, %v9702_v61  ;;  %v2434_v42 = vpop.f32.mrb[85].mxu1 }
 0x55a   :  { %7966 = vmatprep.mubr.bf16.mxu0 %v2577_v8  ;;  %v2435_v51 = vadd.f32 %v9702_v61, %v2434_v42  ;;  %v7925_v27 = vpop.f32.mrb[86].mxu1 }
 0x55b   :  { %7967 = vmatmul.mubr.bf16.vlgmr.msra.gmra.mrb[80].mxu0 %v2578_v53  ;;  %v2446_v48 = vadd.f32 %v7925_v27, %v9702_v61  ;;  %v2437_v19 = vpop.f32.mrb[87].mxu1  ;;  %v2551_v45 = vmax.f32 %v2443_v16, 0.0 }
 0x55c   :  { %v2438_v56 = vadd.f32 %v9702_v61, %v2437_v19  ;;  %v2549_v37 = vmax.f32 %v2435_v51, 0.0 }
 0x55d   :  { %v2552_v15 = vmax.f32 %v2446_v48, 0.0 }
 0x55e   :  { %v2550_v58 = vmax.f32 %v2438_v56, 0.0 }
 0x55f   :  { %v2580_v21 = vpack.c.bf16 %v2552_v15, %v2551_v45 }
 0x560   :  { %v2579_v28 = vpack.c.bf16 %v2550_v58, %v2549_v37  ;;  %v7928_v29 = vpop.f32.mrb[88].mxu1  ;;  %v8314_v58 = vld [vmem:[%s11124_s5 + $0xc0] sm:$0xff]  }
 0x561   :  { %v2459_v22 = vadd.f32 %v7928_v29, %v9702_v61  ;;  %v2450_v34 = vpop.f32.mrb[89].mxu1  ;;  %7998 = vmatprep.subr.bf16.mxu1 %v8314_v58  ;;  %v8317_v29 = vld [vmem:[%s11124_s5 + $0xd8] sm:$0xff]  }
 0x562   :  { %v2451_v52 = vadd.f32 %v9702_v61, %v2450_v34  ;;  %v7929_v35 = vpop.f32.mrb[90].mxu1  ;;  %7970 = vmatprep.mubr.bf16.mxu0 %v2579_v28  ;;  %7999 = vmatpush3.bf16.msra.mxu1 %v8314_v58  ;;  %v8316_v28 = vld [vmem:[%s11124_s5 + $0xd0] sm:$0xff]  }
 0x563   :  { %v2462_v20 = vadd.f32 %v7929_v35, %v9702_v61  ;;  %v2453_v50 = vpop.f32.mrb[91].mxu1  ;;  %7971 = vmatmul.mubr.bf16.gmra.mrb[84].mxu0 %v2580_v21  ;;  %v2555_v3 = vmax.f32 %v2459_v22, 0.0  ;;  %v8315_v21 = vld [vmem:[%s11124_s5 + $0xc8] sm:$0xff]   ;;  %v8318_v22 = vld [vmem:[%s11124_s5 + $0xe0] sm:$0xff]  }
 0x564   :  { %v2454_v25 = vadd.f32 %v9702_v61, %v2453_v50  ;;  %v2553_v11 = vmax.f32 %v2451_v52, 0.0  ;;  %8000 = vmatprep.subr.bf16.mxu1 %v8315_v21 }
 0x565   :  { %v2556_v24 = vmax.f32 %v2462_v20, 0.0 }
 0x566   :  { %v2554_v41 = vmax.f32 %v2454_v25, 0.0  ;;  %8001 = vmatpush3.bf16.msra.mxu1 %v8315_v21 }
 0x567   :  { %v2582_v36 = vpack.c.bf16 %v2556_v24, %v2555_v3  ;;  %8002 = vmatprep.subr.bf16.mxu1 %v8316_v28 }
 0x568   :  { %v2581_v12 = vpack.c.bf16 %v2554_v41, %v2553_v11 }
 0x56a   :  { %7974 = vmatprep.mubr.bf16.mxu0 %v2581_v12  ;;  %8003 = vmatpush3.bf16.msra.mxu1 %v8316_v28 }
 0x56b   :  { %7975 = vmatmul.mubr.bf16.gmra.mrb[88].mxu0 %v2582_v36  ;;  %8004 = vmatprep.subr.bf16.mxu1 %v8317_v29 }
 0x56e   :  { %8005 = vmatpush3.bf16.msra.mxu1 %v8317_v29 }
 0x56f   :  { %8006 = vmatprep.subr.bf16.mxu1 %v8318_v22 }
 0x572   :  { %8007 = vmatpush3.bf16.msra.mxu1 %v8318_v22 }
 0x575   :  { %v7932_v10 = vpop.f32.mrb[92].mxu1 }
 0x576   :  { %v2475_v53 = vadd.f32 %v7932_v10, %v9702_v61  ;;  %v2466_v8 = vpop.f32.mrb[93].mxu1 }
 0x577   :  { %v2467_v43 = vadd.f32 %v9702_v61, %v2466_v8  ;;  %v7933_v16 = vpop.f32.mrb[94].mxu1  ;;  %v8319_v8 = vld [vmem:[%s11124_s5 + $0xe8] sm:$0xff]  }
 0x578   :  { %v2478_v42 = vadd.f32 %v7933_v16, %v9702_v61  ;;  %v2469_v51 = vpop.f32.mrb[95].mxu1  ;;  %v2559_v48 = vmax.f32 %v2475_v53, 0.0  ;;  %8008 = vmatprep.subr.bf16.mxu1 %v8319_v8  ;;  %v8321_v16 = vld [vmem:[%s11124_s5 + $0xf8] sm:$0xff]  }
 0x579   :  { %v2470_v27 = vadd.f32 %v9702_v61, %v2469_v51  ;;  %v2557_v56 = vmax.f32 %v2467_v43, 0.0  ;;  %8009 = vmatpush3.bf16.msra.mxu1 %v8319_v8  ;;  %v8320_v43 = vld [vmem:[%s11124_s5 + $0xf0] sm:$0xff]  }
 0x57a   :  { %v2560_v19 = vmax.f32 %v2478_v42, 0.0  ;;  %8010 = vmatprep.subr.bf16.mxu1 %v8320_v43 }
 0x57b   :  { %v2558_v45 = vmax.f32 %v2470_v27, 0.0 }
 0x57c   :  { %v2584_v15 = vpack.c.bf16 %v2560_v19, %v2559_v48 }
 0x57d   :  { %v2583_v37 = vpack.c.bf16 %v2558_v45, %v2557_v56  ;;  %8011 = vmatpush3.bf16.msra.mxu1 %v8320_v43 }
 0x57e   :  { %8012 = vmatprep.subr.bf16.mxu1 %v8321_v16 }
 0x57f   :  { %7978 = vmatprep.mubr.bf16.mxu0 %v2583_v37 }
 0x580   :  { %7979 = vmatmul.mubr.bf16.gmra.mrb[92].mxu0 %v2584_v15 }
 0x581   :  { %8013 = vmatpush3.bf16.msra.mxu1 %v8321_v16 }
 0x59a   :  { %v7936_v34 = vpop.f32.mrb[96].mxu1 }
 0x59b   :  { %v2491_v52 = vadd.f32 %v7936_v34, %v9702_v61  ;;  %v2482_v35 = vpop.f32.mrb[97].mxu1 }
 0x59c   :  { %v2483_v20 = vadd.f32 %v9702_v61, %v2482_v35  ;;  %v7937_v50 = vpop.f32.mrb[98].mxu1 }
 0x59d   :  { %v2494_v25 = vadd.f32 %v7937_v50, %v9702_v61  ;;  %v2485_v3 = vpop.f32.mrb[99].mxu1  ;;  %v2563_v11 = vmax.f32 %v2491_v52, 0.0 }
 0x59e   :  { %v2486_v24 = vadd.f32 %v9702_v61, %v2485_v3  ;;  %v2561_v36 = vmax.f32 %v2483_v20, 0.0 }
 0x59f   :  { %v2564_v41 = vmax.f32 %v2494_v25, 0.0 }
 0x5a0   :  { %v2562_v12 = vmax.f32 %v2486_v24, 0.0 }
 0x5a1   :  { %v2586_v10 = vpack.c.bf16 %v2564_v41, %v2563_v11 }
 0x5a2   :  { %v2585_v53 = vpack.c.bf16 %v2562_v12, %v2561_v36 }
 0x5a4   :  { %7982 = vmatprep.mubr.bf16.mxu0 %v2585_v53 }
 0x5a5   :  { %7983 = vmatmul.mubr.bf16.gmra.mrb[96].mxu0 %v2586_v10 }
 0x5bb   :  { %v7940_v42 = vpop.f32.mrb[100].mxu1 }
 0x5bc   :  { %v2507_v51 = vadd.f32 %v7940_v42, %v9702_v61  ;;  %v2498_v27 = vpop.f32.mrb[101].mxu1 }
 0x5bd   :  { %v2499_v48 = vadd.f32 %v9702_v61, %v2498_v27  ;;  %v7941_v19 = vpop.f32.mrb[102].mxu1 }
 0x5be   :  { %v2510_v56 = vadd.f32 %v7941_v19, %v9702_v61  ;;  %v2501_v45 = vpop.f32.mrb[103].mxu1  ;;  %v2567_v37 = vmax.f32 %v2507_v51, 0.0 }
 0x5bf   :  { %v2502_v15 = vadd.f32 %v9702_v61, %v2501_v45  ;;  %v2565_v21 = vmax.f32 %v2499_v48, 0.0 }
 0x5c0   :  { %v2568_v58 = vmax.f32 %v2510_v56, 0.0 }
 0x5c1   :  { %v2566_v28 = vmax.f32 %v2502_v15, 0.0 }
 0x5c2   :  { %v2588_v29 = vpack.c.bf16 %v2568_v58, %v2567_v37 }
 0x5c3   :  { %v2587_v22 = vpack.c.bf16 %v2566_v28, %v2565_v21  ;;  %v9763_v28 = vld [vmem:[%s11127_s8 + $0x2] ss:$0 sm:$0xff] }
 0x5c5   :  { %7986 = vmatprep.mubr.bf16.mxu0 %v2587_v22 }
 0x5c6   :  { %7987 = vmatmul.mubr.bf16.gmra.mrb[100].mxu0 %v2588_v29 }
 0x5e0   :  { %v7944_v34 = vpop.f32.mrb[104].mxu1 }
 0x5e1   :  { %v2523_v52 = vadd.f32 %v7944_v34, %v9702_v61  ;;  %v2514_v35 = vpop.f32.mrb[105].mxu1 }
 0x5e2   :  { %v2515_v20 = vadd.f32 %v9702_v61, %v2514_v35  ;;  %v7945_v50 = vpop.f32.mrb[106].mxu1 }
 0x5e3   :  { %v2526_v25 = vadd.f32 %v7945_v50, %v9702_v61  ;;  %v2517_v3 = vpop.f32.mrb[107].mxu1  ;;  %v2571_v11 = vmax.f32 %v2523_v52, 0.0 }
 0x5e4   :  { %v2518_v24 = vadd.f32 %v9702_v61, %v2517_v3  ;;  %v2569_v36 = vmax.f32 %v2515_v20, 0.0 }
 0x5e5   :  { %v2572_v41 = vmax.f32 %v2526_v25, 0.0 }
 0x5e6   :  { %v2570_v12 = vmax.f32 %v2518_v24, 0.0 }
 0x5e7   :  { %v2590_v10 = vpack.c.bf16 %v2572_v41, %v2571_v11 }
 0x5e8   :  { %v2589_v53 = vpack.c.bf16 %v2570_v12, %v2569_v36 }
 0x5ea   :  { %7990 = vmatprep.mubr.bf16.mxu0 %v2589_v53 }
 0x5eb   :  { %7991 = vmatmul.mubr.bf16.gmra.mrb[104].mxu0 %v2590_v10 }
 0x601   :  { %v7948_v8 = vpop.f32.mrb[108].mxu1 }
 0x602   :  { %v2539_v43 = vadd.f32 %v7948_v8, %v9702_v61  ;;  %v2530_v16 = vpop.f32.mrb[109].mxu1 }
 0x603   :  { %v2531_v42 = vadd.f32 %v9702_v61, %v2530_v16  ;;  %v7949_v51 = vpop.f32.mrb[110].mxu1 }
 0x604   :  { %v2542_v27 = vadd.f32 %v7949_v51, %v9702_v61  ;;  %v2533_v48 = vpop.f32.mrb[111].mxu1  ;;  %v2575_v56 = vmax.f32 %v2539_v43, 0.0 }
 0x605   :  { %v2534_v19 = vadd.f32 %v9702_v61, %v2533_v48  ;;  %v2573_v15 = vmax.f32 %v2531_v42, 0.0 }
 0x606   :  { %v2576_v45 = vmax.f32 %v2542_v27, 0.0 }
 0x607   :  { %v2574_v37 = vmax.f32 %v2534_v19, 0.0 }
 0x608   :  { %v2592_v58 = vpack.c.bf16 %v2576_v45, %v2575_v56 }
 0x609   :  { %v2591_v21 = vpack.c.bf16 %v2574_v37, %v2573_v15 }
 0x60b   :  { %7994 = vmatprep.mubr.bf16.mxu0 %v2591_v21 }
 0x60c   :  { %7995 = vmatmul.mubr.bf16.gmra.mrb[108].mxu0 %v2592_v58 }
 0x62e   :  { %v7968_v29 = vpop.f32.mrb[80].mxu0 }
 0x62f   :  { %v2706_v22 = vadd.f32 %v7968_v29, %v9763_v28  ;;  %v2697_v34 = vpop.f32.mrb[81].mxu0 }
 0x630   :  { %v2698_v52 = vadd.f32 %v9763_v28, %v2697_v34  ;;  %v7969_v61 = vpop.f32.mrb[82].mxu0 }
 0x631   :  { %v2709_v35 = vadd.f32 %v7969_v61, %v9763_v28  ;;  %v2700_v20 = vpop.f32.mrb[83].mxu0  ;;  %v9773_v3 = vadd.f32 %v2706_v22, %v9547_v46 }
 0x632   :  { %v9769_v50 = vadd.f32 %v2698_v52, %v9543_v54  ;;  %v2701_v25 = vadd.f32 %v9763_v28, %v2700_v20 }
 0x633   :  { %v9776_v24 = vadd.f32 %v2709_v35, %v9550_v59  ;;  %v2858_v54 = vmax.f32 %v9773_v3, 0.0 }
 0x634   :  { %v9779_v11 = vadd.f32 %v2701_v25, %v9553_v44  ;;  %v2856_v36 = vmax.f32 %v9769_v50, 0.0 }
 0x635   :  { %v2859_v41 = vmax.f32 %v9776_v24, 0.0 }
 0x636   :  { %v2857_v12 = vmax.f32 %v9779_v11, 0.0  ;;  %v7972_v10 = vpop.f32.mrb[84].mxu0 }
 0x637   :  { %v2722_v53 = vadd.f32 %v7972_v10, %v9763_v28  ;;  %v2713_v8 = vpop.f32.mrb[85].mxu0  ;;  %v2889_v43 = vpack.c.bf16 %v2859_v41, %v2858_v54 }
 0x638   :  { %v2888_v46 = vpack.c.bf16 %v2857_v12, %v2856_v36  ;;  %v2714_v59 = vadd.f32 %v9763_v28, %v2713_v8  ;;  %v7973_v16 = vpop.f32.mrb[86].mxu0 }
 0x639   :  { %v2725_v44 = vadd.f32 %v7973_v16, %v9763_v28  ;;  %v2716_v42 = vpop.f32.mrb[87].mxu0  ;;  %v9793_v48 = vadd.f32 %v2722_v53, %v9567_v60 }
 0x63a   :  { %8014 = vmatprep.mubr.bf16.mxu1 %v2888_v46  ;;  %v9789_v51 = vadd.f32 %v2714_v59, %v9563_v18  ;;  %v2717_v27 = vadd.f32 %v9763_v28, %v2716_v42 }
 0x63b   :  { %8015 = vmatmul.mubr.bf16.vlgmr.msra.gmra.mrb[112].mxu1 %v2889_v43  ;;  %v9796_v19 = vadd.f32 %v2725_v44, %v9570_v26  ;;  %v2862_v58 = vmax.f32 %v9793_v48, 0.0 }
 0x63c   :  { %v9799_v56 = vadd.f32 %v2717_v27, %v9573_v33  ;;  %v2860_v15 = vmax.f32 %v9789_v51, 0.0 }
 0x63d   :  { %v2863_v45 = vmax.f32 %v9796_v19, 0.0 }
 0x63e   :  { %v2861_v37 = vmax.f32 %v9799_v56, 0.0  ;;  %v7976_v18 = vpop.f32.mrb[88].mxu0 }
 0x63f   :  { %v2738_v21 = vadd.f32 %v7976_v18, %v9763_v28  ;;  %v2729_v29 = vpop.f32.mrb[89].mxu0  ;;  %v2891_v52 = vpack.c.bf16 %v2863_v45, %v2862_v58 }
 0x640   :  { %v2730_v60 = vadd.f32 %v9763_v28, %v2729_v29  ;;  %v7977_v22 = vpop.f32.mrb[90].mxu0  ;;  %v2890_v26 = vpack.c.bf16 %v2861_v37, %v2860_v15  ;;  %v8323_v29 = vld [vmem:[#allocation3 + $0xc8] sm:$0xff]  }
 0x641   :  { %v2741_v34 = vadd.f32 %v7977_v22, %v9763_v28  ;;  %v2732_v33 = vpop.f32.mrb[91].mxu0  ;;  %v9813_v20 = vadd.f32 %v2738_v21, %v9587_v63  ;;  %v8326_v22 = vld [vmem:[#allocation3 + $0xe0] sm:$0xff]  }
 0x642   :  { %v9809_v61 = vadd.f32 %v2730_v60, %v9583_v40  ;;  %v2733_v35 = vadd.f32 %v9763_v28, %v2732_v33  ;;  %8018 = vmatprep.mubr.bf16.mxu1 %v2890_v26 }
 0x643   :  { %v9816_v25 = vadd.f32 %v2741_v34, %v9590_v62  ;;  %8019 = vmatmul.mubr.bf16.gmra.mrb[116].mxu1 %v2891_v52  ;;  %v2866_v54 = vmax.f32 %v9813_v20, 0.0 }
 0x644   :  { %v9819_v41 = vadd.f32 %v2733_v35, %v9593_v39  ;;  %v2864_v12 = vmax.f32 %v9809_v61, 0.0 }
 0x645   :  { %v2867_v36 = vmax.f32 %v9816_v25, 0.0 }
 0x646   :  { %v2865_v40 = vmax.f32 %v9819_v41, 0.0 }
 0x647   :  { %v2893_v53 = vpack.c.bf16 %v2867_v36, %v2866_v54  ;;  %v8327_v54 = vld [vmem:[#allocation3 + $0xe8] sm:$0xff]  }
 0x648   :  { %v2892_v10 = vpack.c.bf16 %v2865_v40, %v2864_v12 }
 0x64a   :  { %8022 = vmatprep.mubr.bf16.mxu1 %v2892_v10 }
 0x64b   :  { %8023 = vmatmul.mubr.bf16.gmra.mrb[120].mxu1 %v2893_v53 }
 0x653   :  { %v7980_v63 = vpop.f32.mrb[92].mxu0 }
 0x654   :  { %v2754_v62 = vadd.f32 %v7980_v63, %v9763_v28  ;;  %v2745_v8 = vpop.f32.mrb[93].mxu0 }
 0x655   :  { %v2746_v46 = vadd.f32 %v9763_v28, %v2745_v8  ;;  %v7981_v39 = vpop.f32.mrb[94].mxu0 }
 0x656   :  { %v2757_v43 = vadd.f32 %v7981_v39, %v9763_v28  ;;  %v2748_v59 = vpop.f32.mrb[95].mxu0  ;;  %v9833_v42 = vadd.f32 %v2754_v62, %v9607_v30  ;;  %v8322_v30 = vld [vmem:[#allocation3 + $0xc0] sm:$0xff]  }
 0x657   :  { %v9829_v16 = vadd.f32 %v2746_v46, %v9603_v5  ;;  %v2749_v44 = vadd.f32 %v9763_v28, %v2748_v59  ;;  %8046 = vmatprep.subr.bf16.mxu0 %v8322_v30 }
 0x658   :  { %v9836_v27 = vadd.f32 %v2757_v43, %v9610_v17  ;;  %v2870_v5 = vmax.f32 %v9833_v42, 0.0  ;;  %8047 = vmatpush3.bf16.msra.mxu0 %v8322_v30  ;;  %v8324_v17 = vld [vmem:[#allocation3 + $0xd0] sm:$0xff]  }
 0x659   :  { %v9839_v45 = vadd.f32 %v2749_v44, %v9613_v1  ;;  %v2868_v37 = vmax.f32 %v9829_v16, 0.0  ;;  %8048 = vmatprep.subr.bf16.mxu0 %v8323_v29  ;;  %v8325_v1 = vld [vmem:[#allocation3 + $0xd8] sm:$0xff]  }
 0x65a   :  { %v2871_v15 = vmax.f32 %v9836_v27, 0.0 }
 0x65b   :  { %v2869_v18 = vmax.f32 %v9839_v45, 0.0 }
 0x65c   :  { %v2895_v21 = vpack.c.bf16 %v2871_v15, %v2870_v5  ;;  %8049 = vmatpush3.bf16.msra.mxu0 %v8323_v29 }
 0x65d   :  { %v2894_v58 = vpack.c.bf16 %v2869_v18, %v2868_v37  ;;  %8050 = vmatprep.subr.bf16.mxu0 %v8324_v17 }
 0x65f   :  { %8026 = vmatprep.mubr.bf16.mxu1 %v2894_v58 }
 0x660   :  { %8027 = vmatmul.mubr.bf16.gmra.mrb[124].mxu1 %v2895_v21  ;;  %8051 = vmatpush3.bf16.msra.mxu0 %v8324_v17 }
 0x661   :  { %8052 = vmatprep.subr.bf16.mxu0 %v8325_v1 }
 0x664   :  { %8053 = vmatpush3.bf16.msra.mxu0 %v8325_v1 }
 0x665   :  { %8054 = vmatprep.subr.bf16.mxu0 %v8326_v22 }
 0x668   :  { %8055 = vmatpush3.bf16.msra.mxu0 %v8326_v22 }
 0x669   :  { %8056 = vmatprep.subr.bf16.mxu0 %v8327_v54 }
 0x66c   :  { %8057 = vmatpush3.bf16.msra.mxu0 %v8327_v54 }
 0x678   :  { %v7984_v60 = vpop.f32.mrb[96].mxu0 }
 0x679   :  { %v2770_v26 = vadd.f32 %v7984_v60, %v9763_v28  ;;  %v2761_v34 = vpop.f32.mrb[97].mxu0 }
 0x67a   :  { %v2762_v33 = vadd.f32 %v9763_v28, %v2761_v34  ;;  %v7985_v52 = vpop.f32.mrb[98].mxu0 }
 0x67b   :  { %v2773_v35 = vadd.f32 %v7985_v52, %v9763_v28  ;;  %v2764_v36 = vpop.f32.mrb[99].mxu0  ;;  %v9853_v10 = vadd.f32 %v2770_v26, %v9627_v4  ;;  %v8328_v4 = vld [vmem:[#allocation3 + $0xf0] sm:$0xff]  }
 0x67c   :  { %v9849_v12 = vadd.f32 %v2762_v33, %v9623_v31  ;;  %v2765_v40 = vadd.f32 %v9763_v28, %v2764_v36  ;;  %8058 = vmatprep.subr.bf16.mxu0 %v8328_v4 }
 0x67d   :  { %v9856_v53 = vadd.f32 %v2773_v35, %v9630_v23  ;;  %v2874_v46 = vmax.f32 %v9853_v10, 0.0  ;;  %8059 = vmatpush3.bf16.msra.mxu0 %v8328_v4  ;;  %v8329_v23 = vld [vmem:[#allocation3 + $0xf8] sm:$0xff]  }
 0x67e   :  { %v9859_v63 = vadd.f32 %v2765_v40, %v9633_v6  ;;  %v2872_v8 = vmax.f32 %v9849_v12, 0.0  ;;  %8060 = vmatprep.subr.bf16.mxu0 %v8329_v23 }
 0x67f   :  { %v2875_v62 = vmax.f32 %v9856_v53, 0.0 }
 0x680   :  { %v2873_v31 = vmax.f32 %v9859_v63, 0.0 }
 0x681   :  { %v2897_v43 = vpack.c.bf16 %v2875_v62, %v2874_v46  ;;  %8061 = vmatpush3.bf16.msra.mxu0 %v8329_v23 }
 0x682   :  { %v2896_v39 = vpack.c.bf16 %v2873_v31, %v2872_v8 }
 0x684   :  { %8030 = vmatprep.mubr.bf16.mxu1 %v2896_v39 }
 0x685   :  { %8031 = vmatmul.mubr.bf16.gmra.mrb[128].mxu1 %v2897_v43 }
 0x699   :  { %v7988_v6 = vpop.f32.mrb[100].mxu0 }
 0x69a   :  { %v2786_v59 = vadd.f32 %v7988_v6, %v9763_v28  ;;  %v2777_v44 = vpop.f32.mrb[101].mxu0 }
 0x69b   :  { %v2778_v15 = vadd.f32 %v9763_v28, %v2777_v44  ;;  %v7989_v37 = vpop.f32.mrb[102].mxu0 }
 0x69c   :  { %v2789_v18 = vadd.f32 %v7989_v37, %v9763_v28  ;;  %v2780_v5 = vpop.f32.mrb[103].mxu0  ;;  %v9873_v30 = vadd.f32 %v2786_v59, %v9647_v2 }
 0x69d   :  { %v9869_v58 = vadd.f32 %v2778_v15, %v9643_v14  ;;  %v2781_v21 = vadd.f32 %v9763_v28, %v2780_v5 }
 0x69e   :  { %v9876_v29 = vadd.f32 %v2789_v18, %v9650_v47  ;;  %v2878_v14 = vmax.f32 %v9873_v30, 0.0 }
 0x69f   :  { %v9879_v17 = vadd.f32 %v2781_v21, %v9653_v0  ;;  %v2876_v60 = vmax.f32 %v9869_v58, 0.0 }
 0x6a0   :  { %v2879_v1 = vmax.f32 %v9876_v29, 0.0 }
 0x6a1   :  { %v2877_v22 = vmax.f32 %v9879_v17, 0.0 }
 0x6a2   :  { %v2899_v34 = vpack.c.bf16 %v2879_v1, %v2878_v14 }
 0x6a3   :  { %v2898_v26 = vpack.c.bf16 %v2877_v22, %v2876_v60 }
 0x6a5   :  { %8034 = vmatprep.mubr.bf16.mxu1 %v2898_v26 }
 0x6a6   :  { %8035 = vmatmul.mubr.bf16.gmra.mrb[132].mxu1 %v2899_v34 }
 0x6be   :  { %v7992_v2 = vpop.f32.mrb[104].mxu0 }
 0x6bf   :  { %v2802_v33 = vadd.f32 %v7992_v2, %v9763_v28  ;;  %v2793_v47 = vpop.f32.mrb[105].mxu0 }
 0x6c0   :  { %v2794_v52 = vadd.f32 %v9763_v28, %v2793_v47  ;;  %v7993_v0 = vpop.f32.mrb[106].mxu0 }
 0x6c1   :  { %v2805_v35 = vadd.f32 %v7993_v0, %v9763_v28  ;;  %v2796_v36 = vpop.f32.mrb[107].mxu0  ;;  %v9893_v62 = vadd.f32 %v2802_v33, %v9667_v57 }
 0x6c2   :  { %v9889_v40 = vadd.f32 %v2794_v52, %v9663_v32  ;;  %v2797_v54 = vadd.f32 %v9763_v28, %v2796_v36 }
 0x6c3   :  { %v9896_v8 = vadd.f32 %v2805_v35, %v9670_v13  ;;  %v2882_v32 = vmax.f32 %v9893_v62, 0.0 }
 0x6c4   :  { %v9899_v31 = vadd.f32 %v2797_v54, %v9673_v7  ;;  %v2880_v39 = vmax.f32 %v9889_v40, 0.0 }
 0x6c5   :  { %v2883_v46 = vmax.f32 %v9896_v8, 0.0 }
 0x6c6   :  { %v2881_v43 = vmax.f32 %v9899_v31, 0.0 }
 0x6c7   :  { %v2901_v23 = vpack.c.bf16 %v2883_v46, %v2882_v32 }
 0x6c8   :  { %v2900_v4 = vpack.c.bf16 %v2881_v43, %v2880_v39 }
 0x6ca   :  { %8038 = vmatprep.mubr.bf16.mxu1 %v2900_v4 }
 0x6cb   :  { %8039 = vmatmul.mubr.bf16.gmra.mrb[136].mxu1 %v2901_v23 }
 0x6df   :  { %v7996_v57 = vpop.f32.mrb[108].mxu0 }
 0x6e0   :  { %v2818_v6 = vadd.f32 %v7996_v57, %v9763_v28  ;;  %v2809_v13 = vpop.f32.mrb[109].mxu0 }
 0x6e1   :  { %v2810_v59 = vadd.f32 %v9763_v28, %v2809_v13  ;;  %v7997_v7 = vpop.f32.mrb[110].mxu0 }
 0x6e2   :  { %v2821_v44 = vadd.f32 %v7997_v7, %v9763_v28  ;;  %v2812_v15 = vpop.f32.mrb[111].mxu0  ;;  %v9913_v5 = vadd.f32 %v2818_v6, %v9687_v55  ;;  %v9928_v55 = vld [vmem:[%s11125_s6 + $0x3] ss:$0 sm:$0xff] }
 0x6e3   :  { %v9909_v37 = vadd.f32 %v2810_v59, %v9683_v9  ;;  %v2813_v18 = vadd.f32 %v9763_v28, %v2812_v15 }
 0x6e4   :  { %v9916_v21 = vadd.f32 %v2821_v44, %v9690_v49  ;;  %v2886_v9 = vmax.f32 %v9913_v5, 0.0 }
 0x6e5   :  { %v9919_v1 = vadd.f32 %v2813_v18, %v9693_v38  ;;  %v2884_v22 = vmax.f32 %v9909_v37, 0.0 }
 0x6e6   :  { %v2887_v60 = vmax.f32 %v9916_v21, 0.0 }
 0x6e7   :  { %v2885_v14 = vmax.f32 %v9919_v1, 0.0 }
 0x6e8   :  { %v2903_v34 = vpack.c.bf16 %v2887_v60, %v2886_v9 }
 0x6e9   :  { %v2902_v26 = vpack.c.bf16 %v2885_v14, %v2884_v22 }
 0x6eb   :  { %8042 = vmatprep.mubr.bf16.mxu1 %v2902_v26 }
 0x6ec   :  { %8043 = vmatmul.mubr.bf16.gmra.mrb[140].mxu1 %v2903_v34 }
 0x70e   :  { %v8016_v49 = vpop.f32.mrb[112].mxu1 }
 0x70f   :  { %v3017_v38 = vadd.f32 %v8016_v49, %v9928_v55  ;;  %v3008_v28 = vpop.f32.mrb[113].mxu1 }
 0x710   :  { %v3009_v2 = vadd.f32 %v9928_v55, %v3008_v28  ;;  %v8017_v33 = vpop.f32.mrb[114].mxu1 }
 0x711   :  { %v3020_v47 = vadd.f32 %v8017_v33, %v9928_v55  ;;  %v3011_v52 = vpop.f32.mrb[115].mxu1  ;;  %v3137_v35 = vmax.f32 %v3017_v38, 0.0 }
 0x712   :  { %v3012_v0 = vadd.f32 %v9928_v55, %v3011_v52  ;;  %v3135_v54 = vmax.f32 %v3009_v2, 0.0 }
 0x713   :  { %v3138_v36 = vmax.f32 %v3020_v47, 0.0 }
 0x714   :  { %v3136_v46 = vmax.f32 %v3012_v0, 0.0 }
 0x715   :  { %v3168_v39 = vpack.c.bf16 %v3138_v36, %v3137_v35 }
 0x716   :  { %v3167_v43 = vpack.c.bf16 %v3136_v46, %v3135_v54  ;;  %v8020_v32 = vpop.f32.mrb[116].mxu1 }
 0x717   :  { %v3033_v4 = vadd.f32 %v8020_v32, %v9928_v55  ;;  %v3024_v23 = vpop.f32.mrb[117].mxu1 }
 0x718   :  { %8062 = vmatprep.mubr.bf16.mxu0 %v3167_v43  ;;  %v3025_v57 = vadd.f32 %v9928_v55, %v3024_v23  ;;  %v8021_v6 = vpop.f32.mrb[118].mxu1 }
 0x719   :  { %8063 = vmatmul.mubr.bf16.vlgmr.msra.gmra.mrb[112].mxu0 %v3168_v39  ;;  %v3036_v13 = vadd.f32 %v8021_v6, %v9928_v55  ;;  %v3027_v59 = vpop.f32.mrb[119].mxu1  ;;  %v3141_v44 = vmax.f32 %v3033_v4, 0.0 }
 0x71a   :  { %v3028_v7 = vadd.f32 %v9928_v55, %v3027_v59  ;;  %v3139_v18 = vmax.f32 %v3025_v57, 0.0 }
 0x71b   :  { %v3142_v15 = vmax.f32 %v3036_v13, 0.0 }
 0x71c   :  { %v3140_v60 = vmax.f32 %v3028_v7, 0.0 }
 0x71d   :  { %v3170_v22 = vpack.c.bf16 %v3142_v15, %v3141_v44 }
 0x71e   :  { %v3169_v14 = vpack.c.bf16 %v3140_v60, %v3139_v18  ;;  %v8024_v9 = vpop.f32.mrb[120].mxu1  ;;  %v8330_v60 = vld [vmem:[%s11124_s5 + $0x100] sm:$0xff]  }
 0x71f   :  { %v3049_v26 = vadd.f32 %v8024_v9, %v9928_v55  ;;  %v3040_v34 = vpop.f32.mrb[121].mxu1  ;;  %8094 = vmatprep.subr.bf16.mxu1 %v8330_v60  ;;  %v8333_v9 = vld [vmem:[%s11124_s5 + $0x118] sm:$0xff]  }
 0x720   :  { %v3041_v49 = vadd.f32 %v9928_v55, %v3040_v34  ;;  %v8025_v38 = vpop.f32.mrb[122].mxu1  ;;  %8066 = vmatprep.mubr.bf16.mxu0 %v3169_v14  ;;  %8095 = vmatpush3.bf16.msra.mxu1 %v8330_v60  ;;  %v8332_v14 = vld [vmem:[%s11124_s5 + $0x110] sm:$0xff]  }
 0x721   :  { %v3052_v28 = vadd.f32 %v8025_v38, %v9928_v55  ;;  %v3043_v2 = vpop.f32.mrb[123].mxu1  ;;  %8067 = vmatmul.mubr.bf16.gmra.mrb[116].mxu0 %v3170_v22  ;;  %v3145_v47 = vmax.f32 %v3049_v26, 0.0  ;;  %v8331_v22 = vld [vmem:[%s11124_s5 + $0x108] sm:$0xff]   ;;  %v8334_v26 = vld [vmem:[%s11124_s5 + $0x120] sm:$0xff]  }
 0x722   :  { %v3044_v33 = vadd.f32 %v9928_v55, %v3043_v2  ;;  %v3143_v0 = vmax.f32 %v3041_v49, 0.0  ;;  %8096 = vmatprep.subr.bf16.mxu1 %v8331_v22 }
 0x723   :  { %v3146_v52 = vmax.f32 %v3052_v28, 0.0 }
 0x724   :  { %v3144_v35 = vmax.f32 %v3044_v33, 0.0  ;;  %8097 = vmatpush3.bf16.msra.mxu1 %v8331_v22 }
 0x725   :  { %v3172_v36 = vpack.c.bf16 %v3146_v52, %v3145_v47  ;;  %8098 = vmatprep.subr.bf16.mxu1 %v8332_v14 }
 0x726   :  { %v3171_v54 = vpack.c.bf16 %v3144_v35, %v3143_v0 }
 0x728   :  { %8070 = vmatprep.mubr.bf16.mxu0 %v3171_v54  ;;  %8099 = vmatpush3.bf16.msra.mxu1 %v8332_v14 }
 0x729   :  { %8071 = vmatmul.mubr.bf16.gmra.mrb[120].mxu0 %v3172_v36  ;;  %8100 = vmatprep.subr.bf16.mxu1 %v8333_v9 }
 0x72c   :  { %8101 = vmatpush3.bf16.msra.mxu1 %v8333_v9 }
 0x72d   :  { %8102 = vmatprep.subr.bf16.mxu1 %v8334_v26 }
 0x730   :  { %8103 = vmatpush3.bf16.msra.mxu1 %v8334_v26 }
 0x733   :  { %v8028_v46 = vpop.f32.mrb[124].mxu1 }
 0x734   :  { %v3065_v39 = vadd.f32 %v8028_v46, %v9928_v55  ;;  %v3056_v43 = vpop.f32.mrb[125].mxu1 }
 0x735   :  { %v3057_v32 = vadd.f32 %v9928_v55, %v3056_v43  ;;  %v8029_v4 = vpop.f32.mrb[126].mxu1  ;;  %v8335_v43 = vld [vmem:[%s11124_s5 + $0x128] sm:$0xff]  }
 0x736   :  { %v3068_v23 = vadd.f32 %v8029_v4, %v9928_v55  ;;  %v3059_v57 = vpop.f32.mrb[127].mxu1  ;;  %v3149_v13 = vmax.f32 %v3065_v39, 0.0  ;;  %8104 = vmatprep.subr.bf16.mxu1 %v8335_v43  ;;  %v8337_v4 = vld [vmem:[%s11124_s5 + $0x138] sm:$0xff]  }
 0x737   :  { %v3060_v6 = vadd.f32 %v9928_v55, %v3059_v57  ;;  %v3147_v7 = vmax.f32 %v3057_v32, 0.0  ;;  %8105 = vmatpush3.bf16.msra.mxu1 %v8335_v43  ;;  %v8336_v32 = vld [vmem:[%s11124_s5 + $0x130] sm:$0xff]  }
 0x738   :  { %v3150_v59 = vmax.f32 %v3068_v23, 0.0  ;;  %8106 = vmatprep.subr.bf16.mxu1 %v8336_v32 }
 0x739   :  { %v3148_v44 = vmax.f32 %v3060_v6, 0.0 }
 0x73a   :  { %v3174_v15 = vpack.c.bf16 %v3150_v59, %v3149_v13 }
 0x73b   :  { %v3173_v18 = vpack.c.bf16 %v3148_v44, %v3147_v7  ;;  %8107 = vmatpush3.bf16.msra.mxu1 %v8336_v32 }
 0x73c   :  { %8108 = vmatprep.subr.bf16.mxu1 %v8337_v4 }
 0x73d   :  { %8074 = vmatprep.mubr.bf16.mxu0 %v3173_v18 }
 0x73e   :  { %8075 = vmatmul.mubr.bf16.gmra.mrb[124].mxu0 %v3174_v15 }
 0x73f   :  { %8109 = vmatpush3.bf16.msra.mxu1 %v8337_v4 }
 0x758   :  { %v8032_v34 = vpop.f32.mrb[128].mxu1 }
 0x759   :  { %v3081_v49 = vadd.f32 %v8032_v34, %v9928_v55  ;;  %v3072_v38 = vpop.f32.mrb[129].mxu1 }
 0x75a   :  { %v3073_v28 = vadd.f32 %v9928_v55, %v3072_v38  ;;  %v8033_v2 = vpop.f32.mrb[130].mxu1 }
 0x75b   :  { %v3084_v33 = vadd.f32 %v8033_v2, %v9928_v55  ;;  %v3075_v47 = vpop.f32.mrb[131].mxu1  ;;  %v3153_v0 = vmax.f32 %v3081_v49, 0.0 }
 0x75c   :  { %v3076_v52 = vadd.f32 %v9928_v55, %v3075_v47  ;;  %v3151_v36 = vmax.f32 %v3073_v28, 0.0 }
 0x75d   :  { %v3154_v35 = vmax.f32 %v3084_v33, 0.0 }
 0x75e   :  { %v3152_v54 = vmax.f32 %v3076_v52, 0.0 }
 0x75f   :  { %v3176_v46 = vpack.c.bf16 %v3154_v35, %v3153_v0 }
 0x760   :  { %v3175_v39 = vpack.c.bf16 %v3152_v54, %v3151_v36 }
 0x762   :  { %8078 = vmatprep.mubr.bf16.mxu0 %v3175_v39 }
 0x763   :  { %8079 = vmatmul.mubr.bf16.gmra.mrb[128].mxu0 %v3176_v46 }
 0x779   :  { %v8036_v23 = vpop.f32.mrb[132].mxu1 }
 0x77a   :  { %v3097_v57 = vadd.f32 %v8036_v23, %v9928_v55  ;;  %v3088_v6 = vpop.f32.mrb[133].mxu1 }
 0x77b   :  { %v3089_v13 = vadd.f32 %v9928_v55, %v3088_v6  ;;  %v8037_v59 = vpop.f32.mrb[134].mxu1 }
 0x77c   :  { %v3100_v7 = vadd.f32 %v8037_v59, %v9928_v55  ;;  %v3091_v44 = vpop.f32.mrb[135].mxu1  ;;  %v3157_v18 = vmax.f32 %v3097_v57, 0.0 }
 0x77d   :  { %v3092_v15 = vadd.f32 %v9928_v55, %v3091_v44  ;;  %v3155_v22 = vmax.f32 %v3089_v13, 0.0 }
 0x77e   :  { %v3158_v60 = vmax.f32 %v3100_v7, 0.0 }
 0x77f   :  { %v3156_v14 = vmax.f32 %v3092_v15, 0.0 }
 0x780   :  { %v3178_v9 = vpack.c.bf16 %v3158_v60, %v3157_v18 }
 0x781   :  { %v3177_v26 = vpack.c.bf16 %v3156_v14, %v3155_v22  ;;  %v9989_v14 = vld [vmem:[%s11127_s8 + $0x3] ss:$0 sm:$0xff] }
 0x783   :  { %8082 = vmatprep.mubr.bf16.mxu0 %v3177_v26 }
 0x784   :  { %8083 = vmatmul.mubr.bf16.gmra.mrb[132].mxu0 %v3178_v9 }
 0x79e   :  { %v8040_v34 = vpop.f32.mrb[136].mxu1 }
 0x79f   :  { %v3113_v49 = vadd.f32 %v8040_v34, %v9928_v55  ;;  %v3104_v38 = vpop.f32.mrb[137].mxu1 }
 0x7a0   :  { %v3105_v28 = vadd.f32 %v9928_v55, %v3104_v38  ;;  %v8041_v2 = vpop.f32.mrb[138].mxu1 }
 0x7a1   :  { %v3116_v33 = vadd.f32 %v8041_v2, %v9928_v55  ;;  %v3107_v47 = vpop.f32.mrb[139].mxu1  ;;  %v3161_v0 = vmax.f32 %v3113_v49, 0.0 }
 0x7a2   :  { %v3108_v52 = vadd.f32 %v9928_v55, %v3107_v47  ;;  %v3159_v36 = vmax.f32 %v3105_v28, 0.0 }
 0x7a3   :  { %v3162_v35 = vmax.f32 %v3116_v33, 0.0 }
 0x7a4   :  { %v3160_v54 = vmax.f32 %v3108_v52, 0.0 }
 0x7a5   :  { %v3180_v46 = vpack.c.bf16 %v3162_v35, %v3161_v0 }
 0x7a6   :  { %v3179_v39 = vpack.c.bf16 %v3160_v54, %v3159_v36 }
 0x7a8   :  { %8086 = vmatprep.mubr.bf16.mxu0 %v3179_v39 }
 0x7a9   :  { %8087 = vmatmul.mubr.bf16.gmra.mrb[136].mxu0 %v3180_v46 }
 0x7bf   :  { %v8044_v43 = vpop.f32.mrb[140].mxu1 }
 0x7c0   :  { %v3129_v32 = vadd.f32 %v8044_v43, %v9928_v55  ;;  %v3120_v4 = vpop.f32.mrb[141].mxu1 }
 0x7c1   :  { %v3121_v23 = vadd.f32 %v9928_v55, %v3120_v4  ;;  %v8045_v57 = vpop.f32.mrb[142].mxu1 }
 0x7c2   :  { %v3132_v6 = vadd.f32 %v8045_v57, %v9928_v55  ;;  %v3123_v13 = vpop.f32.mrb[143].mxu1  ;;  %v3165_v7 = vmax.f32 %v3129_v32, 0.0 }
 0x7c3   :  { %v3124_v59 = vadd.f32 %v9928_v55, %v3123_v13  ;;  %v3163_v15 = vmax.f32 %v3121_v23, 0.0 }
 0x7c4   :  { %v3166_v44 = vmax.f32 %v3132_v6, 0.0 }
 0x7c5   :  { %v3164_v18 = vmax.f32 %v3124_v59, 0.0 }
 0x7c6   :  { %v3182_v60 = vpack.c.bf16 %v3166_v44, %v3165_v7 }
 0x7c7   :  { %v3181_v22 = vpack.c.bf16 %v3164_v18, %v3163_v15 }
 0x7c9   :  { %8090 = vmatprep.mubr.bf16.mxu0 %v3181_v22 }
 0x7ca   :  { %8091 = vmatmul.mubr.bf16.gmra.mrb[140].mxu0 %v3182_v60 }
 0x7ec   :  { %v8064_v9 = vpop.f32.mrb[112].mxu0 }
 0x7ed   :  { %v3296_v26 = vadd.f32 %v8064_v9, %v9989_v14  ;;  %v3287_v34 = vpop.f32.mrb[113].mxu0 }
 0x7ee   :  { %v3288_v49 = vadd.f32 %v9989_v14, %v3287_v34  ;;  %v8065_v55 = vpop.f32.mrb[114].mxu0 }
 0x7ef   :  { %v3299_v38 = vadd.f32 %v8065_v55, %v9989_v14  ;;  %v3290_v28 = vpop.f32.mrb[115].mxu0  ;;  %v9999_v47 = vadd.f32 %v3296_v26, %v9773_v3 }
 0x7f0   :  { %v9995_v2 = vadd.f32 %v3288_v49, %v9769_v50  ;;  %v3291_v33 = vadd.f32 %v9989_v14, %v3290_v28 }
 0x7f1   :  { %v10002_v52 = vadd.f32 %v3299_v38, %v9776_v24  ;;  %v3448_v50 = vmax.f32 %v9999_v47, 0.0 }
 0x7f2   :  { %v10005_v0 = vadd.f32 %v3291_v33, %v9779_v11  ;;  %v3446_v36 = vmax.f32 %v9995_v2, 0.0 }
 0x7f3   :  { %v3449_v35 = vmax.f32 %v10002_v52, 0.0 }
 0x7f4   :  { %v3447_v54 = vmax.f32 %v10005_v0, 0.0  ;;  %v8068_v46 = vpop.f32.mrb[116].mxu0 }
 0x7f5   :  { %v3312_v39 = vadd.f32 %v8068_v46, %v9989_v14  ;;  %v3303_v43 = vpop.f32.mrb[117].mxu0  ;;  %v3479_v32 = vpack.c.bf16 %v3449_v35, %v3448_v50 }
 0x7f6   :  { %v3478_v3 = vpack.c.bf16 %v3447_v54, %v3446_v36  ;;  %v3304_v24 = vadd.f32 %v9989_v14, %v3303_v43  ;;  %v8069_v4 = vpop.f32.mrb[118].mxu0 }
 0x7f7   :  { %v3315_v11 = vadd.f32 %v8069_v4, %v9989_v14  ;;  %v3306_v23 = vpop.f32.mrb[119].mxu0  ;;  %v10019_v13 = vadd.f32 %v3312_v39, %v9793_v48 }
 0x7f8   :  { %8110 = vmatprep.mubr.bf16.mxu1 %v3478_v3  ;;  %v10015_v57 = vadd.f32 %v3304_v24, %v9789_v51  ;;  %v3307_v6 = vadd.f32 %v9989_v14, %v3306_v23 }
 0x7f9   :  { %8111 = vmatmul.mubr.bf16.vlgmr.msra.gmra.mrb[144].mxu1 %v3479_v32  ;;  %v10022_v59 = vadd.f32 %v3315_v11, %v9796_v19  ;;  %v3452_v60 = vmax.f32 %v10019_v13, 0.0 }
 0x7fa   :  { %v10025_v7 = vadd.f32 %v3307_v6, %v9799_v56  ;;  %v3450_v15 = vmax.f32 %v10015_v57, 0.0 }
 0x7fb   :  { %v3453_v44 = vmax.f32 %v10022_v59, 0.0 }
 0x7fc   :  { %v3451_v18 = vmax.f32 %v10025_v7, 0.0  ;;  %v8072_v51 = vpop.f32.mrb[120].mxu0 }
 0x7fd   :  { %v3328_v22 = vadd.f32 %v8072_v51, %v9989_v14  ;;  %v3319_v9 = vpop.f32.mrb[121].mxu0  ;;  %v3481_v49 = vpack.c.bf16 %v3453_v44, %v3452_v60 }
 0x7fe   :  { %v3320_v48 = vadd.f32 %v9989_v14, %v3319_v9  ;;  %v8073_v26 = vpop.f32.mrb[122].mxu0  ;;  %v3480_v19 = vpack.c.bf16 %v3451_v18, %v3450_v15  ;;  %v8339_v9 = vld [vmem:[#allocation3 + $0x108] sm:$0xff]  }
 0x7ff   :  { %v3331_v34 = vadd.f32 %v8073_v26, %v9989_v14  ;;  %v3322_v56 = vpop.f32.mrb[123].mxu0  ;;  %v10039_v28 = vadd.f32 %v3328_v22, %v9813_v20  ;;  %v8342_v26 = vld [vmem:[#allocation3 + $0x120] sm:$0xff]  }
 0x800   :  { %v10035_v55 = vadd.f32 %v3320_v48, %v9809_v61  ;;  %v3323_v38 = vadd.f32 %v9989_v14, %v3322_v56  ;;  %8114 = vmatprep.mubr.bf16.mxu1 %v3480_v19 }
 0x801   :  { %v10042_v33 = vadd.f32 %v3331_v34, %v9816_v25  ;;  %8115 = vmatmul.mubr.bf16.gmra.mrb[148].mxu1 %v3481_v49  ;;  %v3456_v50 = vmax.f32 %v10039_v28, 0.0 }
 0x802   :  { %v10045_v35 = vadd.f32 %v3323_v38, %v9819_v41  ;;  %v3454_v54 = vmax.f32 %v10035_v55, 0.0 }
 0x803   :  { %v3457_v36 = vmax.f32 %v10042_v33, 0.0 }
 0x804   :  { %v3455_v61 = vmax.f32 %v10045_v35, 0.0 }
 0x805   :  { %v3483_v39 = vpack.c.bf16 %v3457_v36, %v3456_v50  ;;  %v8343_v50 = vld [vmem:[#allocation3 + $0x128] sm:$0xff]  }
 0x806   :  { %v3482_v46 = vpack.c.bf16 %v3455_v61, %v3454_v54 }
 0x808   :  { %8118 = vmatprep.mubr.bf16.mxu1 %v3482_v46 }
 0x809   :  { %8119 = vmatmul.mubr.bf16.gmra.mrb[152].mxu1 %v3483_v39 }
 0x811   :  { %v8076_v20 = vpop.f32.mrb[124].mxu0 }
 0x812   :  { %v3344_v25 = vadd.f32 %v8076_v20, %v9989_v14  ;;  %v3335_v43 = vpop.f32.mrb[125].mxu0 }
 0x813   :  { %v3336_v3 = vadd.f32 %v9989_v14, %v3335_v43  ;;  %v8077_v41 = vpop.f32.mrb[126].mxu0 }
 0x814   :  { %v3347_v32 = vadd.f32 %v8077_v41, %v9989_v14  ;;  %v3338_v24 = vpop.f32.mrb[127].mxu0  ;;  %v10059_v23 = vadd.f32 %v3344_v25, %v9833_v42  ;;  %v8338_v42 = vld [vmem:[#allocation3 + $0x100] sm:$0xff]  }
 0x815   :  { %v10055_v4 = vadd.f32 %v3336_v3, %v9829_v16  ;;  %v3339_v11 = vadd.f32 %v9989_v14, %v3338_v24  ;;  %8142 = vmatprep.subr.bf16.mxu0 %v8338_v42 }
 0x816   :  { %v10062_v6 = vadd.f32 %v3347_v32, %v9836_v27  ;;  %v3460_v16 = vmax.f32 %v10059_v23, 0.0  ;;  %8143 = vmatpush3.bf16.msra.mxu0 %v8338_v42  ;;  %v8340_v27 = vld [vmem:[#allocation3 + $0x110] sm:$0xff]  }
 0x817   :  { %v10065_v44 = vadd.f32 %v3339_v11, %v9839_v45  ;;  %v3458_v18 = vmax.f32 %v10055_v4, 0.0  ;;  %8144 = vmatprep.subr.bf16.mxu0 %v8339_v9  ;;  %v8341_v45 = vld [vmem:[#allocation3 + $0x118] sm:$0xff]  }
 0x818   :  { %v3461_v15 = vmax.f32 %v10062_v6, 0.0 }
 0x819   :  { %v3459_v51 = vmax.f32 %v10065_v44, 0.0 }
 0x81a   :  { %v3485_v22 = vpack.c.bf16 %v3461_v15, %v3460_v16  ;;  %8145 = vmatpush3.bf16.msra.mxu0 %v8339_v9 }
 0x81b   :  { %v3484_v60 = vpack.c.bf16 %v3459_v51, %v3458_v18  ;;  %8146 = vmatprep.subr.bf16.mxu0 %v8340_v27 }
 0x81d   :  { %8122 = vmatprep.mubr.bf16.mxu1 %v3484_v60 }
 0x81e   :  { %8123 = vmatmul.mubr.bf16.gmra.mrb[156].mxu1 %v3485_v22  ;;  %8147 = vmatpush3.bf16.msra.mxu0 %v8340_v27 }
 0x81f   :  { %8148 = vmatprep.subr.bf16.mxu0 %v8341_v45 }
 0x822   :  { %8149 = vmatpush3.bf16.msra.mxu0 %v8341_v45 }
 0x823   :  { %8150 = vmatprep.subr.bf16.mxu0 %v8342_v26 }
 0x826   :  { %8151 = vmatpush3.bf16.msra.mxu0 %v8342_v26 }
 0x827   :  { %8152 = vmatprep.subr.bf16.mxu0 %v8343_v50 }
 0x82a   :  { %8153 = vmatpush3.bf16.msra.mxu0 %v8343_v50 }
 0x836   :  { %v8080_v48 = vpop.f32.mrb[128].mxu0 }
 0x837   :  { %v3360_v19 = vadd.f32 %v8080_v48, %v9989_v14  ;;  %v3351_v34 = vpop.f32.mrb[129].mxu0 }
 0x838   :  { %v3352_v56 = vadd.f32 %v9989_v14, %v3351_v34  ;;  %v8081_v49 = vpop.f32.mrb[130].mxu0 }
 0x839   :  { %v3363_v38 = vadd.f32 %v8081_v49, %v9989_v14  ;;  %v3354_v36 = vpop.f32.mrb[131].mxu0  ;;  %v10079_v46 = vadd.f32 %v3360_v19, %v9853_v10  ;;  %v8344_v10 = vld [vmem:[#allocation3 + $0x130] sm:$0xff]  }
 0x83a   :  { %v10075_v54 = vadd.f32 %v3352_v56, %v9849_v12  ;;  %v3355_v61 = vadd.f32 %v9989_v14, %v3354_v36  ;;  %8154 = vmatprep.subr.bf16.mxu0 %v8344_v10 }
 0x83b   :  { %v10082_v39 = vadd.f32 %v3363_v38, %v9856_v53  ;;  %v3464_v3 = vmax.f32 %v10079_v46, 0.0  ;;  %8155 = vmatpush3.bf16.msra.mxu0 %v8344_v10  ;;  %v8345_v53 = vld [vmem:[#allocation3 + $0x138] sm:$0xff]  }
 0x83c   :  { %v10085_v20 = vadd.f32 %v3355_v61, %v9859_v63  ;;  %v3462_v43 = vmax.f32 %v10075_v54, 0.0  ;;  %8156 = vmatprep.subr.bf16.mxu0 %v8345_v53 }
 0x83d   :  { %v3465_v25 = vmax.f32 %v10082_v39, 0.0 }
 0x83e   :  { %v3463_v12 = vmax.f32 %v10085_v20, 0.0 }
 0x83f   :  { %v3487_v32 = vpack.c.bf16 %v3465_v25, %v3464_v3  ;;  %8157 = vmatpush3.bf16.msra.mxu0 %v8345_v53 }
 0x840   :  { %v3486_v41 = vpack.c.bf16 %v3463_v12, %v3462_v43 }
 0x842   :  { %8126 = vmatprep.mubr.bf16.mxu1 %v3486_v41 }
 0x843   :  { %8127 = vmatmul.mubr.bf16.gmra.mrb[160].mxu1 %v3487_v32 }
 0x857   :  { %v8084_v63 = vpop.f32.mrb[132].mxu0 }
 0x858   :  { %v3376_v24 = vadd.f32 %v8084_v63, %v9989_v14  ;;  %v3367_v11 = vpop.f32.mrb[133].mxu0 }
 0x859   :  { %v3368_v15 = vadd.f32 %v9989_v14, %v3367_v11  ;;  %v8085_v18 = vpop.f32.mrb[134].mxu0 }
 0x85a   :  { %v3379_v51 = vadd.f32 %v8085_v18, %v9989_v14  ;;  %v3370_v16 = vpop.f32.mrb[135].mxu0  ;;  %v10099_v42 = vadd.f32 %v3376_v24, %v9873_v30 }
 0x85b   :  { %v10095_v60 = vadd.f32 %v3368_v15, %v9869_v58  ;;  %v3371_v22 = vadd.f32 %v9989_v14, %v3370_v16 }
 0x85c   :  { %v10102_v9 = vadd.f32 %v3379_v51, %v9876_v29  ;;  %v3468_v58 = vmax.f32 %v10099_v42, 0.0 }
 0x85d   :  { %v10105_v27 = vadd.f32 %v3371_v22, %v9879_v17  ;;  %v3466_v48 = vmax.f32 %v10095_v60, 0.0 }
 0x85e   :  { %v3469_v45 = vmax.f32 %v10102_v9, 0.0 }
 0x85f   :  { %v3467_v26 = vmax.f32 %v10105_v27, 0.0 }
 0x860   :  { %v3489_v34 = vpack.c.bf16 %v3469_v45, %v3468_v58 }
 0x861   :  { %v3488_v19 = vpack.c.bf16 %v3467_v26, %v3466_v48 }
 0x863   :  { %8130 = vmatprep.mubr.bf16.mxu1 %v3488_v19 }
 0x864   :  { %8131 = vmatmul.mubr.bf16.gmra.mrb[164].mxu1 %v3489_v34 }
 0x87c   :  { %v8088_v30 = vpop.f32.mrb[136].mxu0 }
 0x87d   :  { %v3392_v56 = vadd.f32 %v8088_v30, %v9989_v14  ;;  %v3383_v29 = vpop.f32.mrb[137].mxu0 }
 0x87e   :  { %v3384_v49 = vadd.f32 %v9989_v14, %v3383_v29  ;;  %v8089_v17 = vpop.f32.mrb[138].mxu0 }
 0x87f   :  { %v3395_v38 = vadd.f32 %v8089_v17, %v9989_v14  ;;  %v3386_v36 = vpop.f32.mrb[139].mxu0  ;;  %v10119_v25 = vadd.f32 %v3392_v56, %v9893_v62 }
 0x880   :  { %v10115_v61 = vadd.f32 %v3384_v49, %v9889_v40  ;;  %v3387_v50 = vadd.f32 %v9989_v14, %v3386_v36 }
 0x881   :  { %v10122_v43 = vadd.f32 %v3395_v38, %v9896_v8  ;;  %v3472_v40 = vmax.f32 %v10119_v25, 0.0 }
 0x882   :  { %v10125_v12 = vadd.f32 %v3387_v50, %v9899_v31  ;;  %v3470_v41 = vmax.f32 %v10115_v61, 0.0 }
 0x883   :  { %v3473_v3 = vmax.f32 %v10122_v43, 0.0 }
 0x884   :  { %v3471_v32 = vmax.f32 %v10125_v12, 0.0 }
 0x885   :  { %v3491_v53 = vpack.c.bf16 %v3473_v3, %v3472_v40 }
 0x886   :  { %v3490_v10 = vpack.c.bf16 %v3471_v32, %v3470_v41 }
 0x888   :  { %8134 = vmatprep.mubr.bf16.mxu1 %v3490_v10 }
 0x889   :  { %8135 = vmatmul.mubr.bf16.gmra.mrb[168].mxu1 %v3491_v53 }
 0x89d   :  { %v8092_v62 = vpop.f32.mrb[140].mxu0 }
 0x89e   :  { %v3408_v63 = vadd.f32 %v8092_v62, %v9989_v14  ;;  %v3399_v8 = vpop.f32.mrb[141].mxu0 }
 0x89f   :  { %v3400_v24 = vadd.f32 %v9989_v14, %v3399_v8  ;;  %v8093_v31 = vpop.f32.mrb[142].mxu0 }
 0x8a0   :  { %v3411_v11 = vadd.f32 %v8093_v31, %v9989_v14  ;;  %v3402_v15 = vpop.f32.mrb[143].mxu0  ;;  %v10139_v16 = vadd.f32 %v3408_v63, %v9913_v5  ;;  %v10154_v5 = vld [vmem:[%s11125_s6 + $0x4] ss:$0 sm:$0xff] }
 0x8a1   :  { %v10135_v18 = vadd.f32 %v3400_v24, %v9909_v37  ;;  %v3403_v51 = vadd.f32 %v9989_v14, %v3402_v15 }
 0x8a2   :  { %v10142_v22 = vadd.f32 %v3411_v11, %v9916_v21  ;;  %v3476_v37 = vmax.f32 %v10139_v16, 0.0 }
 0x8a3   :  { %v10145_v45 = vadd.f32 %v3403_v51, %v9919_v1  ;;  %v3474_v26 = vmax.f32 %v10135_v18, 0.0 }
 0x8a4   :  { %v3477_v48 = vmax.f32 %v10142_v22, 0.0 }
 0x8a5   :  { %v3475_v58 = vmax.f32 %v10145_v45, 0.0 }
 0x8a6   :  { %v3493_v34 = vpack.c.bf16 %v3477_v48, %v3476_v37 }
 0x8a7   :  { %v3492_v19 = vpack.c.bf16 %v3475_v58, %v3474_v26 }
 0x8a9   :  { %8138 = vmatprep.mubr.bf16.mxu1 %v3492_v19 }
 0x8aa   :  { %8139 = vmatmul.mubr.bf16.gmra.mrb[172].mxu1 %v3493_v34 }
 0x8cc   :  { %v8112_v21 = vpop.f32.mrb[144].mxu1 }
 0x8cd   :  { %v3607_v1 = vadd.f32 %v8112_v21, %v10154_v5  ;;  %v3598_v14 = vpop.f32.mrb[145].mxu1 }
 0x8ce   :  { %v3599_v30 = vadd.f32 %v10154_v5, %v3598_v14  ;;  %v8113_v56 = vpop.f32.mrb[146].mxu1 }
 0x8cf   :  { %v3610_v29 = vadd.f32 %v8113_v56, %v10154_v5  ;;  %v3601_v49 = vpop.f32.mrb[147].mxu1  ;;  %v3727_v38 = vmax.f32 %v3607_v1, 0.0 }
 0x8d0   :  { %v3602_v17 = vadd.f32 %v10154_v5, %v3601_v49  ;;  %v3725_v50 = vmax.f32 %v3599_v30, 0.0 }
 0x8d1   :  { %v3728_v36 = vmax.f32 %v3610_v29, 0.0 }
 0x8d2   :  { %v3726_v3 = vmax.f32 %v3602_v17, 0.0 }
 0x8d3   :  { %v3758_v41 = vpack.c.bf16 %v3728_v36, %v3727_v38 }
 0x8d4   :  { %v3757_v32 = vpack.c.bf16 %v3726_v3, %v3725_v50  ;;  %v8116_v40 = vpop.f32.mrb[148].mxu1 }
 0x8d5   :  { %v3623_v10 = vadd.f32 %v8116_v40, %v10154_v5  ;;  %v3614_v53 = vpop.f32.mrb[149].mxu1 }
 0x8d6   :  { %8158 = vmatprep.mubr.bf16.mxu0 %v3757_v32  ;;  %v3615_v62 = vadd.f32 %v10154_v5, %v3614_v53  ;;  %v8117_v63 = vpop.f32.mrb[150].mxu1 }
 0x8d7   :  { %8159 = vmatmul.mubr.bf16.vlgmr.msra.gmra.mrb[144].mxu0 %v3758_v41  ;;  %v3626_v8 = vadd.f32 %v8117_v63, %v10154_v5  ;;  %v3617_v24 = vpop.f32.mrb[151].mxu1  ;;  %v3731_v11 = vmax.f32 %v3623_v10, 0.0 }
 0x8d8   :  { %v3618_v31 = vadd.f32 %v10154_v5, %v3617_v24  ;;  %v3729_v51 = vmax.f32 %v3615_v62, 0.0 }
 0x8d9   :  { %v3732_v15 = vmax.f32 %v3626_v8, 0.0 }
 0x8da   :  { %v3730_v48 = vmax.f32 %v3618_v31, 0.0 }
 0x8db   :  { %v3760_v26 = vpack.c.bf16 %v3732_v15, %v3731_v11 }
 0x8dc   :  { %v3759_v58 = vpack.c.bf16 %v3730_v48, %v3729_v51  ;;  %v8120_v37 = vpop.f32.mrb[152].mxu1  ;;  %v4235_v48 = vld [vmem:[#allocation2] sm:$0x1] }
 0x8dd   :  { %v3639_v19 = vadd.f32 %v8120_v37, %v10154_v5  ;;  %v3630_v34 = vpop.f32.mrb[153].mxu1  ;;  %4238 = vperm.xlu1 %8246, %v4235_v48  }
 0x8de   :  { %v3631_v21 = vadd.f32 %v10154_v5, %v3630_v34  ;;  %v8121_v1 = vpop.f32.mrb[154].mxu1  ;;  %8162 = vmatprep.mubr.bf16.mxu0 %v3759_v58 }
 0x8df   :  { %v3642_v14 = vadd.f32 %v8121_v1, %v10154_v5  ;;  %v3633_v30 = vpop.f32.mrb[155].mxu1  ;;  %8163 = vmatmul.mubr.bf16.gmra.mrb[148].mxu0 %v3760_v26  ;;  %v3735_v29 = vmax.f32 %v3639_v19, 0.0 }
 0x8e0   :  { %v3634_v56 = vadd.f32 %v10154_v5, %v3633_v30  ;;  %v3733_v17 = vmax.f32 %v3631_v21, 0.0 }
 0x8e1   :  { %v3736_v49 = vmax.f32 %v3642_v14, 0.0 }
 0x8e2   :  { %v3734_v38 = vmax.f32 %v3634_v56, 0.0 }
 0x8e3   :  { %v3762_v36 = vpack.c.bf16 %v3736_v49, %v3735_v29 }
 0x8e4   :  { %v3761_v50 = vpack.c.bf16 %v3734_v38, %v3733_v17 }
 0x8e6   :  { %8166 = vmatprep.mubr.bf16.mxu0 %v3761_v50 }
 0x8e7   :  { %8167 = vmatmul.mubr.bf16.gmra.mrb[152].mxu0 %v3762_v36 }
 0x8f1   :  { %v8124_v3 = vpop.f32.mrb[156].mxu1 }
 0x8f2   :  { %v3655_v41 = vadd.f32 %v8124_v3, %v10154_v5  ;;  %v3646_v32 = vpop.f32.mrb[157].mxu1 }
 0x8f3   :  { %v3647_v40 = vadd.f32 %v10154_v5, %v3646_v32  ;;  %v8125_v10 = vpop.f32.mrb[158].mxu1 }
 0x8f4   :  { %v3658_v53 = vadd.f32 %v8125_v10, %v10154_v5  ;;  %v3649_v62 = vpop.f32.mrb[159].mxu1  ;;  %v3739_v8 = vmax.f32 %v3655_v41, 0.0 }
 0x8f5   :  { %v3650_v63 = vadd.f32 %v10154_v5, %v3649_v62  ;;  %v3737_v31 = vmax.f32 %v3647_v40, 0.0 }
 0x8f6   :  { %v3740_v24 = vmax.f32 %v3658_v53, 0.0 }
 0x8f7   :  { %v3738_v11 = vmax.f32 %v3650_v63, 0.0 }
 0x8f8   :  { %v3764_v15 = vpack.c.bf16 %v3740_v24, %v3739_v8 }
 0x8f9   :  { %v3763_v51 = vpack.c.bf16 %v3738_v11, %v3737_v31 }
 0x8fb   :  { %8170 = vmatprep.mubr.bf16.mxu0 %v3763_v51 }
 0x8fc   :  { %8171 = vmatmul.mubr.bf16.gmra.mrb[156].mxu0 %v3764_v15 }
 0x916   :  { %v8128_v26 = vpop.f32.mrb[160].mxu1 }
 0x917   :  { %v3671_v58 = vadd.f32 %v8128_v26, %v10154_v5  ;;  %v3662_v37 = vpop.f32.mrb[161].mxu1 }
 0x918   :  { %v3663_v19 = vadd.f32 %v10154_v5, %v3662_v37  ;;  %v8129_v34 = vpop.f32.mrb[162].mxu1 }
 0x919   :  { %v3674_v21 = vadd.f32 %v8129_v34, %v10154_v5  ;;  %v3665_v1 = vpop.f32.mrb[163].mxu1  ;;  %v3743_v30 = vmax.f32 %v3671_v58, 0.0 }
 0x91a   :  { %v3666_v14 = vadd.f32 %v10154_v5, %v3665_v1  ;;  %v3741_v29 = vmax.f32 %v3663_v19, 0.0 }
 0x91b   :  { %v3744_v56 = vmax.f32 %v3674_v21, 0.0 }
 0x91c   :  { %v3742_v49 = vmax.f32 %v3666_v14, 0.0 }
 0x91d   :  { %v3766_v17 = vpack.c.bf16 %v3744_v56, %v3743_v30 }
 0x91e   :  { %v3765_v38 = vpack.c.bf16 %v3742_v49, %v3741_v29 }
 0x920   :  { %8174 = vmatprep.mubr.bf16.mxu0 %v3765_v38 }
 0x921   :  { %8175 = vmatmul.mubr.bf16.gmra.mrb[160].mxu0 %v3766_v17 }
 0x937   :  { %v8132_v36 = vpop.f32.mrb[164].mxu1 }
 0x938   :  { %v3687_v50 = vadd.f32 %v8132_v36, %v10154_v5  ;;  %v3678_v3 = vpop.f32.mrb[165].mxu1 }
 0x939   :  { %v3679_v41 = vadd.f32 %v10154_v5, %v3678_v3  ;;  %v8133_v32 = vpop.f32.mrb[166].mxu1 }
 0x93a   :  { %v3690_v40 = vadd.f32 %v8133_v32, %v10154_v5  ;;  %v3681_v10 = vpop.f32.mrb[167].mxu1  ;;  %v3747_v62 = vmax.f32 %v3687_v50, 0.0 }
 0x93b   :  { %v3682_v53 = vadd.f32 %v10154_v5, %v3681_v10  ;;  %v3745_v8 = vmax.f32 %v3679_v41, 0.0 }
 0x93c   :  { %v3748_v63 = vmax.f32 %v3690_v40, 0.0 }
 0x93d   :  { %v3746_v24 = vmax.f32 %v3682_v53, 0.0 }
 0x93e   :  { %v3768_v31 = vpack.c.bf16 %v3748_v63, %v3747_v62 }
 0x93f   :  { %v3767_v11 = vpack.c.bf16 %v3746_v24, %v3745_v8  ;;  %v10191_v24 = vld [vmem:[%s11127_s8 + $0x4] ss:$0 sm:$0xff] }
 0x941   :  { %8178 = vmatprep.mubr.bf16.mxu0 %v3767_v11 }
 0x942   :  { %8179 = vmatmul.mubr.bf16.gmra.mrb[164].mxu0 %v3768_v31 }
 0x95c   :  { %v8136_v15 = vpop.f32.mrb[168].mxu1 }
 0x95d   :  { %v3703_v51 = vadd.f32 %v8136_v15, %v10154_v5  ;;  %v3694_v48 = vpop.f32.mrb[169].mxu1 }
 0x95e   :  { %v3695_v26 = vadd.f32 %v10154_v5, %v3694_v48  ;;  %v8137_v58 = vpop.f32.mrb[170].mxu1 }
 0x95f   :  { %v3706_v37 = vadd.f32 %v8137_v58, %v10154_v5  ;;  %v3697_v19 = vpop.f32.mrb[171].mxu1  ;;  %v3751_v21 = vmax.f32 %v3703_v51, 0.0 }
 0x960   :  { %v3698_v34 = vadd.f32 %v10154_v5, %v3697_v19  ;;  %v3749_v14 = vmax.f32 %v3695_v26, 0.0 }
 0x961   :  { %v3752_v1 = vmax.f32 %v3706_v37, 0.0 }
 0x962   :  { %v3750_v30 = vmax.f32 %v3698_v34, 0.0 }
 0x963   :  { %v3770_v56 = vpack.c.bf16 %v3752_v1, %v3751_v21  ;;  %v10203_v1 = vld [vmem:[%s11128_s9] ss:$0 sm:$0xff]  ;;  %s8401_s9 = smov [#allocation6]  }
 0x964   :  { %v3769_v29 = vpack.c.bf16 %v3750_v30, %v3749_v14  ;;  %s7214_s25 = sshll.u32 %s8401_s9, 4  ;;  %s7215_s25 = int_to_ptr.vmem [resolvable:$true] %s7214_s25 }
 0x965   :  { %s8368_s26 = scalar_lea.vmem %s7215_s25, 32  ;;  %p8373_p9 = scmp.lt.s32.totalorder %s7215_s25, %s7215_s25 }
 0x966   :  { %8182 = vmatprep.mubr.bf16.mxu0 %v3769_v29  ;;  %p8369_p8 = scmp.ne.s32.totalorder %s7215_s25, %s8368_s26  ;;  %p8374_p10 = scmp.lt.s32.totalorder %s8368_s26, %s8368_s26 }
 0x967   :  { %8183 = vmatmul.mubr.bf16.gmra.mrb[168].mxu0 %v3770_v56 }
 0x968   :  { %p8375_p11 = por %p8374_p10, %p8373_p9 }
 0x96a   :  { %p8376_p12 = pnand %p8375_p11, %p8369_p8 }
 0x97d   :  { %v8140_v49 = vpop.f32.mrb[172].mxu1 }
 0x97e   :  { %v3719_v17 = vadd.f32 %v8140_v49, %v10154_v5  ;;  %v3710_v38 = vpop.f32.mrb[173].mxu1 }
 0x97f   :  { %v3711_v36 = vadd.f32 %v10154_v5, %v3710_v38  ;;  %v8141_v50 = vpop.f32.mrb[174].mxu1 }
 0x980   :  { %v3722_v3 = vadd.f32 %v8141_v50, %v10154_v5  ;;  %v3713_v41 = vpop.f32.mrb[175].mxu1  ;;  %v3755_v40 = vmax.f32 %v3719_v17, 0.0 }
 0x981   :  { %v3714_v32 = vadd.f32 %v10154_v5, %v3713_v41  ;;  %v3753_v53 = vmax.f32 %v3711_v36, 0.0 }
 0x982   :  { %v3756_v10 = vmax.f32 %v3722_v3, 0.0 }
 0x983   :  { %v3754_v62 = vmax.f32 %v3714_v32, 0.0 }
 0x984   :  { %v3772_v63 = vpack.c.bf16 %v3756_v10, %v3755_v40 }
 0x985   :  { %v3771_v8 = vpack.c.bf16 %v3754_v62, %v3753_v53 }
 0x987   :  { %8186 = vmatprep.mubr.bf16.mxu0 %v3771_v8 }
 0x988   :  { %8187 = vmatmul.mubr.bf16.gmra.mrb[172].mxu0 %v3772_v63 }
 0x9aa   :  { %v8160_v31 = vpop.f32.mrb[144].mxu0 }
 0x9ab   :  { %v3886_v11 = vadd.f32 %v8160_v31, %v10191_v24  ;;  %v3877_v15 = vpop.f32.mrb[145].mxu0 }
 0x9ac   :  { %v3878_v51 = vadd.f32 %v10191_v24, %v3877_v15  ;;  %v8161_v5 = vpop.f32.mrb[146].mxu0 }
 0x9ad   :  { %v4006_v48 = vadd.f32 %v3886_v11, %v9999_v47  ;;  %v3889_v26 = vadd.f32 %v8161_v5, %v10191_v24  ;;  %v3880_v58 = vpop.f32.mrb[147].mxu0 }
 0x9ae   :  { %v4004_v37 = vadd.f32 %v3878_v51, %v9995_v2  ;;  %v3881_v19 = vadd.f32 %v10191_v24, %v3880_v58 }
 0x9af   :  { %v4007_v34 = vadd.f32 %v3889_v26, %v10002_v52  ;;  %vm4038_vm1 = vcmp.gt.f32.partialorder %v4006_v48, 0.0  ;;  %v4070_v21 = vmul.f32 0.2, %v4006_v48 }
 0x9b0   :  { %vm4036_vm2 = vcmp.gt.f32.partialorder %v4004_v37, 0.0  ;;  %v4068_v14 = vmul.f32 0.2, %v4004_v37  ;;  %v4005_v47 = vadd.f32 %v3881_v19, %v10005_v0 }
 0x9b1   :  { %vm4039_vm3 = vcmp.gt.f32.partialorder %v4007_v34, 0.0  ;;  %v4071_v30 = vmul.f32 0.2, %v4007_v34  ;;  %v4102_v56 = vsel %vm4038_vm1, %v4006_v48, %v4070_v21 }
 0x9b2   :  { %v4141_v2 = vmul.f32 %v10203_v1, %v4102_v56  ;;  %v4100_v29 = vsel %vm4036_vm2, %v4004_v37, %v4068_v14  ;;  %vm4037_vm4 = vcmp.gt.f32.partialorder %v4005_v47, 0.0  ;;  %v4069_v49 = vmul.f32 0.2, %v4005_v47  ;;  %v8164_v52 = vpop.f32.mrb[148].mxu0 }
 0x9b3   :  { %v4139_v17 = vmul.f32 %v10203_v1, %v4100_v29  ;;  %v3902_v38 = vadd.f32 %v8164_v52, %v10191_v24  ;;  %v3893_v36 = vpop.f32.mrb[149].mxu0  ;;  %v4103_v3 = vsel %vm4039_vm3, %v4007_v34, %v4071_v30 }
 0x9b4   :  { %4175 = vadd.xlane.f32.xlu0 %v4141_v2  ;;  %v4101_v50 = vsel %vm4037_vm4, %v4005_v47, %v4069_v49  ;;  %v3894_v41 = vadd.f32 %v10191_v24, %v3893_v36  ;;  %v8165_v0 = vpop.f32.mrb[150].mxu0  ;;  %v4142_v8 = vmul.f32 %v10203_v1, %v4103_v3 }
 0x9b5   :  { %4171 = vadd.xlane.f32.xlu1 %v4139_v17  ;;  %v4140_v32 = vmul.f32 %v10203_v1, %v4101_v50  ;;  %v4010_v40 = vadd.f32 %v3902_v38, %v10019_v13  ;;  %v3905_v10 = vadd.f32 %v8165_v0, %v10191_v24  ;;  %v3896_v53 = vpop.f32.mrb[151].mxu0 }
 0x9b6   :  { %v4008_v62 = vadd.f32 %v3894_v41, %v10015_v57  ;;  %v3897_v63 = vadd.f32 %v10191_v24, %v3896_v53 }
 0x9b7   :  { %v4011_v31 = vadd.f32 %v3905_v10, %v10022_v59  ;;  %vm4042_vm5 = vcmp.gt.f32.partialorder %v4010_v40, 0.0  ;;  %v4074_v11 = vmul.f32 0.2, %v4010_v40 }
 0x9b8   :  { %4173 = vadd.xlane.f32.xlu0 %v4140_v32  ;;  %v4009_v15 = vadd.f32 %v3897_v63, %v10025_v7  ;;  %vm4040_vm6 = vcmp.gt.f32.partialorder %v4008_v62, 0.0  ;;  %v4072_v51 = vmul.f32 0.2, %v4008_v62 }
 0x9b9   :  { %4177 = vadd.xlane.f32.xlu1 %v4142_v8  ;;  %vm4043_vm7 = vcmp.gt.f32.partialorder %v4011_v31, 0.0  ;;  %v4075_v13 = vmul.f32 0.2, %v4011_v31  ;;  %v4106_v5 = vsel %vm4042_vm5, %v4010_v40, %v4074_v11 }
 0x9ba   :  { %vm4041_vm8 = vcmp.gt.f32.partialorder %v4009_v15, 0.0  ;;  %v4073_v48 = vmul.f32 0.2, %v4009_v15  ;;  %v8168_v57 = vpop.f32.mrb[152].mxu0  ;;  %v4145_v26 = vmul.f32 %v10203_v1, %v4106_v5  ;;  %v4104_v19 = vsel %vm4040_vm6, %v4008_v62, %v4072_v51 }
 0x9bb   :  { %v3918_v58 = vadd.f32 %v8168_v57, %v10191_v24  ;;  %v3909_v37 = vpop.f32.mrb[153].mxu0  ;;  %v4107_v59 = vsel %vm4043_vm7, %v4011_v31, %v4075_v13  ;;  %v4143_v49 = vmul.f32 %v10203_v1, %v4104_v19 }
 0x9bc   :  { %v3910_v34 = vadd.f32 %v10191_v24, %v3909_v37  ;;  %v8169_v21 = vpop.f32.mrb[154].mxu0  ;;  %4183 = vadd.xlane.f32.xlu0 %v4145_v26  ;;  %v4146_v7 = vmul.f32 %v10203_v1, %v4107_v59  ;;  %v4105_v56 = vsel %vm4041_vm8, %v4009_v15, %v4073_v48 }
 0x9bd   :  { %v4014_v14 = vadd.f32 %v3918_v58, %v10039_v28  ;;  %v3921_v47 = vadd.f32 %v8169_v21, %v10191_v24  ;;  %v3912_v30 = vpop.f32.mrb[155].mxu0  ;;  %v4144_v28 = vmul.f32 %v10203_v1, %v4105_v56 }
 0x9be   :  { %v4012_v2 = vadd.f32 %v3910_v34, %v10035_v55  ;;  %v3913_v29 = vadd.f32 %v10191_v24, %v3912_v30  ;;  %4185 = vadd.xlane.f32.xlu1 %v4146_v7 }
 0x9bf   :  { %v4015_v52 = vadd.f32 %v3921_v47, %v10042_v33  ;;  %vm4046_vm9 = vcmp.gt.f32.partialorder %v4014_v14, 0.0  ;;  %v4078_v17 = vmul.f32 0.2, %v4014_v14 }
 0x9c0   :  { %v4013_v38 = vadd.f32 %v3913_v29, %v10045_v35  ;;  %4179 = vadd.xlane.f32.xlu0 %v4143_v49  ;;  %vm4044_vm10 = vcmp.gt.f32.partialorder %v4012_v2, 0.0  ;;  %v4076_v36 = vmul.f32 0.2, %v4012_v2 }
 0x9c1   :  { %vm4047_vm11 = vcmp.gt.f32.partialorder %v4015_v52, 0.0  ;;  %v4079_v50 = vmul.f32 0.2, %v4015_v52  ;;  %v4110_v3 = vsel %vm4046_vm9, %v4014_v14, %v4078_v17 }
 0x9c2   :  { %vm4045_vm12 = vcmp.gt.f32.partialorder %v4013_v38, 0.0  ;;  %v4077_v55 = vmul.f32 0.2, %v4013_v38  ;;  %4181 = vadd.xlane.f32.xlu1 %v4144_v28  ;;  %v4149_v41 = vmul.f32 %v10203_v1, %v4110_v3  ;;  %v4108_v32 = vsel %vm4044_vm10, %v4012_v2, %v4076_v36 }
 0x9c3   :  { %v4111_v0 = vsel %vm4047_vm11, %v4015_v52, %v4079_v50  ;;  %v4147_v35 = vmul.f32 %v10203_v1, %v4108_v32 }
 0x9c4   :  { %4191 = vadd.xlane.f32.xlu0 %v4149_v41  ;;  %v4150_v33 = vmul.f32 %v10203_v1, %v4111_v0  ;;  %v4109_v40 = vsel %vm4045_vm12, %v4013_v38, %v4077_v55 }
 0x9c5   :  { %v4148_v10 = vmul.f32 %v10203_v1, %v4109_v40 }
 0x9c6   :  { %4193 = vadd.xlane.f32.xlu1 %v4150_v33 }
 0x9c8   :  { %4187 = vadd.xlane.f32.xlu0 %v4147_v35 }
 0x9ca   :  { %4189 = vadd.xlane.f32.xlu1 %v4148_v10 }
 0x9cf   :  { %v8172_v53 = vpop.f32.mrb[156].mxu0 }
 0x9d0   :  { %v3934_v62 = vadd.f32 %v8172_v53, %v10191_v24  ;;  %v3925_v63 = vpop.f32.mrb[157].mxu0 }
 0x9d1   :  { %v3926_v8 = vadd.f32 %v10191_v24, %v3925_v63  ;;  %v8173_v31 = vpop.f32.mrb[158].mxu0 }
 0x9d2   :  { %v4018_v11 = vadd.f32 %v3934_v62, %v10059_v23  ;;  %v3937_v15 = vadd.f32 %v8173_v31, %v10191_v24  ;;  %v3928_v51 = vpop.f32.mrb[159].mxu0 }
 0x9d3   :  { %v4016_v13 = vadd.f32 %v3926_v8, %v10055_v4  ;;  %v3929_v5 = vadd.f32 %v10191_v24, %v3928_v51 }
 0x9d4   :  { %v4019_v48 = vadd.f32 %v3937_v15, %v10062_v6  ;;  %vm4050_vm13 = vcmp.gt.f32.partialorder %v4018_v11, 0.0  ;;  %v4082_v57 = vmul.f32 0.2, %v4018_v11 }
 0x9d5   :  { %v4017_v26 = vadd.f32 %v3929_v5, %v10065_v44  ;;  %vm4048_vm14 = vcmp.gt.f32.partialorder %v4016_v13, 0.0  ;;  %v4080_v58 = vmul.f32 0.2, %v4016_v13 }
 0x9d6   :  { %vm4051_vm15 = vcmp.gt.f32.partialorder %v4019_v48, 0.0  ;;  %v4083_v37 = vmul.f32 0.2, %v4019_v48  ;;  %v4114_v59 = vsel %vm4050_vm13, %v4018_v11, %v4082_v57 }
 0x9d7   :  { %vm4049_vm0 = vcmp.gt.f32.partialorder %v4017_v26, 0.0  ;;  %v4081_v23 = vmul.f32 0.2, %v4017_v26  ;;  %v4153_v19 = vmul.f32 %v10203_v1, %v4114_v59  ;;  %v4112_v21 = vsel %vm4048_vm14, %v4016_v13, %v4080_v58 }
 0x9d8   :  { %v4115_v34 = vsel %vm4051_vm15, %v4019_v48, %v4083_v37  ;;  %v4151_v6 = vmul.f32 %v10203_v1, %v4112_v21 }
 0x9d9   :  { %4199 = vadd.xlane.f32.xlu0 %v4153_v19  ;;  %v4154_v4 = vmul.f32 %v10203_v1, %v4115_v34  ;;  %v4113_v7 = vsel %vm4049_vm0, %v4017_v26, %v4081_v23  ;;  %v4241_v34 = vlaneseq }
 0x9da   :  { %v4152_v44 = vmul.f32 %v10203_v1, %v4113_v7  ;;  %v4239_v7 = vpop.permute.xlu1 %4238 }
 0x9db   :  { %4201 = vadd.xlane.f32.xlu1 %v4154_v4  ;;  %v10271_v21 = vshrl.u32 %v4241_v34, 7 }
 0x9dd   :  { %4195 = vadd.xlane.f32.xlu0 %v4151_v6  ;;  %v10274_v4 = vsub.s32 0, %v10271_v21 }
 0x9df   :  { %4197 = vadd.xlane.f32.xlu1 %v4152_v44 }
 0x9f4   :  { %v8176_v14 = vpop.f32.mrb[160].mxu0 }
 0x9f5   :  { %v3950_v47 = vadd.f32 %v8176_v14, %v10191_v24  ;;  %v3941_v30 = vpop.f32.mrb[161].mxu0 }
 0x9f6   :  { %v3942_v56 = vadd.f32 %v10191_v24, %v3941_v30  ;;  %v8177_v2 = vpop.f32.mrb[162].mxu0 }
 0x9f7   :  { %v4022_v29 = vadd.f32 %v3950_v47, %v10079_v46  ;;  %v3953_v49 = vadd.f32 %v8177_v2, %v10191_v24  ;;  %v3944_v52 = vpop.f32.mrb[163].mxu0  ;;  %v8400_v2 = vmov 1966171168  }
 0x9f8   :  { %v4020_v17 = vadd.f32 %v3942_v56, %v10075_v54  ;;  %v3945_v38 = vadd.f32 %v10191_v24, %v3944_v52  ;;  %v10279_v56 = vrot.slane %v4239_v7, %v10274_v4 }
 0x9f9   :  { %v4023_v28 = vadd.f32 %v3953_v49, %v10082_v39  ;;  %vm4054_vm1 = vcmp.gt.f32.partialorder %v4022_v29, 0.0  ;;  %v4086_v36 = vmul.f32 0.2, %v4022_v29 }
 0x9fa   :  { %v4021_v50 = vadd.f32 %v3945_v38, %v10085_v20  ;;  %vm4052_vm2 = vcmp.gt.f32.partialorder %v4020_v17, 0.0  ;;  %v4084_v3 = vmul.f32 0.2, %v4020_v17  ;;  %v10284_v38 = vsub.s32 1, %v10271_v21 }
 0x9fb   :  { %vm4055_vm3 = vcmp.gt.f32.partialorder %v4023_v28, 0.0  ;;  %v4087_v55 = vmul.f32 0.2, %v4023_v28  ;;  %v4118_v41 = vsel %vm4054_vm1, %v4022_v29, %v4086_v36  ;;  %v5338_v29 = vunpack.c.l.s4 %v8400_v2 }
 0x9fc   :  { %vm4053_vm4 = vcmp.gt.f32.partialorder %v4021_v50, 0.0  ;;  %v4085_v46 = vmul.f32 0.2, %v4021_v50  ;;  %v4157_v0 = vmul.f32 %v10203_v1, %v4118_v41  ;;  %v4116_v33 = vsel %vm4052_vm2, %v4020_v17, %v4084_v3 }
 0x9fd   :  { %v4119_v32 = vsel %vm4055_vm3, %v4023_v28, %v4087_v55  ;;  %v4155_v39 = vmul.f32 %v10203_v1, %v4116_v33  ;;  %v10287_v28 = vsub.s32 2, %v10271_v21  ;;  %v10292_v3 = vsub.s32 3, %v10271_v21 }
 0x9fe   :  { %4207 = vadd.xlane.f32.xlu0 %v4157_v0  ;;  %v4158_v54 = vmul.f32 %v10203_v1, %v4119_v32  ;;  %v4117_v40 = vsel %vm4053_vm4, %v4021_v50, %v4085_v46  ;;  %v10295_v55 = vsub.s32 4, %v10271_v21  ;;  %v10299_v46 = vsub.s32 5, %v10271_v21 }
 0x9ff   :  { %v4156_v20 = vmul.f32 %v10203_v1, %v4117_v40  ;;  %v10303_v40 = vsub.s32 6, %v10271_v21  ;;  %vm7008_vm1 = vcmask 130112   ;;  %vm7015_vm2 = vcmask 195712  }
 0xa00   :  { %4209 = vadd.xlane.f32.xlu1 %v4158_v54  ;;  %vm7022_vm3 = vcmask 261312   ;;  %vm7029_vm4 = vcmask 326912  }
 0xa02   :  { %4203 = vadd.xlane.f32.xlu0 %v4155_v39 }
 0xa04   :  { %4205 = vadd.xlane.f32.xlu1 %v4156_v20 }
 0xa15   :  { %v8180_v35 = vpop.f32.mrb[164].mxu0 }
 0xa16   :  { %v3966_v10 = vadd.f32 %v8180_v35, %v10191_v24  ;;  %v3957_v53 = vpop.f32.mrb[165].mxu0 }
 0xa17   :  { %v3958_v62 = vadd.f32 %v10191_v24, %v3957_v53  ;;  %v8181_v63 = vpop.f32.mrb[166].mxu0 }
 0xa18   :  { %v4026_v8 = vadd.f32 %v3966_v10, %v10099_v42  ;;  %v3969_v31 = vadd.f32 %v8181_v63, %v10191_v24  ;;  %v3960_v11 = vpop.f32.mrb[167].mxu0  ;;  %v10308_v63 = vsub.s32 7, %v10271_v21 }
 0xa19   :  { %v4024_v15 = vadd.f32 %v3958_v62, %v10095_v60  ;;  %v3961_v51 = vadd.f32 %v10191_v24, %v3960_v11 }
 0xa1a   :  { %v4027_v13 = vadd.f32 %v3969_v31, %v10102_v9  ;;  %vm4058_vm5 = vcmp.gt.f32.partialorder %v4026_v8, 0.0  ;;  %v4090_v5 = vmul.f32 0.2, %v4026_v8 }
 0xa1b   :  { %v4025_v48 = vadd.f32 %v3961_v51, %v10105_v27  ;;  %vm4056_vm6 = vcmp.gt.f32.partialorder %v4024_v15, 0.0  ;;  %v4088_v57 = vmul.f32 0.2, %v4024_v15 }
 0xa1c   :  { %v4122_v26 = vsel %vm4058_vm5, %v4026_v8, %v4090_v5  ;;  %v4091_v37 = vmul.f32 0.2, %v4027_v13  ;;  %vm4059_vm8 = vcmp.gt.f32.partialorder %v4027_v13, 0.0  ;;  %vm7036_vm5 = vcmask 392512  }
 0xa1d   :  { %vm4057_vm7 = vcmp.gt.f32.partialorder %v4025_v48, 0.0  ;;  %v4089_v58 = vmul.f32 0.2, %v4025_v48  ;;  %v4161_v42 = vmul.f32 %v10203_v1, %v4122_v26  ;;  %v4120_v59 = vsel %vm4056_vm6, %v4024_v15, %v4088_v57 }
 0xa1e   :  { %v4159_v9 = vmul.f32 %v10203_v1, %v4120_v59  ;;  %v4123_v19 = vsel %vm4059_vm8, %v4027_v13, %v4091_v37  ;;  %vm7043_vm6 = vcmask 458112   ;;  %vm7057_vm8 = vcmask 589312  }
 0xa1f   :  { %4215 = vadd.xlane.f32.xlu0 %v4161_v42  ;;  %v4121_v60 = vsel %vm4057_vm7, %v4025_v48, %v4089_v58  ;;  %v4162_v27 = vmul.f32 %v10203_v1, %v4123_v19  ;;  %vm7050_vm7 = vcmask 523712  }
 0xa20   :  { %v4160_v23 = vmul.f32 %v10203_v1, %v4121_v60 }
 0xa22   :  { %4213 = vadd.xlane.f32.xlu1 %v4160_v23 }
 0xa23   :  { %4211 = vadd.xlane.f32.xlu0 %v4159_v9 }
 0xa27   :  { %4217 = vadd.xlane.f32.xlu0 %v4162_v27 }
 0xa3a   :  { %v8184_v6 = vpop.f32.mrb[168].mxu0 }
 0xa3b   :  { %v3982_v44 = vadd.f32 %v8184_v6, %v10191_v24  ;;  %v3973_v14 = vpop.f32.mrb[169].mxu0 }
 0xa3c   :  { %v3974_v47 = vadd.f32 %v10191_v24, %v3973_v14  ;;  %v8185_v30 = vpop.f32.mrb[170].mxu0 }
 0xa3d   :  { %v4030_v49 = vadd.f32 %v3982_v44, %v10119_v25  ;;  %v3985_v52 = vadd.f32 %v8185_v30, %v10191_v24  ;;  %v3976_v17 = vpop.f32.mrb[171].mxu0 }
 0xa3e   :  { %v4028_v36 = vadd.f32 %v3974_v47, %v10115_v61  ;;  %v3977_v50 = vadd.f32 %v10191_v24, %v3976_v17  ;;  %v5339_v61 = vunpack.c.0.s8 %v5338_v29 }
 0xa3f   :  { %vm4062_vm9 = vcmp.gt.f32.partialorder %v4030_v49, 0.0  ;;  %v4094_v25 = vmul.f32 0.2, %v4030_v49  ;;  %v4031_v41 = vadd.f32 %v3985_v52, %v10122_v43 }
 0xa40   :  { %vm4060_vm10 = vcmp.gt.f32.partialorder %v4028_v36, 0.0  ;;  %v4092_v0 = vmul.f32 0.2, %v4028_v36  ;;  %v4029_v32 = vadd.f32 %v3977_v50, %v10125_v12  ;;  %v10315_v11 = vsub.s32 %v5339_v61, %v10271_v21 }
 0xa41   :  { %vm4063_vm11 = vcmp.gt.f32.partialorder %v4031_v41, 0.0  ;;  %v4095_v33 = vmul.f32 0.2, %v4031_v41  ;;  %v4126_v54 = vsel %vm4062_vm9, %v4030_v49, %v4094_v25  ;;  %v4176_v20 = vpop.xlane.xlu0 %4175  ;;  %vm7064_vm9 = vcmask 654912  }
 0xa42   :  { %vm4061_vm12 = vcmp.gt.f32.partialorder %v4029_v32, 0.0  ;;  %v4093_v39 = vmul.f32 0.2, %v4029_v32  ;;  %v4165_v35 = vmul.f32 %v10203_v1, %v4126_v54  ;;  %v4124_v43 = vsel %vm4060_vm10, %v4028_v36, %v4092_v0  ;;  %v4172_v53 = vpop.xlane.xlu1 %4171 }
 0xa43   :  { %v4247_v10 = vadd.f32 %v10279_v56, %v4176_v20  ;;  %v4127_v62 = vsel %vm4063_vm11, %v4031_v41, %v4095_v33  ;;  %v10311_v12 = vadd.f32 %v10279_v56, %v4172_v53  ;;  %v4163_v15 = vmul.f32 %v10203_v1, %v4124_v43 }
 0xa44   :  { %4223 = vadd.xlane.f32.xlu0 %v4165_v35  ;;  %v4166_v8 = vmul.f32 %v10203_v1, %v4127_v62  ;;  %v4125_v31 = vsel %vm4061_vm12, %v4029_v32, %v4093_v39  ;;  %vm7071_vm10 = vcmask 720512   ;;  %vm7078_vm11 = vcmask 786112  }
 0xa45   :  { %v4376_v51 = vrot.slane %v4247_v10, %v10274_v4  ;;  %v4380_v13 = vrot.slane %v4247_v10, %v10284_v38  ;;  %v4384_v5 = vrot.slane %v4247_v10, %v10287_v28  ;;  %v4174_v48 = vpop.xlane.xlu0 %4173  ;;  %v4388_v57 = vrot.slane %v4247_v10, %v10292_v3 }
 0xa46   :  { %4225 = vadd.xlane.f32.xlu1 %v4166_v8  ;;  %v4392_v26 = vrot.slane %v4247_v10, %v10295_v55  ;;  %v4396_v58 = vrot.slane %v4247_v10, %v10299_v46  ;;  %v4400_v42 = vrot.slane %v4247_v10, %v10303_v40  ;;  %v4246_v37 = vadd.f32 %v10279_v56, %v4174_v48  ;;  %v4178_v59 = vpop.xlane.xlu1 %4177 }
 0xa47   :  { %v4164_v60 = vmul.f32 %v10203_v1, %v4125_v31  ;;  %v4404_v23 = vrot.slane %v4247_v10, %v10308_v63  ;;  %v5431_v9 = vcombine.low %v4376_v51, %v4380_v13  ;;  %v4248_v19 = vadd.f32 %v10279_v56, %v4178_v59 }
 0xa48   :  { %4219 = vadd.xlane.f32.xlu0 %v4163_v15  ;;  %v5432_v27 = vcombine.low %v4384_v5, %v4388_v57  ;;  %v5433_v7 = vcombine.low %v4392_v26, %v4396_v58  ;;  %v4312_v6 = vrot.slane %v10311_v12, %v10274_v4  ;;  %v4344_v47 = vrot.slane %v4246_v37, %v10274_v4 }
 0xa49   :  { %v5434_v44 = vcombine.low %v4400_v42, %v4404_v23  ;;  %v5441_v14 = vrot.slane %v5431_v9, %v10315_v11  ;;  %v4316_v30 = vrot.slane %v10311_v12, %v10284_v38  ;;  %v4408_v49 = vrot.slane %v4248_v19, %v10274_v4  ;;  %v4184_v17 = vpop.xlane.xlu0 %4183 }
 0xa4a   :  { %v5448_v2 = vrot.slane %v5432_v27, %v10315_v11  ;;  %v5455_v29 = vrot.slane %v5433_v7, %v10315_v11  ;;  %v4412_v52 = vrot.slane %v4248_v19, %v10284_v38  ;;  %v4416_v50 = vrot.slane %v4248_v19, %v10287_v28 }
 0xa4b   :  { %v5462_v36 = vrot.slane %v5434_v44, %v10315_v11  ;;  %v4420_v25 = vrot.slane %v4248_v19, %v10292_v3  ;;  %v4424_v41 = vrot.slane %v4248_v19, %v10295_v55  ;;  %v4428_v32 = vrot.slane %v4248_v19, %v10299_v46  ;;  %v4186_v54 = vpop.xlane.xlu1 %4185 }
 0xa4c   :  { %4221 = vadd.xlane.f32.xlu0 %v4164_v60  ;;  %v5463_v0 = vcombine.low %v5441_v14, %v5448_v2  ;;  %v4432_v61 = vrot.slane %v4248_v19, %v10303_v40  ;;  %v4348_v33 = vrot.slane %v4246_v37, %v10284_v38  ;;  %v4436_v20 = vrot.slane %v4248_v19, %v10308_v63 }
 0xa4d   :  { %v5464_v39 = vcombine.low %v5455_v29, %v5462_v36  ;;  %v5480_v35 = vcombine.low %v4408_v49, %v4412_v52  ;;  %v5481_v43 = vcombine.low %v4416_v50, %v4420_v25  ;;  %v4251_v10 = vadd.f32 %v10279_v56, %v4184_v17  ;;  %v4180_v31 = vpop.xlane.xlu0 %4179 }
 0xa4e   :  { %v5471_v53 = vrot.slane %v5463_v0, %v10315_v11  ;;  %v5482_v62 = vcombine.low %v4424_v41, %v4428_v32  ;;  %v4352_v8 = vrot.slane %v4246_v37, %v10287_v28  ;;  %v5483_v51 = vcombine.low %v4432_v61, %v4436_v20 }
 0xa4f   :  { %v5478_v15 = vrot.slane %v5464_v39, %v10315_v11  ;;  %v5490_v13 = vrot.slane %v5480_v35, %v10315_v11  ;;  %v5497_v5 = vrot.slane %v5481_v43, %v10315_v11  ;;  %v10354_v48 = vadd.f32 %v10279_v56, %v4186_v54  ;;  %v4182_v59 = vpop.xlane.xlu1 %4181 }
 0xa50   :  { %v5504_v57 = vrot.slane %v5482_v62, %v10315_v11  ;;  %v4356_v26 = vrot.slane %v4246_v37, %v10292_v3  ;;  %v4360_v58 = vrot.slane %v4246_v37, %v10295_v55  ;;  %v10360_v42 = vadd.f32 %v10279_v56, %v4180_v31 }
 0xa51   :  { %v5511_v60 = vrot.slane %v5483_v51, %v10315_v11  ;;  %v5512_v23 = vcombine.low %v5490_v13, %v5497_v5  ;;  %v4364_v9 = vrot.slane %v4246_v37, %v10299_v46  ;;  %v5479_v19 = vcombine.low %v5471_v53, %v5478_v15  ;;  %v4192_v2 = vpop.xlane.xlu0 %4191 }
 0xa52   :  { %v4368_v27 = vrot.slane %v4246_v37, %v10303_v40  ;;  %v4372_v7 = vrot.slane %v4246_v37, %v10308_v63  ;;  %v5382_v44 = vcombine.low %v4344_v47, %v4348_v33  ;;  %v10367_v14 = vadd.f32 %v10279_v56, %v4182_v59 }
 0xa53   :  { %v5513_v29 = vcombine.low %v5504_v57, %v5511_v60  ;;  %v5383_v49 = vcombine.low %v4352_v8, %v4356_v26  ;;  %v5384_v52 = vcombine.low %v4360_v58, %v4364_v9  ;;  %v5520_v17 = vrot.slane %v5512_v23, %v10315_v11  ;;  %v4194_v41 = vpop.xlane.xlu1 %4193 }
 0xa54   :  { %v5385_v36 = vcombine.low %v4368_v27, %v4372_v7  ;;  %v5392_v50 = vrot.slane %v5382_v44, %v10315_v11  ;;  %v4504_v25 = vrot.slane %v4251_v10, %v10274_v4  ;;  %v4508_v32 = vrot.slane %v4251_v10, %v10284_v38 }
 0xa55   :  { %v5527_v0 = vrot.slane %v5513_v29, %v10315_v11  ;;  %v5399_v37 = vrot.slane %v5383_v49, %v10315_v11  ;;  %v5406_v47 = vrot.slane %v5384_v52, %v10315_v11  ;;  %v10377_v61 = vadd.f32 %v10279_v56, %v4192_v2  ;;  %v4188_v35 = vpop.xlane.xlu0 %4187 }
 0xa56   :  { %v5413_v33 = vrot.slane %v5385_v36, %v10315_v11  ;;  %v4512_v54 = vrot.slane %v4251_v10, %v10287_v28  ;;  %v4516_v39 = vrot.slane %v4251_v10, %v10292_v3  ;;  %v10383_v20 = vadd.f32 %v10279_v56, %v4194_v41 }
 0xa57   :  { %6908 = vperm.xlu1 %8246, %v5479_v19   ;;  %v5414_v43 = vcombine.low %v5392_v50, %v5399_v37  ;;  %v4520_v53 = vrot.slane %v4251_v10, %v10295_v55  ;;  %v4524_v62 = vrot.slane %v4251_v10, %v10299_v46  ;;  %v5528_v8 = vcombine.low %v5520_v17, %v5527_v0 }
 0xa58   :  { %v5415_v31 = vcombine.low %v5406_v47, %v5413_v33  ;;  %v4528_v15 = vrot.slane %v4251_v10, %v10303_v40  ;;  %v4532_v51 = vrot.slane %v4251_v10, %v10308_v63  ;;  %v5627_v5 = vcombine.low %v4504_v25, %v4508_v32 }
 0xa59   :  { %v5422_v13 = vrot.slane %v5414_v43, %v10315_v11  ;;  %v5628_v57 = vcombine.low %v4512_v54, %v4516_v39  ;;  %v5629_v26 = vcombine.low %v4520_v53, %v4524_v62  ;;  %v10391_v58 = vadd.f32 %v10279_v56, %v4188_v35  ;;  %v4190_v54 = vpop.xlane.xlu1 %4189 }
 0xa5a   :  { %v5429_v59 = vrot.slane %v5415_v31, %v10315_v11  ;;  %v5630_v60 = vcombine.low %v4528_v15, %v4532_v51  ;;  %v4440_v23 = vrot.slane %v10360_v42, %v10274_v4  ;;  %v5637_v19 = vrot.slane %v5627_v5, %v10315_v11 }
 0xa5b   :  { %v8188_v9 = vpop.f32.mrb[172].mxu0  ;;  %6911 = vperm.xlu1 %8246, %v5528_v8   ;;  %v5644_v10 = vrot.slane %v5628_v57, %v10315_v11  ;;  %v5651_v27 = vrot.slane %v5629_v26, %v10315_v11  ;;  %v4444_v7 = vrot.slane %v10360_v42, %v10284_v38  ;;  %v4448_v52 = vrot.slane %v10360_v42, %v10287_v28 }
 0xa5c   :  { %v3998_v44 = vadd.f32 %v8188_v9, %v10191_v24  ;;  %v3989_v2 = vpop.f32.mrb[173].mxu0  ;;  %v5430_v29 = vcombine.low %v5422_v13, %v5429_v59  ;;  %v5658_v49 = vrot.slane %v5630_v60, %v10315_v11  ;;  %v4452_v25 = vrot.slane %v10360_v42, %v10292_v3 }
 0xa5d   :  { %v3990_v17 = vadd.f32 %v10191_v24, %v3989_v2  ;;  %v8189_v36 = vpop.f32.mrb[174].mxu0  ;;  %v5659_v50 = vcombine.low %v5637_v19, %v5644_v10  ;;  %v4456_v41 = vrot.slane %v10360_v42, %v10295_v55  ;;  %v4460_v33 = vrot.slane %v10360_v42, %v10299_v46 }
 0xa5e   :  { %v4034_v0 = vadd.f32 %v3998_v44, %v10139_v16  ;;  %v4001_v37 = vadd.f32 %v8189_v36, %v10191_v24  ;;  %v3992_v47 = vpop.f32.mrb[175].mxu0  ;;  %v5660_v32 = vcombine.low %v5651_v27, %v5658_v49  ;;  %v4464_v53 = vrot.slane %v10360_v42, %v10303_v40 }
 0xa5f   :  { %v4032_v39 = vadd.f32 %v3990_v17, %v10135_v18  ;;  %v3993_v35 = vadd.f32 %v10191_v24, %v3992_v47  ;;  %6905 = vperm.xlu1 %8246, %v5430_v29   ;;  %v5667_v43 = vrot.slane %v5659_v50, %v10315_v11  ;;  %v4468_v18 = vrot.slane %v10360_v42, %v10308_v63 }
 0xa60   :  { %vm4066_vm13 = vcmp.gt.f32.partialorder %v4034_v0, 0.0  ;;  %v4098_v16 = vmul.f32 0.2, %v4034_v0  ;;  %v10420_v62 = vadd.f32 %v4001_v37, %v10142_v22  ;;  %v5674_v8 = vrot.slane %v5660_v32, %v10315_v11 }
 0xa61   :  { %vm4064_vm14 = vcmp.gt.f32.partialorder %v4032_v39, 0.0  ;;  %v4096_v31 = vmul.f32 0.2, %v4032_v39  ;;  %v4033_v15 = vadd.f32 %v3993_v35, %v10145_v45  ;;  %v10427_v24 = vadd.f32 %v10279_v56, %v4190_v54 }
 0xa62   :  { %v10430_v51 = vmul.f32 0.2, %v10420_v62  ;;  %v5675_v13 = vcombine.low %v5667_v43, %v5674_v8  ;;  %v4130_v5 = vsel %vm4066_vm13, %v4034_v0, %v4098_v16  ;;  %v5529_v26 = vcombine.low %v4440_v23, %v4444_v7 }
 0xa63   :  { %vm4065_vm15 = vcmp.gt.f32.partialorder %v4033_v15, 0.0  ;;  %v4097_v22 = vmul.f32 0.2, %v4033_v15  ;;  %v4169_v57 = vmul.f32 %v10203_v1, %v4130_v5  ;;  %v5530_v59 = vcombine.low %v4448_v52, %v4452_v25 }
 0xa64   :  { %6920 = vperm.xlu1 %8246, %v5675_v13   ;;  %v5531_v60 = vcombine.low %v4456_v41, %v4460_v33  ;;  %v5532_v45 = vcombine.low %v4464_v53, %v4468_v18  ;;  %v4128_v9 = vsel %vm4064_vm14, %v4032_v39, %v4096_v31  ;;  %vm4067_vm0 = vcmp.gt.f32.partialorder %v10420_v62, 0.0 }
 0xa65   :  { %4231 = vadd.xlane.f32.xlu0 %v4169_v57  ;;  %v5539_v42 = vrot.slane %v5529_v26, %v10315_v11  ;;  %v4167_v19 = vmul.f32 %v10203_v1, %v4128_v9  ;;  %v4536_v10 = vrot.slane %v10354_v48, %v10274_v4  ;;  %v4540_v27 = vrot.slane %v10354_v48, %v10284_v38 }
 0xa66   :  { %v4200_v23 = vpop.xlane.xlu0 %4199  ;;  %v5546_v7 = vrot.slane %v5530_v59, %v10315_v11  ;;  %v5553_v44 = vrot.slane %v5531_v60, %v10315_v11  ;;  %v5560_v2 = vrot.slane %v5532_v45, %v10315_v11  ;;  %v4544_v29 = vrot.slane %v10354_v48, %v10287_v28 }
 0xa67   :  { %v10447_v49 = vadd.f32 %v10279_v56, %v4200_v23  ;;  %v4548_v52 = vrot.slane %v10354_v48, %v10292_v3  ;;  %v4552_v17 = vrot.slane %v10354_v48, %v10295_v55  ;;  %v4556_v36 = vrot.slane %v10354_v48, %v10299_v46 }
 0xa68   :  { %v5561_v50 = vcombine.low %v5539_v42, %v5546_v7  ;;  %v5562_v25 = vcombine.low %v5553_v44, %v5560_v2  ;;  %v4202_v41 = vpop.xlane.xlu1 %4201  ;;  %v4560_v0 = vrot.slane %v10354_v48, %v10303_v40  ;;  %v4564_v37 = vrot.slane %v10354_v48, %v10308_v63 }
 0xa69   :  { %v10460_v47 = vadd.f32 %v10279_v56, %v4202_v41  ;;  %4227 = vadd.xlane.f32.xlu0 %v4167_v19  ;;  %v5676_v32 = vcombine.low %v4536_v10, %v4540_v27  ;;  %v5677_v33 = vcombine.low %v4544_v29, %v4548_v52  ;;  %v5678_v54 = vcombine.low %v4552_v17, %v4556_v36 }
 0xa6a   :  { %v5569_v39 = vrot.slane %v5561_v50, %v10315_v11  ;;  %v5576_v35 = vrot.slane %v5562_v25, %v10315_v11  ;;  %v4196_v43 = vpop.xlane.xlu0 %4195  ;;  %v5679_v53 = vcombine.low %v4560_v0, %v4564_v37  ;;  %v4129_v16 = vsel %vm4065_vm15, %v4033_v15, %v4097_v22 }
 0xa6b   :  { %v10466_v8 = vadd.f32 %v10279_v56, %v4196_v43  ;;  %v5686_v48 = vrot.slane %v5676_v32, %v10315_v11  ;;  %v5693_v31 = vrot.slane %v5677_v33, %v10315_v11  ;;  %v5700_v18 = vrot.slane %v5678_v54, %v10315_v11 }
 0xa6c   :  { %v5577_v13 = vcombine.low %v5569_v39, %v5576_v35  ;;  %v5707_v5 = vrot.slane %v5679_v53, %v10315_v11  ;;  %v4198_v57 = vpop.xlane.xlu1 %4197  ;;  %v4168_v26 = vmul.f32 %v10203_v1, %v4129_v16  ;;  %v4472_v59 = vrot.slane %v10367_v14, %v10274_v4 }
 0xa6d   :  { %v5708_v60 = vcombine.low %v5686_v48, %v5693_v31  ;;  %v10476_v15 = vadd.f32 %v10279_v56, %v4198_v57  ;;  %v4476_v22 = vrot.slane %v10367_v14, %v10284_v38  ;;  %v4480_v45 = vrot.slane %v10367_v14, %v10287_v28 }
 0xa6e   :  { %6914 = vperm.xlu1 %8246, %v5577_v13   ;;  %v5709_v9 = vcombine.low %v5700_v18, %v5707_v5  ;;  %4229 = vadd.xlane.f32.xlu0 %v4168_v26  ;;  %v4484_v42 = vrot.slane %v10367_v14, %v10292_v3  ;;  %v4488_v19 = vrot.slane %v10367_v14, %v10295_v55  ;;  %vm7085_vm12 = vcmask 851712  }
 0xa6f   :  { %v5716_v10 = vrot.slane %v5708_v60, %v10315_v11  ;;  %v4492_v27 = vrot.slane %v10367_v14, %v10299_v46  ;;  %v4496_v23 = vrot.slane %v10367_v14, %v10303_v40  ;;  %v4500_v7 = vrot.slane %v10367_v14, %v10308_v63 }
 0xa70   :  { %v5723_v44 = vrot.slane %v5709_v9, %v10315_v11  ;;  %v5578_v2 = vcombine.low %v4472_v59, %v4476_v22  ;;  %v5579_v29 = vcombine.low %v4480_v45, %v4484_v42  ;;  %v4131_v52 = vsel %vm4067_vm0, %v10420_v62, %v10430_v51 }
 0xa71   :  { %v5580_v17 = vcombine.low %v4488_v19, %v4492_v27  ;;  %v5581_v36 = vcombine.low %v4496_v23, %v4500_v7  ;;  %v4170_v50 = vmul.f32 %v10203_v1, %v4131_v52  ;;  %v4632_v25 = vrot.slane %v10377_v61, %v10274_v4 }
 0xa72   :  { %v5724_v41 = vcombine.low %v5716_v10, %v5723_v44  ;;  %v5588_v0 = vrot.slane %v5578_v2, %v10315_v11  ;;  %v5595_v14 = vrot.slane %v5579_v29, %v10315_v11  ;;  %v4636_v37 = vrot.slane %v10377_v61, %v10284_v38 }
 0xa73   :  { %v5602_v32 = vrot.slane %v5580_v17, %v10315_v11  ;;  %v5609_v33 = vrot.slane %v5581_v36, %v10315_v11  ;;  %4233 = vadd.xlane.f32.xlu0 %v4170_v50  ;;  %v4640_v62 = vrot.slane %v10377_v61, %v10287_v28  ;;  %v4644_v1 = vrot.slane %v10377_v61, %v10292_v3 }
 0xa74   :  { %6923 = vperm.xlu1 %8246, %v5724_v41   ;;  %v5610_v51 = vcombine.low %v5588_v0, %v5595_v14  ;;  %v4648_v54 = vrot.slane %v10377_v61, %v10295_v55  ;;  %v4652_v39 = vrot.slane %v10377_v61, %v10299_v46  ;;  %v4656_v35 = vrot.slane %v10377_v61, %v10303_v40 }
 0xa75   :  { %v5611_v43 = vcombine.low %v5602_v32, %v5609_v33  ;;  %v4660_v53 = vrot.slane %v10377_v61, %v10308_v63  ;;  %v5823_v16 = vcombine.low %v4632_v25, %v4636_v37  ;;  %v5824_v48 = vcombine.low %v4640_v62, %v4644_v1 }
 0xa76   :  { %v5618_v31 = vrot.slane %v5610_v51, %v10315_v11  ;;  %v5825_v18 = vcombine.low %v4648_v54, %v4652_v39  ;;  %v4568_v13 = vrot.slane %v10391_v58, %v10274_v4  ;;  %v4572_v5 = vrot.slane %v10391_v58, %v10284_v38 }
 0xa77   :  { %v5625_v57 = vrot.slane %v5611_v43, %v10315_v11  ;;  %v5826_v26 = vcombine.low %v4656_v35, %v4660_v53  ;;  %v5833_v59 = vrot.slane %v5823_v16, %v10315_v11  ;;  %v5840_v60 = vrot.slane %v5824_v48, %v10315_v11 }
 0xa78   :  { %v5847_v61 = vrot.slane %v5825_v18, %v10315_v11  ;;  %v4576_v22 = vrot.slane %v10391_v58, %v10287_v28  ;;  %v4580_v45 = vrot.slane %v10391_v58, %v10292_v3  ;;  %v4584_v9 = vrot.slane %v10391_v58, %v10295_v55 }
 0xa79   :  { %v5626_v42 = vcombine.low %v5618_v31, %v5625_v57  ;;  %v5854_v19 = vrot.slane %v5826_v26, %v10315_v11  ;;  %v5855_v10 = vcombine.low %v5833_v59, %v5840_v60  ;;  %v4588_v27 = vrot.slane %v10391_v58, %v10299_v46 }
 0xa7a   :  { %v4592_v23 = vrot.slane %v10391_v58, %v10303_v40  ;;  %v4596_v7 = vrot.slane %v10391_v58, %v10308_v63  ;;  %v5725_v44 = vcombine.low %v4568_v13, %v4572_v5  ;;  %v5726_v2 = vcombine.low %v4576_v22, %v4580_v45 }
 0xa7b   :  { %6917 = vperm.xlu1 %8246, %v5626_v42   ;;  %v5856_v29 = vcombine.low %v5847_v61, %v5854_v19  ;;  %v5863_v52 = vrot.slane %v5855_v10, %v10315_v11  ;;  %v5727_v17 = vcombine.low %v4584_v9, %v4588_v27  ;;  %v4664_v36 = vrot.slane %v10383_v20, %v10274_v4 }
 0xa7c   :  { %v5728_v50 = vcombine.low %v4592_v23, %v4596_v7  ;;  %v5735_v25 = vrot.slane %v5725_v44, %v10315_v11  ;;  %v5742_v41 = vrot.slane %v5726_v2, %v10315_v11  ;;  %v4668_v0 = vrot.slane %v10383_v20, %v10284_v38 }
 0xa7d   :  { %v5870_v58 = vrot.slane %v5856_v29, %v10315_v11  ;;  %v5749_v14 = vrot.slane %v5727_v17, %v10315_v11  ;;  %v4672_v37 = vrot.slane %v10383_v20, %v10287_v28  ;;  %v4676_v32 = vrot.slane %v10383_v20, %v10292_v3 }
 0xa7e   :  { %v5756_v33 = vrot.slane %v5728_v50, %v10315_v11  ;;  %v5757_v62 = vcombine.low %v5735_v25, %v5742_v41  ;;  %v4680_v1 = vrot.slane %v10383_v20, %v10295_v55  ;;  %v4684_v51 = vrot.slane %v10383_v20, %v10299_v46 }
 0xa7f   :  { %v5871_v54 = vcombine.low %v5863_v52, %v5870_v58  ;;  %v4688_v39 = vrot.slane %v10383_v20, %v10303_v40  ;;  %v4692_v35 = vrot.slane %v10383_v20, %v10308_v63  ;;  %v5872_v43 = vcombine.low %v4664_v36, %v4668_v0 }
 0xa80   :  { %v5758_v53 = vcombine.low %v5749_v14, %v5756_v33  ;;  %v5765_v16 = vrot.slane %v5757_v62, %v10315_v11  ;;  %v5873_v48 = vcombine.low %v4672_v37, %v4676_v32  ;;  %v5874_v31 = vcombine.low %v4680_v1, %v4684_v51 }
 0xa81   :  { %6932 = vperm.xlu1 %8246, %v5871_v54   ;;  %v5875_v18 = vcombine.low %v4688_v39, %v4692_v35  ;;  %v5882_v13 = vrot.slane %v5872_v43, %v10315_v11  ;;  %v4600_v5 = vrot.slane %v10427_v24, %v10274_v4  ;;  %v4604_v57 = vrot.slane %v10427_v24, %v10284_v38 }
 0xa82   :  { %v5772_v26 = vrot.slane %v5758_v53, %v10315_v11  ;;  %v5889_v20 = vrot.slane %v5873_v48, %v10315_v11  ;;  %v5896_v59 = vrot.slane %v5874_v31, %v10315_v11  ;;  %v4608_v60 = vrot.slane %v10427_v24, %v10287_v28 }
 0xa83   :  { %v5903_v61 = vrot.slane %v5875_v18, %v10315_v11  ;;  %v4612_v22 = vrot.slane %v10427_v24, %v10292_v3  ;;  %v4616_v45 = vrot.slane %v10427_v24, %v10295_v55  ;;  %v4620_v9 = vrot.slane %v10427_v24, %v10299_v46 }
 0xa84   :  { %v5773_v42 = vcombine.low %v5765_v16, %v5772_v26  ;;  %v5904_v19 = vcombine.low %v5882_v13, %v5889_v20  ;;  %v4624_v10 = vrot.slane %v10427_v24, %v10303_v40  ;;  %v4628_v27 = vrot.slane %v10427_v24, %v10308_v63 }
 0xa85   :  { %v5905_v23 = vcombine.low %v5896_v59, %v5903_v61  ;;  %v5774_v7 = vcombine.low %v4600_v5, %v4604_v57  ;;  %v5775_v44 = vcombine.low %v4608_v60, %v4612_v22  ;;  %v5776_v2 = vcombine.low %v4616_v45, %v4620_v9 }
 0xa86   :  { %6926 = vperm.xlu1 %8246, %v5773_v42   ;;  %v5912_v29 = vrot.slane %v5904_v19, %v10315_v11  ;;  %v5777_v52 = vcombine.low %v4624_v10, %v4628_v27  ;;  %v4320_v17 = vrot.slane %v10311_v12, %v10287_v28  ;;  %v4324_v36 = vrot.slane %v10311_v12, %v10292_v3 }
 0xa87   :  { %v5919_v50 = vrot.slane %v5905_v23, %v10315_v11  ;;  %v5784_v25 = vrot.slane %v5774_v7, %v10315_v11  ;;  %v5791_v24 = vrot.slane %v5775_v44, %v10315_v11  ;;  %v5798_v41 = vrot.slane %v5776_v2, %v10315_v11 }
 0xa88   :  { %v5805_v0 = vrot.slane %v5777_v52, %v10315_v11  ;;  %v4328_v58 = vrot.slane %v10311_v12, %v10295_v55  ;;  %v4332_v14 = vrot.slane %v10311_v12, %v10299_v46  ;;  %v4336_v37 = vrot.slane %v10311_v12, %v10303_v40 }
 0xa89   :  { %v5920_v32 = vcombine.low %v5912_v29, %v5919_v50  ;;  %v5806_v33 = vcombine.low %v5784_v25, %v5791_v24  ;;  %v4340_v62 = vrot.slane %v10311_v12, %v10308_v63  ;;  %v5333_v1 = vcombine.low %v4312_v6, %v4316_v30 }
 0xa8a   :  { %v5807_v51 = vcombine.low %v5798_v41, %v5805_v0  ;;  %v5334_v54 = vcombine.low %v4320_v17, %v4324_v36  ;;  %v5335_v39 = vcombine.low %v4328_v58, %v4332_v14  ;;  %v4696_v35 = vrot.slane %v10466_v8, %v10274_v4 }
 0xa8b   :  { %6935 = vperm.xlu1 %8246, %v5920_v32   ;;  %v5814_v43 = vrot.slane %v5806_v33, %v10315_v11  ;;  %v5336_v53 = vcombine.low %v4336_v37, %v4340_v62  ;;  %v5343_v16 = vrot.slane %v5333_v1, %v10315_v11  ;;  %v4208_v48 = vpop.xlane.xlu0 %4207  ;;  %v4700_v31 = vrot.slane %v10466_v8, %v10284_v38 }
 0xa8c   :  { %v5821_v18 = vrot.slane %v5807_v51, %v10315_v11  ;;  %v5350_v12 = vrot.slane %v5334_v54, %v10315_v11  ;;  %v5357_v6 = vrot.slane %v5335_v39, %v10315_v11  ;;  %v4263_v30 = vadd.f32 %v10279_v56, %v4208_v48 }
 0xa8d   :  { %v5364_v13 = vrot.slane %v5336_v53, %v10315_v11  ;;  %v4210_v5 = vpop.xlane.xlu1 %4209  ;;  %v4704_v57 = vrot.slane %v10466_v8, %v10287_v28  ;;  %v4708_v26 = vrot.slane %v10466_v8, %v10292_v3  ;;  %v4712_v20 = vrot.slane %v10466_v8, %v10295_v55 }
 0xa8e   :  { %v5822_v59 = vcombine.low %v5814_v43, %v5821_v18  ;;  %v5365_v60 = vcombine.low %v5343_v16, %v5350_v12  ;;  %v10627_v61 = vadd.f32 %v10279_v56, %v4210_v5  ;;  %v4888_v22 = vrot.slane %v4263_v30, %v10274_v4 }
 0xa8f   :  { %v5366_v45 = vcombine.low %v5357_v6, %v5364_v13  ;;  %v4204_v9 = vpop.xlane.xlu0 %4203  ;;  %v4892_v42 = vrot.slane %v4263_v30, %v10284_v38  ;;  %v4896_v19 = vrot.slane %v4263_v30, %v10287_v28  ;;  %v4900_v10 = vrot.slane %v4263_v30, %v10292_v3 }
 0xa90   :  { %6929 = vperm.xlu1 %8246, %v5822_v59   ;;  %v5373_v27 = vrot.slane %v5365_v60, %v10315_v11  ;;  %v4261_v23 = vadd.f32 %v10279_v56, %v4204_v9  ;;  %v4904_v7 = vrot.slane %v4263_v30, %v10295_v55  ;;  %v4908_v44 = vrot.slane %v4263_v30, %v10299_v46 }
 0xa91   :  { %v5380_v2 = vrot.slane %v5366_v45, %v10315_v11  ;;  %v4206_v29 = vpop.xlane.xlu1 %4205  ;;  %v4912_v52 = vrot.slane %v4263_v30, %v10303_v40  ;;  %v4916_v17 = vrot.slane %v4263_v30, %v10308_v63  ;;  %v6215_v36 = vcombine.low %v4888_v22, %v4892_v42 }
 0xa92   :  { %v10641_v50 = vadd.f32 %v10279_v56, %v4206_v29  ;;  %v6216_v25 = vcombine.low %v4896_v19, %v4900_v10  ;;  %v6217_v24 = vcombine.low %v4904_v7, %v4908_v44  ;;  %v4824_v41 = vrot.slane %v4261_v23, %v10274_v4 }
 0xa93   :  { %v5381_v0 = vcombine.low %v5373_v27, %v5380_v2  ;;  %v6218_v58 = vcombine.low %v4912_v52, %v4916_v17  ;;  %v6225_v14 = vrot.slane %v6215_v36, %v10315_v11  ;;  %v4828_v37 = vrot.slane %v4261_v23, %v10284_v38 }
 0xa94   :  { %v6232_v32 = vrot.slane %v6216_v25, %v10315_v11  ;;  %v6239_v33 = vrot.slane %v6217_v24, %v10315_v11  ;;  %v4832_v62 = vrot.slane %v4261_v23, %v10287_v28  ;;  %v4836_v1 = vrot.slane %v4261_v23, %v10292_v3 }
 0xa95   :  { %6902 = vperm.xlu0 %8247, %v5381_v0   ;;  %v6246_v51 = vrot.slane %v6218_v58, %v10315_v11  ;;  %v4840_v54 = vrot.slane %v4261_v23, %v10295_v55  ;;  %v4844_v39 = vrot.slane %v4261_v23, %v10299_v46  ;;  %v4848_v43 = vrot.slane %v4261_v23, %v10303_v40 }
 0xa96   :  { %v6247_v53 = vcombine.low %v6225_v14, %v6232_v32  ;;  %v4852_v16 = vrot.slane %v4261_v23, %v10308_v63  ;;  %v6117_v48 = vcombine.low %v4824_v41, %v4828_v37  ;;  %v6118_v18 = vcombine.low %v4832_v62, %v4836_v1 }
 0xa97   :  { %v6248_v12 = vcombine.low %v6239_v33, %v6246_v51  ;;  %v6119_v6 = vcombine.low %v4840_v54, %v4844_v39  ;;  %v4920_v30 = vrot.slane %v10627_v61, %v10274_v4  ;;  %v4924_v13 = vrot.slane %v10627_v61, %v10284_v38 }
 0xa98   :  { %v6255_v5 = vrot.slane %v6247_v53, %v10315_v11  ;;  %v6120_v59 = vcombine.low %v4848_v43, %v4852_v16  ;;  %v6127_v60 = vrot.slane %v6117_v48, %v10315_v11  ;;  %v6134_v22 = vrot.slane %v6118_v18, %v10315_v11 }
 0xa99   :  { %v6262_v45 = vrot.slane %v6248_v12, %v10315_v11  ;;  %v6141_v9 = vrot.slane %v6119_v6, %v10315_v11  ;;  %v4928_v42 = vrot.slane %v10627_v61, %v10287_v28  ;;  %v4932_v19 = vrot.slane %v10627_v61, %v10292_v3 }
 0xa9a   :  { %v6148_v10 = vrot.slane %v6120_v59, %v10315_v11  ;;  %v6149_v27 = vcombine.low %v6127_v60, %v6134_v22  ;;  %v4936_v23 = vrot.slane %v10627_v61, %v10295_v55  ;;  %v4940_v7 = vrot.slane %v10627_v61, %v10299_v46 }
 0xa9b   :  { %v6263_v44 = vcombine.low %v6255_v5, %v6262_v45  ;;  %v4944_v2 = vrot.slane %v10627_v61, %v10303_v40  ;;  %v4948_v29 = vrot.slane %v10627_v61, %v10308_v63  ;;  %v6264_v52 = vcombine.low %v4920_v30, %v4924_v13 }
 0xa9c   :  { %v6150_v17 = vcombine.low %v6141_v9, %v6148_v10  ;;  %v6157_v36 = vrot.slane %v6149_v27, %v10315_v11  ;;  %v6265_v25 = vcombine.low %v4928_v42, %v4932_v19  ;;  %v6266_v24 = vcombine.low %v4936_v23, %v4940_v7 }
 0xa9d   :  { %6956 = vperm.xlu0 %8247, %v6263_v44   ;;  %v6267_v41 = vcombine.low %v4944_v2, %v4948_v29  ;;  %v6274_v0 = vrot.slane %v6264_v52, %v10315_v11  ;;  %v4856_v58 = vrot.slane %v10641_v50, %v10274_v4  ;;  %v4860_v14 = vrot.slane %v10641_v50, %v10284_v38 }
 0xa9e   :  { %v6164_v37 = vrot.slane %v6150_v17, %v10315_v11  ;;  %v6281_v61 = vrot.slane %v6265_v25, %v10315_v11  ;;  %v6288_v32 = vrot.slane %v6266_v24, %v10315_v11  ;;  %v4864_v33 = vrot.slane %v10641_v50, %v10287_v28 }
 0xa9f   :  { %v6295_v62 = vrot.slane %v6267_v41, %v10315_v11  ;;  %v4868_v1 = vrot.slane %v10641_v50, %v10292_v3  ;;  %v4872_v51 = vrot.slane %v10641_v50, %v10295_v55  ;;  %v4876_v54 = vrot.slane %v10641_v50, %v10299_v46 }
 0xaa0   :  { %v6165_v39 = vcombine.low %v6157_v36, %v6164_v37  ;;  %v6296_v43 = vcombine.low %v6274_v0, %v6281_v61  ;;  %v4880_v53 = vrot.slane %v10641_v50, %v10303_v40  ;;  %v4884_v16 = vrot.slane %v10641_v50, %v10308_v63 }
 0xaa1   :  { %v6297_v48 = vcombine.low %v6288_v32, %v6295_v62  ;;  %v6166_v18 = vcombine.low %v4856_v58, %v4860_v14  ;;  %v6167_v12 = vcombine.low %v4864_v33, %v4868_v1  ;;  %v6168_v6 = vcombine.low %v4872_v51, %v4876_v54 }
 0xaa2   :  { %6950 = vperm.xlu1 %8246, %v6165_v39   ;;  %v6304_v30 = vrot.slane %v6296_v43, %v10315_v11  ;;  %v6169_v13 = vcombine.low %v4880_v53, %v4884_v16  ;;  %v4716_v5 = vrot.slane %v10466_v8, %v10299_v46  ;;  %v4720_v59 = vrot.slane %v10466_v8, %v10303_v40 }
 0xaa3   :  { %v6311_v60 = vrot.slane %v6297_v48, %v10315_v11  ;;  %v6176_v22 = vrot.slane %v6166_v18, %v10315_v11  ;;  %v6183_v50 = vrot.slane %v6167_v12, %v10315_v11  ;;  %v6190_v45 = vrot.slane %v6168_v6, %v10315_v11 }
 0xaa4   :  { %v6197_v9 = vrot.slane %v6169_v13, %v10315_v11  ;;  %v4724_v42 = vrot.slane %v10466_v8, %v10308_v63  ;;  %v5921_v19 = vcombine.low %v4696_v35, %v4700_v31  ;;  %v5922_v10 = vcombine.low %v4704_v57, %v4708_v26 }
 0xaa5   :  { %v6312_v27 = vcombine.low %v6304_v30, %v6311_v60  ;;  %v6198_v23 = vcombine.low %v6176_v22, %v6183_v50  ;;  %v5923_v7 = vcombine.low %v4712_v20, %v4716_v5  ;;  %v4728_v44 = vrot.slane %v10476_v15, %v10274_v4 }
 0xaa6   :  { %v6199_v2 = vcombine.low %v6190_v45, %v6197_v9  ;;  %v5924_v29 = vcombine.low %v4720_v59, %v4724_v42  ;;  %v5931_v35 = vrot.slane %v5921_v19, %v10315_v11  ;;  %v5938_v31 = vrot.slane %v5922_v10, %v10315_v11 }
 0xaa7   :  { %6959 = vperm.xlu0 %8247, %v6312_v27   ;;  %v6206_v52 = vrot.slane %v6198_v23, %v10315_v11  ;;  %v5945_v57 = vrot.slane %v5923_v7, %v10315_v11  ;;  %v4732_v26 = vrot.slane %v10476_v15, %v10284_v38  ;;  %v4736_v8 = vrot.slane %v10476_v15, %v10287_v28 }
 0xaa8   :  { %v6213_v20 = vrot.slane %v6199_v2, %v10315_v11  ;;  %v5952_v17 = vrot.slane %v5924_v29, %v10315_v11  ;;  %v5953_v36 = vcombine.low %v5931_v35, %v5938_v31  ;;  %v4740_v25 = vrot.slane %v10476_v15, %v10292_v3 }
 0xaa9   :  { %v4744_v24 = vrot.slane %v10476_v15, %v10295_v55  ;;  %v4748_v41 = vrot.slane %v10476_v15, %v10299_v46  ;;  %v4752_v0 = vrot.slane %v10476_v15, %v10303_v40  ;;  %v4756_v58 = vrot.slane %v10476_v15, %v10308_v63 }
 0xaaa   :  { %v6214_v14 = vcombine.low %v6206_v52, %v6213_v20  ;;  %v5954_v37 = vcombine.low %v5945_v57, %v5952_v17  ;;  %v5961_v61 = vrot.slane %v5953_v36, %v10315_v11  ;;  %v5970_v32 = vcombine.low %v4728_v44, %v4732_v26 }
 0xaab   :  { %v5971_v33 = vcombine.low %v4736_v8, %v4740_v25  ;;  %v5972_v62 = vcombine.low %v4744_v24, %v4748_v41  ;;  %v5973_v1 = vcombine.low %v4752_v0, %v4756_v58  ;;  %v4760_v51 = vrot.slane %v10447_v49, %v10274_v4 }
 0xaac   :  { %6953 = vperm.xlu1 %8246, %v6214_v14   ;;  %v5968_v54 = vrot.slane %v5954_v37, %v10315_v11  ;;  %v5980_v39 = vrot.slane %v5970_v32, %v10315_v11  ;;  %v4216_v43 = vpop.xlane.xlu0 %4215  ;;  %v4764_v15 = vrot.slane %v10447_v49, %v10284_v38  ;;  %v4768_v53 = vrot.slane %v10447_v49, %v10287_v28 }
 0xaad   :  { %v5987_v16 = vrot.slane %v5971_v33, %v10315_v11  ;;  %v5994_v48 = vrot.slane %v5972_v62, %v10315_v11  ;;  %v6001_v18 = vrot.slane %v5973_v1, %v10315_v11  ;;  %v10761_v12 = vadd.f32 %v10279_v56, %v4216_v43 }
 0xaae   :  { %v5969_v6 = vcombine.low %v5961_v61, %v5968_v54  ;;  %v4772_v30 = vrot.slane %v10447_v49, %v10292_v3  ;;  %v4776_v13 = vrot.slane %v10447_v49, %v10295_v55  ;;  %v4780_v5 = vrot.slane %v10447_v49, %v10299_v46 }
 0xaaf   :  { %v6002_v59 = vcombine.low %v5980_v39, %v5987_v16  ;;  %v6003_v60 = vcombine.low %v5994_v48, %v6001_v18  ;;  %v4784_v22 = vrot.slane %v10447_v49, %v10303_v40  ;;  %v4788_v50 = vrot.slane %v10447_v49, %v10308_v63  ;;  %v4214_v45 = vpop.xlane.xlu1 %4213 }
 0xab0   :  { %6938 = vperm.xlu1 %8246, %v5969_v6   ;;  %v6019_v9 = vcombine.low %v4760_v51, %v4764_v15  ;;  %v6020_v42 = vcombine.low %v4768_v53, %v4772_v30  ;;  %v6021_v19 = vcombine.low %v4776_v13, %v4780_v5  ;;  %v10774_v10 = vadd.f32 %v10279_v56, %v4214_v45  ;;  %v4212_v27 = vpop.xlane.xlu0 %4211 }
 0xab1   :  { %v6010_v23 = vrot.slane %v6002_v59, %v10315_v11  ;;  %v6017_v7 = vrot.slane %v6003_v60, %v10315_v11  ;;  %v6022_v44 = vcombine.low %v4784_v22, %v4788_v50  ;;  %v10779_v2 = vadd.f32 %v10279_v56, %v4212_v27 }
 0xab2   :  { %v6029_v29 = vrot.slane %v6019_v9, %v10315_v11  ;;  %v6036_v49 = vrot.slane %v6020_v42, %v10315_v11  ;;  %v6043_v35 = vrot.slane %v6021_v19, %v10315_v11  ;;  %v4792_v31 = vrot.slane %v10460_v47, %v10274_v4 }
 0xab3   :  { %v6018_v52 = vcombine.low %v6010_v23, %v6017_v7  ;;  %v6050_v57 = vrot.slane %v6022_v44, %v10315_v11  ;;  %v4796_v26 = vrot.slane %v10460_v47, %v10284_v38  ;;  %v4800_v8 = vrot.slane %v10460_v47, %v10287_v28 }
 0xab4   :  { %v6051_v20 = vcombine.low %v6029_v29, %v6036_v49  ;;  %v4804_v17 = vrot.slane %v10460_v47, %v10292_v3  ;;  %v4808_v36 = vrot.slane %v10460_v47, %v10295_v55  ;;  %v4812_v25 = vrot.slane %v10460_v47, %v10299_v46  ;;  %v4218_v24 = vpop.xlane.xlu0 %4217 }
 0xab5   :  { %6941 = vperm.xlu1 %8246, %v6018_v52   ;;  %v6052_v41 = vcombine.low %v6043_v35, %v6050_v57  ;;  %v4816_v0 = vrot.slane %v10460_v47, %v10303_v40  ;;  %v4820_v58 = vrot.slane %v10460_v47, %v10308_v63  ;;  %v6068_v14 = vcombine.low %v4792_v31, %v4796_v26 }
 0xab6   :  { %v6059_v37 = vrot.slane %v6051_v20, %v10315_v11  ;;  %v6069_v61 = vcombine.low %v4800_v8, %v4804_v17  ;;  %v6070_v32 = vcombine.low %v4808_v36, %v4812_v25  ;;  %v10803_v33 = vadd.f32 %v10279_v56, %v4218_v24 }
 0xab7   :  { %v6066_v62 = vrot.slane %v6052_v41, %v10315_v11  ;;  %v6071_v1 = vcombine.low %v4816_v0, %v4820_v58  ;;  %v6078_v51 = vrot.slane %v6068_v14, %v10315_v11  ;;  %v5016_v54 = vrot.slane %v10761_v12, %v10274_v4 }
 0xab8   :  { %v6085_v39 = vrot.slane %v6069_v61, %v10315_v11  ;;  %v6092_v47 = vrot.slane %v6070_v32, %v10315_v11  ;;  %v5020_v43 = vrot.slane %v10761_v12, %v10284_v38  ;;  %v5024_v15 = vrot.slane %v10761_v12, %v10287_v28 }
 0xab9   :  { %v6067_v53 = vcombine.low %v6059_v37, %v6066_v62  ;;  %v6099_v16 = vrot.slane %v6071_v1, %v10315_v11  ;;  %v5028_v48 = vrot.slane %v10761_v12, %v10292_v3  ;;  %v5032_v18 = vrot.slane %v10761_v12, %v10295_v55 }
 0xaba   :  { %v6100_v6 = vcombine.low %v6078_v51, %v6085_v39  ;;  %v5036_v30 = vrot.slane %v10761_v12, %v10299_v46  ;;  %v5040_v13 = vrot.slane %v10761_v12, %v10303_v40  ;;  %v5044_v5 = vrot.slane %v10761_v12, %v10308_v63 }
 0xabb   :  { %6944 = vperm.xlu1 %8246, %v6067_v53   ;;  %v6101_v59 = vcombine.low %v6092_v47, %v6099_v16  ;;  %v6411_v60 = vcombine.low %v5016_v54, %v5020_v43  ;;  %v6412_v22 = vcombine.low %v5024_v15, %v5028_v48  ;;  %v4952_v50 = vrot.slane %v10779_v2, %v10274_v4 }
 0xabc   :  { %v6108_v45 = vrot.slane %v6100_v6, %v10315_v11  ;;  %v6413_v9 = vcombine.low %v5032_v18, %v5036_v30  ;;  %v6414_v42 = vcombine.low %v5040_v13, %v5044_v5  ;;  %v4956_v19 = vrot.slane %v10779_v2, %v10284_v38 }
 0xabd   :  { %v6115_v27 = vrot.slane %v6101_v59, %v10315_v11  ;;  %v6421_v23 = vrot.slane %v6411_v60, %v10315_v11  ;;  %v6428_v12 = vrot.slane %v6412_v22, %v10315_v11  ;;  %v4960_v7 = vrot.slane %v10779_v2, %v10287_v28 }
 0xabe   :  { %v6435_v44 = vrot.slane %v6413_v9, %v10315_v11  ;;  %v6442_v29 = vrot.slane %v6414_v42, %v10315_v11  ;;  %v4964_v49 = vrot.slane %v10779_v2, %v10292_v3  ;;  %v4968_v35 = vrot.slane %v10779_v2, %v10295_v55 }
 0xabf   :  { %v6116_v31 = vcombine.low %v6108_v45, %v6115_v27  ;;  %v6443_v52 = vcombine.low %v6421_v23, %v6428_v12  ;;  %v4972_v57 = vrot.slane %v10779_v2, %v10299_v46  ;;  %v4976_v26 = vrot.slane %v10779_v2, %v10303_v40 }
 0xac0   :  { %v6444_v8 = vcombine.low %v6435_v44, %v6442_v29  ;;  %v4980_v20 = vrot.slane %v10779_v2, %v10308_v63  ;;  %v6313_v17 = vcombine.low %v4952_v50, %v4956_v19  ;;  %v6314_v36 = vcombine.low %v4960_v7, %v4964_v49 }
 0xac1   :  { %6947 = vperm.xlu1 %8246, %v6116_v31   ;;  %v6451_v25 = vrot.slane %v6443_v52, %v10315_v11  ;;  %v6315_v24 = vcombine.low %v4968_v35, %v4972_v57  ;;  %v5048_v41 = vrot.slane %v10803_v33, %v10274_v4  ;;  %v5052_v0 = vrot.slane %v10803_v33, %v10284_v38 }
 0xac2   :  { %v6458_v58 = vrot.slane %v6444_v8, %v10315_v11  ;;  %v6316_v14 = vcombine.low %v4976_v26, %v4980_v20  ;;  %v6323_v37 = vrot.slane %v6313_v17, %v10315_v11  ;;  %v6330_v61 = vrot.slane %v6314_v36, %v10315_v11 }
 0xac3   :  { %v6337_v2 = vrot.slane %v6315_v24, %v10315_v11  ;;  %v5056_v32 = vrot.slane %v10803_v33, %v10287_v28  ;;  %v5060_v62 = vrot.slane %v10803_v33, %v10292_v3  ;;  %v5064_v1 = vrot.slane %v10803_v33, %v10295_v55 }
 0xac4   :  { %v6459_v51 = vcombine.low %v6451_v25, %v6458_v58  ;;  %v6344_v54 = vrot.slane %v6316_v14, %v10315_v11  ;;  %v6345_v39 = vcombine.low %v6323_v37, %v6330_v61  ;;  %v5068_v47 = vrot.slane %v10803_v33, %v10299_v46 }
 0xac5   :  { %v5072_v43 = vrot.slane %v10803_v33, %v10303_v40  ;;  %v5076_v15 = vrot.slane %v10803_v33, %v10308_v63  ;;  %v6460_v53 = vcombine.low %v5048_v41, %v5052_v0  ;;  %v6461_v16 = vcombine.low %v5056_v32, %v5060_v62 }
 0xac6   :  { %6968 = vperm.xlu0 %8247, %v6459_v51   ;;  %v6346_v48 = vcombine.low %v6337_v2, %v6344_v54  ;;  %v6353_v18 = vrot.slane %v6345_v39, %v10315_v11  ;;  %v6462_v6 = vcombine.low %v5064_v1, %v5068_v47  ;;  %v4984_v30 = vrot.slane %v10774_v10, %v10274_v4 }
 0xac7   :  { %v6463_v13 = vcombine.low %v5072_v43, %v5076_v15  ;;  %v6470_v5 = vrot.slane %v6460_v53, %v10315_v11  ;;  %v6477_v59 = vrot.slane %v6461_v16, %v10315_v11  ;;  %v4988_v60 = vrot.slane %v10774_v10, %v10284_v38 }
 0xac8   :  { %v6360_v33 = vrot.slane %v6346_v48, %v10315_v11  ;;  %v6484_v22 = vrot.slane %v6462_v6, %v10315_v11  ;;  %v4992_v50 = vrot.slane %v10774_v10, %v10287_v28  ;;  %v4996_v45 = vrot.slane %v10774_v10, %v10292_v3 }
 0xac9   :  { %v6491_v9 = vrot.slane %v6463_v13, %v10315_v11  ;;  %v6492_v42 = vcombine.low %v6470_v5, %v6477_v59  ;;  %v5000_v19 = vrot.slane %v10774_v10, %v10295_v55  ;;  %v5004_v27 = vrot.slane %v10774_v10, %v10299_v46 }
 0xaca   :  { %v6361_v23 = vcombine.low %v6353_v18, %v6360_v33  ;;  %v5008_v12 = vrot.slane %v10774_v10, %v10303_v40  ;;  %v5012_v7 = vrot.slane %v10774_v10, %v10308_v63  ;;  %v6362_v44 = vcombine.low %v4984_v30, %v4988_v60 }
 0xacb   :  { %v6493_v29 = vcombine.low %v6484_v22, %v6491_v9  ;;  %v6500_v49 = vrot.slane %v6492_v42, %v10315_v11  ;;  %v6363_v35 = vcombine.low %v4992_v50, %v4996_v45  ;;  %v6364_v31 = vcombine.low %v5000_v19, %v5004_v27 }
 0xacc   :  { %6962 = vperm.xlu0 %8247, %v6361_v23   ;;  %v6365_v52 = vcombine.low %v5008_v12, %v5012_v7  ;;  %v6372_v57 = vrot.slane %v6362_v44, %v10315_v11  ;;  %vm7092_vm13 = vcmask 917312   ;;  %vm7099_vm14 = vcmask 982912  }
 0xacd   :  { %v6507_v26 = vrot.slane %v6493_v29, %v10315_v11  ;;  %v6379_v8 = vrot.slane %v6363_v35, %v10315_v11  ;;  %v6386_v20 = vrot.slane %v6364_v31, %v10315_v11  ;;  %vm7106_vm15 = vcmask 1048512  }
 0xace   :  { %v6393_v17 = vrot.slane %v6365_v52, %v10315_v11  ;;  %vm7205_vm0 = vcmp.lt.s32.totalorder %v4241_v34, 256 }
 0xacf   :  { %v6508_v36 = vcombine.low %v6500_v49, %v6507_v26  ;;  %v6394_v10 = vcombine.low %v6372_v57, %v6379_v8 }
 0xad0   :  { %v6395_v25 = vcombine.low %v6386_v20, %v6393_v17 }
 0xad1   :  { %6971 = vperm.xlu0 %8247, %v6508_v36   ;;  %v6402_v24 = vrot.slane %v6394_v10, %v10315_v11  ;;  %v4224_v41 = vpop.xlane.xlu0 %4223 }
 0xad2   :  { %v6409_v0 = vrot.slane %v6395_v25, %v10315_v11  ;;  %v4271_v58 = vadd.f32 %v10279_v56, %v4224_v41 }
 0xad3   :  { %v4226_v14 = vpop.xlane.xlu1 %4225 }
 0xad4   :  { %v6410_v37 = vcombine.low %v6402_v24, %v6409_v0  ;;  %v4272_v61 = vadd.f32 %v10279_v56, %v4226_v14  ;;  %v5144_v2 = vrot.slane %v4271_v58, %v10274_v4  ;;  %v5148_v32 = vrot.slane %v4271_v58, %v10284_v38 }
 0xad5   :  { %v4220_v62 = vpop.xlane.xlu0 %4219  ;;  %v5152_v1 = vrot.slane %v4271_v58, %v10287_v28  ;;  %v5156_v51 = vrot.slane %v4271_v58, %v10292_v3  ;;  %v5160_v54 = vrot.slane %v4271_v58, %v10295_v55  ;;  %v5164_v39 = vrot.slane %v4271_v58, %v10299_v46 }
 0xad6   :  { %6965 = vperm.xlu0 %8247, %v6410_v37   ;;  %v4269_v47 = vadd.f32 %v10279_v56, %v4220_v62  ;;  %v5168_v43 = vrot.slane %v4271_v58, %v10303_v40  ;;  %v5172_v15 = vrot.slane %v4271_v58, %v10308_v63  ;;  %v6607_v53 = vcombine.low %v5144_v2, %v5148_v32 }
 0xad7   :  { %v6608_v16 = vcombine.low %v5152_v1, %v5156_v51  ;;  %v6609_v48 = vcombine.low %v5160_v54, %v5164_v39  ;;  %v5176_v13 = vrot.slane %v4272_v61, %v10274_v4  ;;  %v5180_v42 = vrot.slane %v4272_v61, %v10284_v38 }
 0xad8   :  { %v6610_v18 = vcombine.low %v5168_v43, %v5172_v15  ;;  %v6617_v6 = vrot.slane %v6607_v53, %v10315_v11  ;;  %v5080_v30 = vrot.slane %v4269_v47, %v10274_v4  ;;  %v5084_v33 = vrot.slane %v4269_v47, %v10284_v38 }
 0xad9   :  { %v4222_v5 = vpop.xlane.xlu0 %4221  ;;  %v6624_v59 = vrot.slane %v6608_v16, %v10315_v11  ;;  %v6631_v60 = vrot.slane %v6609_v48, %v10315_v11  ;;  %v5088_v22 = vrot.slane %v4269_v47, %v10287_v28  ;;  %v5092_v45 = vrot.slane %v4269_v47, %v10292_v3 }
 0xada   :  { %v6638_v50 = vrot.slane %v6610_v18, %v10315_v11  ;;  %v5096_v9 = vrot.slane %v4269_v47, %v10295_v55  ;;  %v5100_v27 = vrot.slane %v4269_v47, %v10299_v46  ;;  %v5104_v23 = vrot.slane %v4269_v47, %v10303_v40 }
 0xadb   :  { %v6639_v19 = vcombine.low %v6617_v6, %v6624_v59  ;;  %v5108_v12 = vrot.slane %v4269_v47, %v10308_v63  ;;  %v4270_v7 = vadd.f32 %v10279_v56, %v4222_v5  ;;  %v6509_v29 = vcombine.low %v5080_v30, %v5084_v33 }
 0xadc   :  { %v6640_v44 = vcombine.low %v6631_v60, %v6638_v50  ;;  %v6510_v49 = vcombine.low %v5088_v22, %v5092_v45  ;;  %v6511_v31 = vcombine.low %v5096_v9, %v5100_v27  ;;  %v5184_v57 = vrot.slane %v4272_v61, %v10287_v28 }
 0xadd   :  { %v6647_v35 = vrot.slane %v6639_v19, %v10315_v11  ;;  %v6512_v52 = vcombine.low %v5104_v23, %v5108_v12  ;;  %v6519_v8 = vrot.slane %v6509_v29, %v10315_v11  ;;  %v5188_v17 = vrot.slane %v4272_v61, %v10292_v3 }
 0xade   :  { %v6654_v26 = vrot.slane %v6640_v44, %v10315_v11  ;;  %v6526_v20 = vrot.slane %v6510_v49, %v10315_v11  ;;  %v6533_v36 = vrot.slane %v6511_v31, %v10315_v11  ;;  %v5192_v25 = vrot.slane %v4272_v61, %v10295_v55 }
 0xadf   :  { %v6540_v10 = vrot.slane %v6512_v52, %v10315_v11  ;;  %v5196_v24 = vrot.slane %v4272_v61, %v10299_v46  ;;  %v5200_v58 = vrot.slane %v4272_v61, %v10303_v40  ;;  %v5204_v37 = vrot.slane %v4272_v61, %v10308_v63 }
 0xae0   :  { %v6655_v41 = vcombine.low %v6647_v35, %v6654_v26  ;;  %v6541_v0 = vcombine.low %v6519_v8, %v6526_v20  ;;  %v6656_v2 = vcombine.low %v5176_v13, %v5180_v42  ;;  %v6657_v32 = vcombine.low %v5184_v57, %v5188_v17 }
 0xae1   :  { %v6542_v14 = vcombine.low %v6533_v36, %v6540_v10  ;;  %v6658_v1 = vcombine.low %v5192_v25, %v5196_v24  ;;  %v5112_v51 = vrot.slane %v4270_v7, %v10274_v4  ;;  %v5116_v54 = vrot.slane %v4270_v7, %v10284_v38 }
 0xae2   :  { %6980 = vperm.xlu0 %8247, %v6655_v41   ;;  %v6549_v62 = vrot.slane %v6541_v0, %v10315_v11  ;;  %v6659_v47 = vcombine.low %v5200_v58, %v5204_v37  ;;  %v6666_v43 = vrot.slane %v6656_v2, %v10315_v11  ;;  %v6673_v15 = vrot.slane %v6657_v32, %v10315_v11 }
 0xae3   :  { %v6556_v39 = vrot.slane %v6542_v14, %v10315_v11  ;;  %v6680_v53 = vrot.slane %v6658_v1, %v10315_v11  ;;  %v5120_v61 = vrot.slane %v4270_v7, %v10287_v28  ;;  %v5124_v16 = vrot.slane %v4270_v7, %v10292_v3 }
 0xae4   :  { %v6687_v18 = vrot.slane %v6659_v47, %v10315_v11  ;;  %v6688_v6 = vcombine.low %v6666_v43, %v6673_v15  ;;  %v5128_v30 = vrot.slane %v4270_v7, %v10295_v55  ;;  %v5132_v13 = vrot.slane %v4270_v7, %v10299_v46 }
 0xae5   :  { %v6557_v48 = vcombine.low %v6549_v62, %v6556_v39  ;;  %v5136_v5 = vrot.slane %v4270_v7, %v10303_v40  ;;  %v5140_v59 = vrot.slane %v4270_v7, %v10308_v63  ;;  %v6558_v60 = vcombine.low %v5112_v51, %v5116_v54 }
 0xae6   :  { %v6689_v33 = vcombine.low %v6680_v53, %v6687_v18  ;;  %v6696_v22 = vrot.slane %v6688_v6, %v10315_v11  ;;  %v6559_v50 = vcombine.low %v5120_v61, %v5124_v16  ;;  %v6560_v45 = vcombine.low %v5128_v30, %v5132_v13 }
 0xae7   :  { %6974 = vperm.xlu0 %8247, %v6557_v48   ;;  %v6561_v9 = vcombine.low %v5136_v5, %v5140_v59  ;;  %v6568_v42 = vrot.slane %v6558_v60, %v10315_v11 }
 0xae8   :  { %v6703_v19 = vrot.slane %v6689_v33, %v10315_v11  ;;  %v6575_v27 = vrot.slane %v6559_v50, %v10315_v11  ;;  %v6582_v23 = vrot.slane %v6560_v45, %v10315_v11 }
 0xae9   :  { %v6589_v12 = vrot.slane %v6561_v9, %v10315_v11 }
 0xaea   :  { %v6704_v44 = vcombine.low %v6696_v22, %v6703_v19  ;;  %v6590_v7 = vcombine.low %v6568_v42, %v6575_v27 }
 0xaeb   :  { %v6591_v29 = vcombine.low %v6582_v23, %v6589_v12 }
 0xaec   :  { %6983 = vperm.xlu0 %8247, %v6704_v44   ;;  %v6598_v49 = vrot.slane %v6590_v7, %v10315_v11 }
 0xaed   :  { %v6605_v35 = vrot.slane %v6591_v29, %v10315_v11 }
 0xaef   :  { %v6606_v31 = vcombine.low %v6598_v49, %v6605_v35 }
 0xaf1   :  { %6977 = vperm.xlu0 %8247, %v6606_v31  }
 0xaf2   :  { %v4232_v52 = vpop.xlane.xlu0 %4231 }
 0xaf3   :  { %v4275_v57 = vadd.f32 %v10279_v56, %v4232_v52 }
 0xaf5   :  { %v5272_v26 = vrot.slane %v4275_v57, %v10274_v4  ;;  %v5276_v8 = vrot.slane %v4275_v57, %v10284_v38  ;;  %v5280_v20 = vrot.slane %v4275_v57, %v10287_v28  ;;  %v5284_v17 = vrot.slane %v4275_v57, %v10292_v3 }
 0xaf6   :  { %v4228_v36 = vpop.xlane.xlu0 %4227  ;;  %v5288_v10 = vrot.slane %v4275_v57, %v10295_v55  ;;  %v5292_v25 = vrot.slane %v4275_v57, %v10299_v46  ;;  %v5296_v24 = vrot.slane %v4275_v57, %v10303_v40  ;;  %v5300_v41 = vrot.slane %v4275_v57, %v10308_v63 }
 0xaf7   :  { %v4273_v0 = vadd.f32 %v10279_v56, %v4228_v36  ;;  %v6803_v58 = vcombine.low %v5272_v26, %v5276_v8  ;;  %v6804_v14 = vcombine.low %v5280_v20, %v5284_v17 }
 0xaf8   :  { %v6805_v37 = vcombine.low %v5288_v10, %v5292_v25  ;;  %v6806_v2 = vcombine.low %v5296_v24, %v5300_v41 }
 0xaf9   :  { %v6813_v32 = vrot.slane %v6803_v58, %v10315_v11  ;;  %v6820_v62 = vrot.slane %v6804_v14, %v10315_v11  ;;  %v5208_v1 = vrot.slane %v4273_v0, %v10274_v4  ;;  %v5212_v51 = vrot.slane %v4273_v0, %v10284_v38 }
 0xafa   :  { %v6827_v54 = vrot.slane %v6805_v37, %v10315_v11  ;;  %v6834_v39 = vrot.slane %v6806_v2, %v10315_v11  ;;  %v5216_v47 = vrot.slane %v4273_v0, %v10287_v28  ;;  %v5220_v43 = vrot.slane %v4273_v0, %v10292_v3 }
 0xafb   :  { %v4230_v15 = vpop.xlane.xlu0 %4229  ;;  %v6835_v53 = vcombine.low %v6813_v32, %v6820_v62  ;;  %v5224_v61 = vrot.slane %v4273_v0, %v10295_v55  ;;  %v5228_v16 = vrot.slane %v4273_v0, %v10299_v46  ;;  %v5232_v6 = vrot.slane %v4273_v0, %v10303_v40 }
 0xafc   :  { %v4274_v48 = vadd.f32 %v10279_v56, %v4230_v15  ;;  %v6836_v18 = vcombine.low %v6827_v54, %v6834_v39  ;;  %v5236_v30 = vrot.slane %v4273_v0, %v10308_v63  ;;  %v6705_v5 = vcombine.low %v5208_v1, %v5212_v51 }
 0xafd   :  { %v6843_v13 = vrot.slane %v6835_v53, %v10315_v11  ;;  %v6706_v59 = vcombine.low %v5216_v47, %v5220_v43  ;;  %v6707_v60 = vcombine.low %v5224_v61, %v5228_v16 }
 0xafe   :  { %v6850_v33 = vrot.slane %v6836_v18, %v10315_v11  ;;  %v6708_v22 = vcombine.low %v5232_v6, %v5236_v30  ;;  %v5240_v50 = vrot.slane %v4274_v48, %v10274_v4  ;;  %v5244_v45 = vrot.slane %v4274_v48, %v10284_v38  ;;  %v6909_v30 = vpop.permute.xlu1 %6908 }
 0xaff   :  { %v6715_v9 = vrot.slane %v6705_v5, %v10315_v11  ;;  %v6722_v42 = vrot.slane %v6706_v59, %v10315_v11  ;;  %v6729_v19 = vrot.slane %v6707_v60, %v10315_v11  ;;  %v5248_v27 = vrot.slane %v4274_v48, %v10287_v28 }
 0xb00   :  { %v4234_v23 = vpop.xlane.xlu0 %4233  ;;  %v6851_v12 = vcombine.low %v6843_v13, %v6850_v33  ;;  %v6736_v44 = vrot.slane %v6708_v22, %v10315_v11  ;;  %v5252_v7 = vrot.slane %v4274_v48, %v10292_v3  ;;  %v5256_v29 = vrot.slane %v4274_v48, %v10295_v55 }
 0xb01   :  { %v4276_v49 = vadd.f32 %v10279_v56, %v4234_v23  ;;  %v6737_v35 = vcombine.low %v6715_v9, %v6722_v42  ;;  %v5260_v31 = vrot.slane %v4274_v48, %v10299_v46  ;;  %v5264_v57 = vrot.slane %v4274_v48, %v10303_v40 }
 0xb02   :  { %6992 = vperm.xlu0 %8247, %v6851_v12   ;;  %v6738_v52 = vcombine.low %v6729_v19, %v6736_v44  ;;  %v5268_v26 = vrot.slane %v4274_v48, %v10308_v63  ;;  %v6754_v8 = vcombine.low %v5240_v50, %v5244_v45  ;;  %v6755_v17 = vcombine.low %v5248_v27, %v5252_v7  ;;  %v6912_v13 = vpop.permute.xlu1 %6911 }
 0xb03   :  { %v6745_v20 = vrot.slane %v6737_v35, %v10315_v11  ;;  %v6756_v36 = vcombine.low %v5256_v29, %v5260_v31  ;;  %v5304_v10 = vrot.slane %v4276_v49, %v10274_v4  ;;  %v5308_v41 = vrot.slane %v4276_v49, %v10284_v38 }
 0xb04   :  { %v6752_v25 = vrot.slane %v6738_v52, %v10315_v11  ;;  %v6757_v24 = vcombine.low %v5264_v57, %v5268_v26  ;;  %v6764_v56 = vrot.slane %v6754_v8, %v10315_v11  ;;  %v6771_v0 = vrot.slane %v6755_v17, %v10315_v11 }
 0xb05   :  { %v6778_v58 = vrot.slane %v6756_v36, %v10315_v11  ;;  %v5312_v14 = vrot.slane %v4276_v49, %v10287_v28  ;;  %v5316_v37 = vrot.slane %v4276_v49, %v10292_v3  ;;  %v5320_v4 = vrot.slane %v4276_v49, %v10295_v55 }
 0xb06   :  { %v6753_v2 = vcombine.low %v6745_v20, %v6752_v25  ;;  %v6785_v32 = vrot.slane %v6757_v24, %v10315_v11  ;;  %v6786_v62 = vcombine.low %v6764_v56, %v6771_v0  ;;  %v5324_v1 = vrot.slane %v4276_v49, %v10299_v46  ;;  %v6906_v5 = vpop.permute.xlu1 %6905 }
 0xb07   :  { %v5328_v51 = vrot.slane %v4276_v49, %v10303_v40  ;;  %v5332_v38 = vrot.slane %v4276_v49, %v10308_v63  ;;  %v6852_v39 = vcombine.low %v5304_v10, %v5308_v41  ;;  %v6853_v47 = vcombine.low %v5312_v14, %v5316_v37 }
 0xb08   :  { %6986 = vperm.xlu0 %8247, %v6753_v2   ;;  %v6787_v54 = vcombine.low %v6778_v58, %v6785_v32  ;;  %v6794_v28 = vrot.slane %v6786_v62, %v10315_v11  ;;  %v6854_v43 = vcombine.low %v5320_v4, %v5324_v1  ;;  %v11035_v7 = vand.u32 127, %v4241_v34 }
 0xb09   :  { %v6855_v3 = vcombine.low %v5328_v51, %v5332_v38  ;;  %v6862_v53 = vrot.slane %v6852_v39, %v10315_v11  ;;  %v6869_v55 = vrot.slane %v6853_v47, %v10315_v11 }
 0xb0a   :  { %v6801_v15 = vrot.slane %v6787_v54, %v10315_v11  ;;  %v6876_v46 = vrot.slane %v6854_v43, %v10315_v11  ;;  %v11020_v59 = vpop.permute.xlu1 %6920  ;;  %v7003_v35 = vadd.s32 4294967288, %v11035_v7  ;;  %v7001_v31 = vsub.s32 %v11035_v7, %v10271_v21 }
 0xb0b   :  { %v6883_v40 = vrot.slane %v6855_v3, %v10315_v11  ;;  %v6884_v63 = vcombine.low %v6862_v53, %v6869_v55  ;;  %v7010_v57 = vadd.s32 4294967280, %v11035_v7  ;;  %v7017_v20 = vadd.s32 4294967272, %v11035_v7 }
 0xb0c   :  { %v6802_v61 = vcombine.low %v6794_v28, %v6801_v15  ;;  %v7006_v8 = vsub.s32 %v7003_v35, %v10271_v21  ;;  %v7024_v24 = vadd.s32 4294967264, %v11035_v7  ;;  %v7031_v14 = vadd.s32 4294967256, %v11035_v7 }
 0xb0d   :  { %v6885_v16 = vcombine.low %v6876_v46, %v6883_v40  ;;  %v6892_v48 = vrot.slane %v6884_v63, %v10315_v11  ;;  %v7013_v36 = vsub.s32 %v7010_v57, %v10271_v21  ;;  %v7020_v41 = vsub.s32 %v7017_v20, %v10271_v21 }
 0xb0e   :  { %6989 = vperm.xlu0 %8247, %v6802_v61   ;;  %v6915_v60 = vpop.permute.xlu1 %6914  ;;  %v7007_v10 = vrot.slane %v6906_v5, %v7006_v8  ;;  %v7027_v2 = vsub.s32 %v7024_v24, %v10271_v21  ;;  %v7038_v62 = vadd.s32 4294967248, %v11035_v7  ;;  %v7034_v38 = vsub.s32 %v7031_v14, %v10271_v21 }
 0xb0f   :  { %v6899_v18 = vrot.slane %v6885_v16, %v10315_v11  ;;  %v7014_v58 = vrot.slane %v6909_v30, %v7013_v36  ;;  %v7021_v4 = vrot.slane %v6912_v13, %v7020_v41  ;;  %v7045_v28 = vadd.s32 4294967240, %v11035_v7 }
 0xb10   :  { %v7028_v47 = vrot.slane %v6915_v60, %v7027_v2  ;;  %v7041_v3 = vsub.s32 %v7038_v62, %v10271_v21  ;;  %v7087_v24 = vadd.s32 4294967192, %v11035_v7 }
 0xb11   :  { %v6900_v6 = vcombine.low %v6892_v48, %v6899_v18  ;;  %v7048_v48 = vsub.s32 %v7045_v28, %v10271_v21  ;;  %v7052_v18 = vadd.s32 4294967232, %v11035_v7 }
 0xb12   :  { %v11022_v22 = vpop.permute.xlu1 %6923  ;;  %v7042_v5 = vrot.slane %v11020_v59, %v7041_v3 }
 0xb13   :  { %6995 = vperm.xlu0 %8247, %v6900_v6   ;;  %v7059_v6 = vadd.s32 4294967224, %v11035_v7  ;;  %v7049_v35 = vrot.slane %v11022_v22, %v7048_v48  ;;  %v7073_v22 = vadd.s32 4294967208, %v11035_v7 }
 0xb14   :  { %v6903_v33 = vpop.permute.xlu0 %6902 }
 0xb15   :  { %v7002_v17 = vrot.slane %v6903_v33, %v7001_v31  ;;  %v7062_v57 = vsub.s32 %v7059_v6, %v10271_v21 }
 0xb16   :  { %v6918_v45 = vpop.permute.xlu1 %6917 }
 0xb17   :  { %v7009_v0 = vsel %vm7008_vm1, %v7007_v10, %v7002_v17  ;;  %v7035_v40 = vrot.slane %v6918_v45, %v7034_v38  ;;  %v7055_v45 = vsub.s32 %v7052_v18, %v10271_v21  ;;  %v7080_v10 = vadd.s32 4294967200, %v11035_v7 }
 0xb18   :  { %v7016_v32 = vsel %vm7015_vm2, %v7014_v58, %v7009_v0  ;;  %v7094_v0 = vadd.s32 4294967184, %v11035_v7 }
 0xb19   :  { %v7023_v54 = vsel %vm7022_vm3, %v7021_v4, %v7016_v32  ;;  %v7076_v4 = vsub.s32 %v7073_v22, %v10271_v21 }
 0xb1a   :  { %v11026_v19 = vpop.permute.xlu1 %6932  ;;  %v7030_v53 = vsel %vm7029_vm4, %v7028_v47, %v7023_v54  ;;  %v7097_v54 = vsub.s32 %v7094_v0, %v10271_v21 }
 0xb1b   :  { %v7037_v30 = vsel %vm7036_vm5, %v7035_v40, %v7030_v53 }
 0xb1c   :  { %v6957_v50 = vpop.permute.xlu0 %6956 }
 0xb1d   :  { %v7120_v43 = vrot.slane %v6957_v50, %v7013_v36 }
 0xb1e   :  { %v11028_v23 = vpop.permute.xlu1 %6926 }
 0xb1f   :  { %v7056_v36 = vrot.slane %v11028_v23, %v7055_v45  ;;  %v7101_v23 = vadd.s32 4294967176, %v11035_v7 }
 0xb22   :  { %v11032_v44 = vpop.permute.xlu1 %6935 }
 0xb23   :  { %v7077_v53 = vrot.slane %v11032_v44, %v7076_v4 }
 0xb26   :  { %v6960_v9 = vpop.permute.xlu0 %6959  ;;  %v11037_v49 = vpop.permute.xlu1 %6929 }
 0xb27   :  { %v7125_v61 = vrot.slane %v6960_v9, %v7020_v41  ;;  %v7044_v9 = vsel %vm7043_vm6, %v7042_v5, %v7037_v30  ;;  %v7063_v14 = vrot.slane %v11037_v49, %v7062_v57  ;;  %v7104_v49 = vsub.s32 %v7101_v23, %v10271_v21 }
 0xb2a   :  { %v6951_v26 = vpop.permute.xlu1 %6950 }
 0xb2b   :  { %v7111_v1 = vrot.slane %v6951_v26, %v7001_v31  ;;  %v7066_v31 = vadd.s32 4294967216, %v11035_v7 }
 0xb2e   :  { %v6954_v56 = vpop.permute.xlu1 %6953 }
 0xb2f   :  { %v7115_v37 = vrot.slane %v6954_v56, %v7006_v8  ;;  %v7051_v8 = vsel %vm7050_vm7, %v7049_v35, %v7044_v9 }
 0xb31   :  { %v7116_v39 = vsel %vm7008_vm1, %v7115_v37, %v7111_v1  ;;  %v7090_v1 = vsub.s32 %v7087_v24, %v10271_v21 }
 0xb32   :  { %v7121_v15 = vsel %vm7015_vm2, %v7120_v43, %v7116_v39  ;;  %v11066_v55 = vpop.permute.xlu1 %6938 }
 0xb33   :  { %v7126_v13 = vsel %vm7022_vm3, %v7125_v61, %v7121_v15 }
 0xb45   :  { %v11024_v42 = vpop.permute.xlu0 %6968 }
 0xb4b   :  { %v6963_v27 = vpop.permute.xlu0 %6962 }
 0xb4c   :  { %v7130_v46 = vrot.slane %v6963_v27, %v7027_v2  ;;  %v6942_v27 = vpop.permute.xlu1 %6941  ;;  %v7083_v2 = vsub.s32 %v7080_v10, %v10271_v21 }
 0xb4e   :  { %v7131_v60 = vsel %vm7029_vm4, %v7130_v46, %v7126_v13  ;;  %v7091_v46 = vrot.slane %v6942_v27, %v7090_v1 }
 0xb50   :  { %v11030_v12 = vpop.permute.xlu0 %6971  ;;  %v6945_v58 = vpop.permute.xlu1 %6944 }
 0xb51   :  { %v7145_v20 = vrot.slane %v11030_v12, %v7048_v48  ;;  %v7098_v40 = vrot.slane %v6945_v58, %v7097_v54 }
 0xb55   :  { %v6966_v29 = vpop.permute.xlu0 %6965 }
 0xb56   :  { %v7135_v63 = vrot.slane %v6966_v29, %v7034_v38  ;;  %v7140_v29 = vrot.slane %v11024_v42, %v7041_v3  ;;  %v7069_v42 = vsub.s32 %v7066_v31, %v10271_v21  ;;  %v6948_v3 = vpop.permute.xlu1 %6947 }
 0xb57   :  { %v7105_v21 = vrot.slane %v6948_v3, %v7104_v49 }
 0xb58   :  { %v7136_v33 = vsel %vm7036_vm5, %v7135_v63, %v7131_v60  ;;  %v7070_v38 = vrot.slane %v11026_v19, %v7069_v42 }
 0xb59   :  { %v7141_v26 = vsel %vm7043_vm6, %v7140_v29, %v7136_v33 }
 0xb5a   :  { %v7146_v56 = vsel %vm7050_vm7, %v7145_v20, %v7141_v26 }
 0xb61   :  { %v11042_v52 = vpop.permute.xlu0 %6980 }
 0xb62   :  { %v7160_v32 = vrot.slane %v11042_v52, %v7069_v42  ;;  %v7084_v52 = vrot.slane %v11066_v55, %v7083_v2 }
 0xb66   :  { %v11048_v25 = vpop.permute.xlu0 %6974 }
 0xb67   :  { %v7150_v59 = vrot.slane %v11048_v25, %v7055_v45  ;;  %v7058_v25 = vsel %vm7057_vm8, %v7056_v36, %v7051_v8 }
 0xb68   :  { %v7065_v62 = vsel %vm7064_vm9, %v7063_v14, %v7058_v25 }
 0xb69   :  { %v7151_v12 = vsel %vm7057_vm8, %v7150_v59, %v7146_v56  ;;  %v7072_v43 = vsel %vm7071_vm10, %v7070_v38, %v7065_v62 }
 0xb6a   :  { %v7079_v63 = vsel %vm7078_vm11, %v7077_v53, %v7072_v43 }
 0xb6b   :  { %v11057_v51 = vpop.permute.xlu0 %6983 }
 0xb6c   :  { %v7165_v7 = vrot.slane %v11057_v51, %v7076_v4  ;;  %v7086_v51 = vsel %vm7085_vm12, %v7084_v52, %v7079_v63 }
 0xb6d   :  { %v7093_v55 = vsel %vm7092_vm13, %v7091_v46, %v7086_v51 }
 0xb6e   :  { %v7100_v30 = vsel %vm7099_vm14, %v7098_v40, %v7093_v55 }
 0xb6f   :  { %v7107_v44 = vsel %vm7106_vm15, %v7105_v21, %v7100_v30 }
 0xb70   :  { %v6978_v16 = vpop.permute.xlu0 %6977 }
 0xb71   :  { %v7155_v17 = vrot.slane %v6978_v16, %v7062_v57 }
 0xb73   :  { %v7156_v37 = vsel %vm7064_vm9, %v7155_v17, %v7151_v12 }
 0xb74   :  { %v7161_v39 = vsel %vm7071_vm10, %v7160_v32, %v7156_v37 }
 0xb75   :  { %v7166_v19 = vsel %vm7078_vm11, %v7165_v7, %v7161_v39 }
 0xb81   :  { %v11074_v50 = vpop.permute.xlu0 %6992 }
 0xb82   :  { %v7180_v48 = vrot.slane %v11074_v50, %v7097_v54 }
 0xb87   :  { %v6987_v41 = vpop.permute.xlu0 %6986 }
 0xb88   :  { %v7170_v47 = vrot.slane %v6987_v41, %v7083_v2 }
 0xb8a   :  { %v7171_v61 = vsel %vm7085_vm12, %v7170_v47, %v7166_v19 }
 0xb8d   :  { %v6990_v28 = vpop.permute.xlu0 %6989 }
 0xb8e   :  { %v7175_v15 = vrot.slane %v6990_v28, %v7090_v1 }
 0xb90   :  { %v7176_v16 = vsel %vm7092_vm13, %v7175_v15, %v7171_v61 }
 0xb91   :  { %v7181_v13 = vsel %vm7099_vm14, %v7180_v48, %v7176_v16 }
 0xb92   :  { %v6996_v18 = vpop.permute.xlu0 %6995 }
 0xb93   :  { %v7185_v6 = vrot.slane %v6996_v18, %v7104_v49 }
 0xb95   :  { %v7186_v5 = vsel %vm7106_vm15, %v7185_v6, %v7181_v13 }
 0xb96   :  { %v7187_v60 = vcombine.low %v7107_v44, %v7186_v5 }
 0xb98   :  { %v7194_v33 = vrot.slane %v7187_v60, %v10315_v11 }
 0xb9a   :  { %v7201_v45 = vrot.slane %v7194_v33, %v10315_v11 }
 0xb9c   :  { %7207 = vst.msk [vmem:[#allocation6] sm:$0x3] %vm7205_vm0, %v7201_v45 }
 0xb9d   :  { %8379 = shalt.err (!%p8376_p12)
}
 0xb9e   :  { %s8380_s10 = scalar_lea.hbm %s11130_s11, 32 }
 0xb9f   :  { %p8381_p13 = scmp.ne.s32.totalorder %s11130_s11, %s8380_s10  ;;  %p8384_p0 = scmp.lt.u32.totalorder %s8380_s10, %s11130_s11 }
 0xba1   :  { %p8386_p1 = pnand %p8384_p0, %p8381_p13 }
 0xba3   :  { %8389 = shalt.err (!%p8386_p1)
}
 0xba4   :  { %7217 = dma.vmem_to_hbm [thread:$0]  %s7215_s25, 32, %s11130_s11, [#allocation5]  }
 0xba5   :  { %8392 = dma.done.wait [#allocation5], 32  }
 0xba6   :  { %8393 = vsyncadd [#allocation5], 4294967264 }
 0xba7   :  { %7221 = vsyncpa [#allocation4], 1 }
 0xba8   :  { %7222 = vsyncpa [#allocation5], 1 }

</bundles_post_ra>
